<compile_context>
chip_gen: v7x
topology: tpu7x:2x2x1
jax: 0.10.0
libtpu: 0.0.40
codegen_flags: <defaults>
</compile_context>

<pallas_src>
import functools

import jax
import jax.numpy as jnp
import numpy as np
from jax.experimental import pallas as pl
from jax.experimental.pallas import tpu as pltpu

_LN_EPS = 1e-5                        # PyTorch nn.LayerNorm default
_VMEM_LIMIT = 48 * 1024 * 1024        # > 16/32 MiB scoped defaults, < v7x 64 MiB physical


def _sigmoid(x):
    return 1.0 / (1.0 + jnp.exp(-x))


def _gelu_tanh(x):
    # TODO(synk): PyTorch F.gelu default is the exact erf form; tanh approximation used here.
    c = 0.7978845608028654  # sqrt(2/pi)
    return 0.5 * x * (1.0 + jnp.tanh(c * (x + 0.044715 * x * x * x)))


def _layer_norm(x, gamma, beta):
    mean = jnp.mean(x, axis=-1, keepdims=True)
    var = jnp.mean(jnp.square(x - mean), axis=-1, keepdims=True)
    return (x - mean) * jax.lax.rsqrt(var + _LN_EPS) * gamma + beta


def _pick_tile(total, target, multiple):
    """Largest divisor of `total` that is a multiple of `multiple` and <= target.
    Falls back to the full extent (always legal for the (8,128) block constraint)."""
    target = max(target, multiple)
    best = None
    d = multiple
    while d <= min(target, total):
        if total % d == 0:
            best = d
        d += multiple
    return total if best is None else best


# --------------------------------------------------------------------------------------
# Kernel A: multi-head attention with a single (last) query row per batch element.
# Grid: S tiles ("arbitrary" reduction). Online softmax in resident, lane-dense f32
# scratch. K/V projection is one batch-packed [B*tS, H] x [H, 2H] MXU matmul; the
# q-length-1 score/PV contractions use VPU multiplies + reductions (MXU M=1 is waste).
# --------------------------------------------------------------------------------------
def _last_query_attn_kernel(q_last_ref, x_ref, wq_ref, bq_ref, wkv_ref, bkv_ref,
                            wo_ref, bo_ref, out_ref,
                            q_scr, m_scr, l_scr, acc_scr, *, n_heads):
    s = pl.program_id(0)
    B, tS, H = x_ref.shape
    hd = H // n_heads

    @pl.when(s == 0)
    def _init():
        # Project the single last-query row once (Wq already carries 1/sqrt(hd)).
        q_scr[...] = (jnp.dot(q_last_ref[...], wq_ref[...],
                              preferred_element_type=jnp.float32) + bq_ref[...])
        m_scr[...] = jnp.full_like(m_scr, -jnp.inf)
        l_scr[...] = jnp.zeros_like(l_scr)
        acc_scr[...] = jnp.zeros_like(acc_scr)

    # Packed K|V projection: single MXU matmul per tile.
    x_flat = x_ref[...].reshape(B * tS, H)
    kv = (jnp.dot(x_flat, wkv_ref[...], preferred_element_type=jnp.float32)
          + bkv_ref[...]).reshape(B, tS, 2 * H)

    q_all = q_scr[...]                 # [B, H]   f32 (pre-scaled)
    m_prev = m_scr[...]                # [B, nH]
    l_prev = l_scr[...]
    acc_prev = acc_scr[...]            # [B, H]

    m_new, l_new, acc_new = [], [], []
    for n in range(n_heads):           # static unroll over heads
        ksl = slice(n * hd, (n + 1) * hd)
        vsl = slice(H + n * hd, H + (n + 1) * hd)
        # Scores: VPU multiply + lane reduce (q length is 1 -> no MXU).
        s_n = jnp.sum(q_all[:, None, ksl] * kv[:, :, ksl], axis=-1)        # [B, tS]
        m_p = m_prev[:, n:n + 1]
        m_n = jnp.maximum(m_p, jnp.max(s_n, axis=-1, keepdims=True))       # [B, 1]
        alpha = jnp.exp(m_p - m_n)
        p = jnp.exp(s_n - m_n)                                             # [B, tS]
        l_new.append(alpha * l_prev[:, n:n + 1] + jnp.sum(p, axis=-1, keepdims=True))
        pv = jnp.sum(p[:, :, None] * kv[:, :, vsl], axis=1)                # [B, hd]
        acc_new.append(alpha * acc_prev[:, ksl] + pv)
        m_new.append(m_n)

    # Lane-dense accumulators: one full-width write per scratch buffer.
    m_scr[...] = jnp.concatenate(m_new, axis=-1)
    l_scr[...] = jnp.concatenate(l_new, axis=-1)
    acc_scr[...] = jnp.concatenate(acc_new, axis=-1)

    @pl.when(s == pl.num_programs(0) - 1)
    def _finalize():
        inv_l = pl.reciprocal(l_scr[...], approx=True)                     # [B, nH]
        acc = acc_scr[...]
        ctx = jnp.concatenate(
            [acc[:, n * hd:(n + 1) * hd] * inv_l[:, n:n + 1] for n in range(n_heads)],
            axis=-1)                                                       # [B, H]
        out_ref[...] = (jnp.dot(ctx.astype(wo_ref.dtype), wo_ref[...],
                                preferred_element_type=jnp.float32)
                        + bo_ref[...]).astype(out_ref.dtype)


# --------------------------------------------------------------------------------------
# Kernel B: gates_x = ( LN2( X + FFN( LN1( X + attn_broadcast ) ) ) ) @ W_ih + b_lstm,
# per S tile ("parallel"). The LSTM input projection is hoisted here as one batch-packed
# matmul; the output is time-major [S, B, 4H] (4H lane-dense) for the LSTM kernel.
# --------------------------------------------------------------------------------------
def _post_attn_ffn_lstm_in_kernel(x_ref, attn_ref, g1_ref, bn1_ref, w1_ref, b1_ref,
                                  w2_ref, b2_ref, g2_ref, bn2_ref,
                                  wih_ref, blstm_ref, gx_ref):
    B, tS, H = x_ref.shape
    x = x_ref[...].astype(jnp.float32)
    a = attn_ref[...]                                          # [B, H] f32 (last-query attn)
    h1 = _layer_norm(x + a[:, None, :], g1_ref[0], bn1_ref[0])             # residual + LN1
    hf = h1.reshape(B * tS, H).astype(w1_ref.dtype)                        # batch-pack rows
    f = jnp.dot(hf, w1_ref[...], preferred_element_type=jnp.float32) + b1_ref[...]
    f = _gelu_tanh(f)
    f = jnp.dot(f.astype(w2_ref.dtype), w2_ref[...],
                preferred_element_type=jnp.float32) + b2_ref[...]
    h2 = _layer_norm(x + f.reshape(B, tS, H), g2_ref[0], bn2_ref[0])       # residual + LN2
    # Hoisted LSTM input projection.  Transpose BEFORE the [*,4H] matmul so the relayout
    # stays H-wide and the matmul already emits the time-major order kernel C consumes.
    h2_tm = jnp.transpose(h2, (1, 0, 2)).reshape(tS * B, H).astype(wih_ref.dtype)
    gx = jnp.dot(h2_tm, wih_ref[...], preferred_element_type=jnp.float32) + blstm_ref[...]
    gx_ref[...] = gx.reshape(tS, B, 4 * H).astype(gx_ref.dtype)


# --------------------------------------------------------------------------------------
# Kernel C: LSTM recurrence chunked over S (grid "arbitrary", t_tile steps per grid step,
# statically unrolled so W_hh stays resident) with the final fc (H -> 1) folded in as a
# lane reduction over the whole chunk; preds written as one dense [t_tile, B] slab.
# --------------------------------------------------------------------------------------
def _lstm_fc_kernel(gx_ref, whh_ref, wfc_ref, bfc_ref, preds_ref, h_scr, c_scr):
    tc = pl.program_id(0)
    tT, B, _ = gx_ref.shape
    H = h_scr.shape[-1]

    @pl.when(tc == 0)
    def _init():
        h_scr[...] = jnp.zeros_like(h_scr)
        c_scr[...] = jnp.zeros_like(c_scr)

    h = h_scr[...]                               # f32 carries across the chunk
    c = c_scr[...]
    whh = whh_ref[...]
    hs = []
    for t in range(tT):                          # static unroll over the timestep chunk
        gates = gx_ref[t].astype(jnp.float32) + jnp.dot(
            h.astype(whh.dtype), whh, preferred_element_type=jnp.float32)  # [B, 4H] i,f,g,o
        i = _sigmoid(gates[:, 0:H])
        f = _sigmoid(gates[:, H:2 * H])
        g = jnp.tanh(gates[:, 2 * H:3 * H])
        o = _sigmoid(gates[:, 3 * H:4 * H])
        c = f * c + i * g
        h = o * jnp.tanh(c)
        hs.append(h)
    h_scr[...] = h
    c_scr[...] = c
    hs = jnp.stack(hs, axis=0)                                             # [tT, B, H]
    preds_ref[...] = (jnp.sum(hs * wfc_ref[...][None], axis=-1)
                      + bfc_ref[0, 0]).astype(preds_ref.dtype)


# --------------------------------------------------------------------------------------
# Wrapper
# --------------------------------------------------------------------------------------
def last_query_forward(X, params, *, n_heads, s_tile=None, t_tile=None,
                       compute_dtype=jnp.bfloat16):
    """Pallas forward for LastQuery starting from the hidden states X [B, S, H].

    compute_dtype: dtype of X / weight operands fed to the MXU (accumulation is always
    f32); bf16 halves HBM traffic and runs the MXU at native rate.  Use jnp.float32
    for bit-closer parity with the f32 PyTorch reference.
    """
    # TODO(synk): ModelBase embedding/projection front-end is not implemented here
    # (the spec's ModelBase.forward returns None and its signature is inconsistent);
    # X is taken as the already-embedded hidden states.
    B, S, H = X.shape
    assert H % n_heads == 0
    hd = H // n_heads
    f32 = jnp.float32
    cdt = compute_dtype

    # Tile selection: s_tile must be a multiple of 8 (or full S); target ~512 packed rows
    # per projection matmul.  t_tile is the preds-block sublane dim (multiple of 8); ~32
    # steps per grid step amortize the per-step pipeline overhead.  Halve targets on v7x
    # (64 MiB VMEM) if tiles get large.
    if s_tile is None:
        s_tile = _pick_tile(S, max(8, 512 // max(B, 1)), 8)
    if t_tile is None:
        t_tile = _pick_tile(S, 32, 8)
    assert S % s_tile == 0 and S % t_tile == 0
    n_s = S // s_tile

    # Fold the external q/k/v Linears with the MultiheadAttention in-projection:
    #   (x @ W_ext + b_ext) @ W_in + b_in == x @ (W_ext W_in) + (b_ext W_in + b_in)
    # fold the 1/sqrt(hd) softmax scale into Wq/bq, and pack Wk|Wv into one [H, 2H].
    scale = 1.0 / float(np.sqrt(hd))
    wq = (params['wq'] @ params['wq_in']) * scale
    bq = (params['bq'] @ params['wq_in'] + params['bq_in']) * scale
    wk = params['wk'] @ params['wk_in']
    bk = params['bk'] @ params['wk_in'] + params['bk_in']
    wv = params['wv'] @ params['wv_in']
    bv = params['bv'] @ params['wv_in'] + params['bv_in']
    wkv = jnp.concatenate([wk, wv], axis=1)
    bkv = jnp.concatenate([bk, bv], axis=0)
    b_lstm = params['b_ih'] + params['b_hh']

    row = lambda v: v.reshape(1, -1).astype(f32)          # small biases / LN params stay f32
    full = lambda shp: pl.BlockSpec(shp, lambda *_: (0,) * len(shp))

    Xc = X.astype(cdt)                 # bf16 at the call boundary: half the HBM DMA bytes
    q_last = Xc[:, -1, :]              # only the last query row is ever needed

    # ---------------- Kernel A: last-query multi-head attention ----------------
    attn_out = pl.pallas_call(
        functools.partial(_last_query_attn_kernel, n_heads=n_heads),
        out_shape=jax.ShapeDtypeStruct((B, H), f32),
        grid_spec=pltpu.PrefetchScalarGridSpec(
            num_scalar_prefetch=0,
            grid=(n_s,),
            in_specs=[
                full((B, H)),                                        # q_last
                pl.BlockSpec((B, s_tile, H), lambda s: (0, s, 0)),   # X tile over S
                full((H, H)), full((1, H)),                          # Wq, bq (folded + scaled)
                full((H, 2 * H)), full((1, 2 * H)),                  # Wk|Wv, bk|bv (packed)
                full((H, H)), full((1, H)),                          # W_out, b_out
            ],
            out_specs=pl.BlockSpec((B, H), lambda s: (0, 0)),        # resident [B, H]
            scratch_shapes=[
                pltpu.VMEM((B, H), f32),                             # projected q
                pltpu.VMEM((B, n_heads), f32),                       # running max
                pltpu.VMEM((B, n_heads), f32),                       # running denom
                pltpu.VMEM((B, H), f32),                             # running numerator
            ]),
        compiler_params=pltpu.CompilerParams(
            dimension_semantics=("arbitrary",),                      # online-softmax reduction
            vmem_limit_bytes=_VMEM_LIMIT),
    )(q_last, Xc,
      wq.astype(cdt), row(bq), wkv.astype(cdt), row(bkv),
      params['wo'].astype(cdt), row(params['bo']))

    # ---- Kernel B: LN1 / FFN / LN2 + hoisted LSTM input projection (time-major gates) ----
    gates_x = pl.pallas_call(
        _post_attn_ffn_lstm_in_kernel,
        out_shape=jax.ShapeDtypeStruct((S, B, 4 * H), cdt),
        grid_spec=pltpu.PrefetchScalarGridSpec(
            num_scalar_prefetch=0,
            grid=(n_s,),
            in_specs=[
                pl.BlockSpec((B, s_tile, H), lambda s: (0, s, 0)),   # X tile
                full((B, H)),                                        # attention output
                full((1, H)), full((1, H)),                          # LN1 gamma/beta
                full((H, H)), full((1, H)),                          # FFN W1, b1
                full((H, H)), full((1, H)),                          # FFN W2, b2
                full((1, H)), full((1, H)),                          # LN2 gamma/beta
                full((H, 4 * H)), full((1, 4 * H)),                  # LSTM W_ih, b_ih + b_hh
            ],
            out_specs=pl.BlockSpec((s_tile, B, 4 * H), lambda s: (s, 0, 0))),
        compiler_params=pltpu.CompilerParams(
            dimension_semantics=("parallel",),                       # independent S tiles
            vmem_limit_bytes=_VMEM_LIMIT),
    )(Xc, attn_out,
      row(params['g1']), row(params['beta1']),
      params['w1'].astype(cdt), row(params['b1']),
      params['w2'].astype(cdt), row(params['b2']),
      row(params['g2']), row(params['beta2']),
      params['w_ih'].astype(cdt), row(b_lstm))

    # ---------------- Kernel C: chunked LSTM recurrence + final fc ----------------
    preds_tm = pl.pallas_call(
        _lstm_fc_kernel,
        out_shape=jax.ShapeDtypeStruct((S, B), f32),
        grid_spec=pltpu.PrefetchScalarGridSpec(
            num_scalar_prefetch=0,
            grid=(S // t_tile,),
            in_specs=[
                pl.BlockSpec((t_tile, B, 4 * H), lambda t: (t, 0, 0)),   # precomputed x-gates
                full((H, 4 * H)),                                        # W_hh
                full((1, H)),                                            # fc weight
                pl.BlockSpec(memory_space=pltpu.MemorySpace.SMEM),       # fc bias (scalar)
            ],
            out_specs=pl.BlockSpec((t_tile, B), lambda t: (t, 0)),
            scratch_shapes=[pltpu.VMEM((B, H), f32),                     # h state
                            pltpu.VMEM((B, H), f32)]),                   # c state
        compiler_params=pltpu.CompilerParams(
            dimension_semantics=("arbitrary",),                          # sequential recurrence
            vmem_limit_bytes=_VMEM_LIMIT),
    )(gates_x, params['w_hh'].astype(cdt),
      params['w_fc'].astype(f32), params['b_fc'].reshape(1, 1).astype(f32))

    # forward() returns raw logits (self.activation is never applied)
    return preds_tm.T                                                    # [B, S]


# --------------------------------------------------------------------------------------
# Pure-JAX reference (mirrors the PyTorch forward, starting from X; f32 throughout)
# --------------------------------------------------------------------------------------
def _reference_forward(X, params, *, n_heads):
    B, S, H = X.shape
    hd = H // n_heads
    q = X[:, -1, :] @ params['wq'] + params['bq']
    k = X @ params['wk'] + params['bk']
    v = X @ params['wv'] + params['bv']
    q = q @ params['wq_in'] + params['bq_in']
    k = k @ params['wk_in'] + params['bk_in']
    v = v @ params['wv_in'] + params['bv_in']
    qh = q.reshape(B, n_heads, hd)
    kh = k.reshape(B, S, n_heads, hd)
    vh = v.reshape(B, S, n_heads, hd)
    scores = jnp.einsum('bnd,bsnd->bns', qh, kh) / np.sqrt(hd)
    w = jax.nn.softmax(scores, axis=-1)
    ctx = jnp.einsum('bns,bsnd->bnd', w, vh).reshape(B, H)
    attn = ctx @ params['wo'] + params['bo']
    h1 = _layer_norm(X + attn[:, None, :], params['g1'], params['beta1'])
    f = _gelu_tanh(h1 @ params['w1'] + params['b1']) @ params['w2'] + params['b2']
    h2 = _layer_norm(X + f, params['g2'], params['beta2'])
    b_lstm = params['b_ih'] + params['b_hh']

    def step(carry, x_t):
        h, c = carry
        gates = x_t @ params['w_ih'] + h @ params['w_hh'] + b_lstm
        i = _sigmoid(gates[:, 0:H])
        fg = _sigmoid(gates[:, H:2 * H])
        g = jnp.tanh(gates[:, 2 * H:3 * H])
        o = _sigmoid(gates[:, 3 * H:4 * H])
        c = fg * c + i * g
        h = o * jnp.tanh(c)
        return (h, c), h

    x_tm = jnp.transpose(h2, (1, 0, 2))
    (_, _), hs = jax.lax.scan(
        step, (jnp.zeros((B, H), X.dtype), jnp.zeros((B, H), X.dtype)), x_tm)
    preds = jnp.einsum('sbh,h->sb', hs, params['w_fc'][0]) + params['b_fc'][0, 0]
    return preds.T


if __name__ == "__main__":
    B, S, H, n_heads = 4, 16, 64, 2

    key = jax.random.PRNGKey(0)
    ks = jax.random.split(key, 25)

    def nrm(k, shape, scale=0.1):
        return scale * jax.random.normal(k, shape, jnp.float32)

    params = {
        'wq': nrm(ks[0], (H, H)), 'bq': nrm(ks[1], (H,)),
        'wk': nrm(ks[2], (H, H)), 'bk': nrm(ks[3], (H,)),
        'wv': nrm(ks[4], (H, H)), 'bv': nrm(ks[5], (H,)),
        'wq_in': nrm(ks[6], (H, H)), 'bq_in': nrm(ks[7], (H,)),
        'wk_in': nrm(ks[8], (H, H)), 'bk_in': nrm(ks[9], (H,)),
        'wv_in': nrm(ks[10], (H, H)), 'bv_in': nrm(ks[11], (H,)),
        'wo': nrm(ks[12], (H, H)), 'bo': nrm(ks[13], (H,)),
        'g1': jnp.ones((H,), jnp.float32), 'beta1': jnp.zeros((H,), jnp.float32),
        'w1': nrm(ks[14], (H, H)), 'b1': nrm(ks[15], (H,)),
        'w2': nrm(ks[16], (H, H)), 'b2': nrm(ks[17], (H,)),
        'g2': jnp.ones((H,), jnp.float32), 'beta2': jnp.zeros((H,), jnp.float32),
        'w_ih': nrm(ks[18], (H, 4 * H)), 'w_hh': nrm(ks[19], (H, 4 * H)),
        'b_ih': nrm(ks[20], (4 * H,)), 'b_hh': nrm(ks[21], (4 * H,)),
        'w_fc': nrm(ks[22], (1, H)), 'b_fc': nrm(ks[23], (1, 1)),
    }
    X = jax.random.normal(ks[24], (B, S, H), jnp.float32)

    ref = _reference_forward(X, params, n_heads=n_heads)

    # f32-operand path: bit-close parity with the f32 reference.
    fwd_f32 = jax.jit(functools.partial(last_query_forward, n_heads=n_heads,
                                        compute_dtype=jnp.float32))
    preds_f32 = jax.block_until_ready(fwd_f32(X, params))
    assert preds_f32.shape == (B, S)
    np.testing.assert_allclose(np.asarray(preds_f32), np.asarray(ref), rtol=3e-3, atol=3e-3)

    # Default bf16-operand path (half HBM traffic, native-rate MXU, f32 accumulation).
    fwd_bf16 = jax.jit(functools.partial(last_query_forward, n_heads=n_heads))
    preds_bf16 = jax.block_until_ready(fwd_bf16(X, params))
    assert preds_bf16.shape == (B, S)
    np.testing.assert_allclose(np.asarray(preds_bf16), np.asarray(ref), rtol=4e-2, atol=4e-2)

    print("KERNEL_OK")
</pallas_src>

<mosaic_0001>
module attributes {stable_mosaic.version = 11 : i64} {
  func.func @_post_attn_ffn_lstm_in_kernel(%arg0: i32, %arg1: memref<4x16x64xf32, #tpu.memory_space<vmem>>, %arg2: memref<4x64xf32, #tpu.memory_space<vmem>>, %arg3: memref<1x64xf32, #tpu.memory_space<vmem>>, %arg4: memref<1x64xf32, #tpu.memory_space<vmem>>, %arg5: memref<64x64xf32, #tpu.memory_space<vmem>>, %arg6: memref<1x64xf32, #tpu.memory_space<vmem>>, %arg7: memref<64x64xf32, #tpu.memory_space<vmem>>, %arg8: memref<1x64xf32, #tpu.memory_space<vmem>>, %arg9: memref<1x64xf32, #tpu.memory_space<vmem>>, %arg10: memref<1x64xf32, #tpu.memory_space<vmem>>, %arg11: memref<64x256xf32, #tpu.memory_space<vmem>>, %arg12: memref<1x256xf32, #tpu.memory_space<vmem>>, %arg13: memref<16x4x256xf32, #tpu.memory_space<vmem>>) attributes {dimension_semantics = [#tpu.dimension_semantics<parallel>], iteration_bounds = array<i64: 1>, scalar_prefetch = 0 : i64, scratch_operands = 0 : i64, tpu.core_type = #tpu.core_type<tc>, window_params = [{transform_indices = @transform_0, window_bounds = array<i64: 4, 16, 64>}, {pipeline_mode = #tpu.pipeline_mode<synchronous>, transform_indices = @transform_1, window_bounds = array<i64: 4, 64>}, {pipeline_mode = #tpu.pipeline_mode<synchronous>, transform_indices = @transform_2, window_bounds = array<i64: 1, 64>}, {pipeline_mode = #tpu.pipeline_mode<synchronous>, transform_indices = @transform_3, window_bounds = array<i64: 1, 64>}, {pipeline_mode = #tpu.pipeline_mode<synchronous>, transform_indices = @transform_4, window_bounds = array<i64: 64, 64>}, {pipeline_mode = #tpu.pipeline_mode<synchronous>, transform_indices = @transform_5, window_bounds = array<i64: 1, 64>}, {pipeline_mode = #tpu.pipeline_mode<synchronous>, transform_indices = @transform_6, window_bounds = array<i64: 64, 64>}, {pipeline_mode = #tpu.pipeline_mode<synchronous>, transform_indices = @transform_7, window_bounds = array<i64: 1, 64>}, {pipeline_mode = #tpu.pipeline_mode<synchronous>, transform_indices = @transform_8, window_bounds = array<i64: 1, 64>}, {pipeline_mode = #tpu.pipeline_mode<synchronous>, transform_indices = @transform_9, window_bounds = array<i64: 1, 64>}, {pipeline_mode = #tpu.pipeline_mode<synchronous>, transform_indices = @transform_10, window_bounds = array<i64: 64, 256>}, {pipeline_mode = #tpu.pipeline_mode<synchronous>, transform_indices = @transform_11, window_bounds = array<i64: 1, 256>}, {transform_indices = @transform_12, window_bounds = array<i64: 16, 4, 256>}]} {
    %c0 = arith.constant 0 : index
    %c0_0 = arith.constant 0 : index
    %c0_1 = arith.constant 0 : index
    %0 = vector.load %arg1[%c0, %c0_0, %c0_1] : memref<4x16x64xf32, #tpu.memory_space<vmem>>, vector<4x16x64xf32>
    %c0_2 = arith.constant 0 : index
    %c0_3 = arith.constant 0 : index
    %1 = vector.load %arg2[%c0_2, %c0_3] : memref<4x64xf32, #tpu.memory_space<vmem>>, vector<4x64xf32>
    %2 = vector.shape_cast %1 : vector<4x64xf32> to vector<4x1x64xf32>
    %3 = vector.broadcast %2 : vector<4x1x64xf32> to vector<4x16x64xf32>
    %4 = arith.addf %0, %3 : vector<4x16x64xf32>
    %c0_4 = arith.constant 0 : index
    %c0_5 = arith.constant 0 : index
    %5 = vector.load %arg3[%c0_4, %c0_5] : memref<1x64xf32, #tpu.memory_space<vmem>>, vector<1x64xf32>
    %6 = vector.shape_cast %5 : vector<1x64xf32> to vector<64xf32>
    %c0_6 = arith.constant 0 : index
    %c0_7 = arith.constant 0 : index
    %7 = vector.load %arg4[%c0_6, %c0_7] : memref<1x64xf32, #tpu.memory_space<vmem>>, vector<1x64xf32>
    %8 = vector.shape_cast %7 : vector<1x64xf32> to vector<64xf32>
    %cst = arith.constant dense<0.000000e+00> : vector<4x16xf32>
    %9 = vector.multi_reduction <add>, %4, %cst [2] : vector<4x16x64xf32> to vector<4x16xf32>
    %10 = vector.shape_cast %9 : vector<4x16xf32> to vector<4x16x1xf32>
    %cst_8 = arith.constant 6.400000e+01 : f32
    %11 = vector.broadcast %cst_8 : f32 to vector<4x16x1xf32>
    %12 = arith.divf %10, %11 : vector<4x16x1xf32>
    %13 = vector.broadcast %12 : vector<4x16x1xf32> to vector<4x16x64xf32>
    %14 = arith.subf %4, %13 : vector<4x16x64xf32>
    %15 = arith.mulf %14, %14 : vector<4x16x64xf32>
    %cst_9 = arith.constant dense<0.000000e+00> : vector<4x16xf32>
    %16 = vector.multi_reduction <add>, %15, %cst_9 [2] : vector<4x16x64xf32> to vector<4x16xf32>
    %17 = vector.shape_cast %16 : vector<4x16xf32> to vector<4x16x1xf32>
    %cst_10 = arith.constant 6.400000e+01 : f32
    %18 = vector.broadcast %cst_10 : f32 to vector<4x16x1xf32>
    %19 = arith.divf %17, %18 : vector<4x16x1xf32>
    %20 = vector.broadcast %12 : vector<4x16x1xf32> to vector<4x16x64xf32>
    %21 = arith.subf %4, %20 : vector<4x16x64xf32>
    %cst_11 = arith.constant 9.99999974E-6 : f32
    %22 = vector.broadcast %cst_11 : f32 to vector<4x16x1xf32>
    %23 = arith.addf %19, %22 : vector<4x16x1xf32>
    %24 = math.rsqrt %23 : vector<4x16x1xf32>
    %25 = vector.broadcast %24 : vector<4x16x1xf32> to vector<4x16x64xf32>
    %26 = arith.mulf %21, %25 : vector<4x16x64xf32>
    %27 = vector.shape_cast %6 : vector<64xf32> to vector<1x1x64xf32>
    %28 = vector.broadcast %27 : vector<1x1x64xf32> to vector<4x16x64xf32>
    %29 = arith.mulf %26, %28 : vector<4x16x64xf32>
    %30 = vector.shape_cast %8 : vector<64xf32> to vector<1x1x64xf32>
    %31 = vector.broadcast %30 : vector<1x1x64xf32> to vector<4x16x64xf32>
    %32 = arith.addf %29, %31 : vector<4x16x64xf32>
    %33 = vector.shape_cast %32 : vector<4x16x64xf32> to vector<64x64xf32>
    %c0_12 = arith.constant 0 : index
    %c0_13 = arith.constant 0 : index
    %34 = vector.load %arg5[%c0_12, %c0_13] : memref<64x64xf32, #tpu.memory_space<vmem>>, vector<64x64xf32>
    %cst_14 = arith.constant dense<0.000000e+00> : vector<64x64xf32>
    %35 = tpu.matmul %33, %34, %cst_14 {dimension_numbers = #tpu.dot_dimension_numbers<[1], [0], [0], [1], [0, 0, 1, 1], [], []>} : vector<64x64xf32>, vector<64x64xf32>, vector<64x64xf32> -> vector<64x64xf32>
    %c0_15 = arith.constant 0 : index
    %c0_16 = arith.constant 0 : index
    %36 = vector.load %arg6[%c0_15, %c0_16] : memref<1x64xf32, #tpu.memory_space<vmem>>, vector<1x64xf32>
    %37 = vector.broadcast %36 : vector<1x64xf32> to vector<64x64xf32>
    %38 = arith.addf %35, %37 : vector<64x64xf32>
    %cst_17 = arith.constant 5.000000e-01 : f32
    %39 = vector.broadcast %cst_17 : f32 to vector<64x64xf32>
    %40 = arith.mulf %39, %38 : vector<64x64xf32>
    %cst_18 = arith.constant 4.471500e-02 : f32
    %41 = vector.broadcast %cst_18 : f32 to vector<64x64xf32>
    %42 = arith.mulf %41, %38 : vector<64x64xf32>
    %43 = arith.mulf %42, %38 : vector<64x64xf32>
    %44 = arith.mulf %43, %38 : vector<64x64xf32>
    %45 = arith.addf %38, %44 : vector<64x64xf32>
    %cst_19 = arith.constant 0.797884583 : f32
    %46 = vector.broadcast %cst_19 : f32 to vector<64x64xf32>
    %47 = arith.mulf %46, %45 : vector<64x64xf32>
    %48 = math.tanh %47 : vector<64x64xf32>
    %cst_20 = arith.constant 1.000000e+00 : f32
    %49 = vector.broadcast %cst_20 : f32 to vector<64x64xf32>
    %50 = arith.addf %49, %48 : vector<64x64xf32>
    %51 = arith.mulf %40, %50 : vector<64x64xf32>
    %c0_21 = arith.constant 0 : index
    %c0_22 = arith.constant 0 : index
    %52 = vector.load %arg7[%c0_21, %c0_22] : memref<64x64xf32, #tpu.memory_space<vmem>>, vector<64x64xf32>
    %cst_23 = arith.constant dense<0.000000e+00> : vector<64x64xf32>
    %53 = tpu.matmul %51, %52, %cst_23 {dimension_numbers = #tpu.dot_dimension_numbers<[1], [0], [0], [1], [0, 0, 1, 1], [], []>} : vector<64x64xf32>, vector<64x64xf32>, vector<64x64xf32> -> vector<64x64xf32>
    %c0_24 = arith.constant 0 : index
    %c0_25 = arith.constant 0 : index
    %54 = vector.load %arg8[%c0_24, %c0_25] : memref<1x64xf32, #tpu.memory_space<vmem>>, vector<1x64xf32>
    %55 = vector.broadcast %54 : vector<1x64xf32> to vector<64x64xf32>
    %56 = arith.addf %53, %55 : vector<64x64xf32>
    %57 = vector.shape_cast %56 : vector<64x64xf32> to vector<4x16x64xf32>
    %58 = arith.addf %0, %57 : vector<4x16x64xf32>
    %c0_26 = arith.constant 0 : index
    %c0_27 = arith.constant 0 : index
    %59 = vector.load %arg9[%c0_26, %c0_27] : memref<1x64xf32, #tpu.memory_space<vmem>>, vector<1x64xf32>
    %60 = vector.shape_cast %59 : vector<1x64xf32> to vector<64xf32>
    %c0_28 = arith.constant 0 : index
    %c0_29 = arith.constant 0 : index
    %61 = vector.load %arg10[%c0_28, %c0_29] : memref<1x64xf32, #tpu.memory_space<vmem>>, vector<1x64xf32>
    %62 = vector.shape_cast %61 : vector<1x64xf32> to vector<64xf32>
    %cst_30 = arith.constant dense<0.000000e+00> : vector<4x16xf32>
    %63 = vector.multi_reduction <add>, %58, %cst_30 [2] : vector<4x16x64xf32> to vector<4x16xf32>
    %64 = vector.shape_cast %63 : vector<4x16xf32> to vector<4x16x1xf32>
    %cst_31 = arith.constant 6.400000e+01 : f32
    %65 = vector.broadcast %cst_31 : f32 to vector<4x16x1xf32>
    %66 = arith.divf %64, %65 : vector<4x16x1xf32>
    %67 = vector.broadcast %66 : vector<4x16x1xf32> to vector<4x16x64xf32>
    %68 = arith.subf %58, %67 : vector<4x16x64xf32>
    %69 = arith.mulf %68, %68 : vector<4x16x64xf32>
    %cst_32 = arith.constant dense<0.000000e+00> : vector<4x16xf32>
    %70 = vector.multi_reduction <add>, %69, %cst_32 [2] : vector<4x16x64xf32> to vector<4x16xf32>
    %71 = vector.shape_cast %70 : vector<4x16xf32> to vector<4x16x1xf32>
    %cst_33 = arith.constant 6.400000e+01 : f32
    %72 = vector.broadcast %cst_33 : f32 to vector<4x16x1xf32>
    %73 = arith.divf %71, %72 : vector<4x16x1xf32>
    %74 = vector.broadcast %66 : vector<4x16x1xf32> to vector<4x16x64xf32>
    %75 = arith.subf %58, %74 : vector<4x16x64xf32>
    %cst_34 = arith.constant 9.99999974E-6 : f32
    %76 = vector.broadcast %cst_34 : f32 to vector<4x16x1xf32>
    %77 = arith.addf %73, %76 : vector<4x16x1xf32>
    %78 = math.rsqrt %77 : vector<4x16x1xf32>
    %79 = vector.broadcast %78 : vector<4x16x1xf32> to vector<4x16x64xf32>
    %80 = arith.mulf %75, %79 : vector<4x16x64xf32>
    %81 = vector.shape_cast %60 : vector<64xf32> to vector<1x1x64xf32>
    %82 = vector.broadcast %81 : vector<1x1x64xf32> to vector<4x16x64xf32>
    %83 = arith.mulf %80, %82 : vector<4x16x64xf32>
    %84 = vector.shape_cast %62 : vector<64xf32> to vector<1x1x64xf32>
    %85 = vector.broadcast %84 : vector<1x1x64xf32> to vector<4x16x64xf32>
    %86 = arith.addf %83, %85 : vector<4x16x64xf32>
    %87 = tpu.transpose %86, [1, 0, 2] : vector<4x16x64xf32> -> vector<16x4x64xf32>
    %88 = vector.shape_cast %87 : vector<16x4x64xf32> to vector<64x64xf32>
    %c0_35 = arith.constant 0 : index
    %c0_36 = arith.constant 0 : index
    %89 = vector.load %arg11[%c0_35, %c0_36] : memref<64x256xf32, #tpu.memory_space<vmem>>, vector<64x256xf32>
    %cst_37 = arith.constant dense<0.000000e+00> : vector<64x256xf32>
    %90 = tpu.matmul %88, %89, %cst_37 {dimension_numbers = #tpu.dot_dimension_numbers<[1], [0], [0], [1], [0, 0, 1, 1], [], []>} : vector<64x64xf32>, vector<64x256xf32>, vector<64x256xf32> -> vector<64x256xf32>
    %c0_38 = arith.constant 0 : index
    %c0_39 = arith.constant 0 : index
    %91 = vector.load %arg12[%c0_38, %c0_39] : memref<1x256xf32, #tpu.memory_space<vmem>>, vector<1x256xf32>
    %92 = vector.broadcast %91 : vector<1x256xf32> to vector<64x256xf32>
    %93 = arith.addf %90, %92 : vector<64x256xf32>
    %94 = vector.shape_cast %93 : vector<64x256xf32> to vector<16x4x256xf32>
    %c0_40 = arith.constant 0 : index
    %c0_41 = arith.constant 0 : index
    %c0_42 = arith.constant 0 : index
    %95 = vector.load %arg13[%c0_40, %c0_41, %c0_42] : memref<16x4x256xf32, #tpu.memory_space<vmem>>, vector<16x4x256xf32>
    tpu.vector_store %arg13[%c0_40, %c0_41, %c0_42], %94 {strides = array<i32>} : memref<16x4x256xf32, #tpu.memory_space<vmem>>, vector<16x4x256xf32>,
    return
  }
  func.func @transform_0(%arg0: i32) -> (i32, i32, i32) {
    %c0_i32 = arith.constant 0 : i32
    %c0_i32_0 = arith.constant 0 : i32
    %c0_i32_1 = arith.constant 0 : i32
    return %c0_i32, %arg0, %c0_i32_0 : i32, i32, i32
  }
  func.func @transform_1(%arg0: i32) -> (i32, i32) {
    %c0_i32 = arith.constant 0 : i32
    %c0_i32_0 = arith.constant 0 : i32
    %c0_i32_1 = arith.constant 0 : i32
    return %c0_i32, %c0_i32_0 : i32, i32
  }
  func.func @transform_2(%arg0: i32) -> (i32, i32) {
    %c0_i32 = arith.constant 0 : i32
    %c0_i32_0 = arith.constant 0 : i32
    %c0_i32_1 = arith.constant 0 : i32
    return %c0_i32, %c0_i32_0 : i32, i32
  }
  func.func @transform_3(%arg0: i32) -> (i32, i32) {
    %c0_i32 = arith.constant 0 : i32
    %c0_i32_0 = arith.constant 0 : i32
    %c0_i32_1 = arith.constant 0 : i32
    return %c0_i32, %c0_i32_0 : i32, i32
  }
  func.func @transform_4(%arg0: i32) -> (i32, i32) {
    %c0_i32 = arith.constant 0 : i32
    %c0_i32_0 = arith.constant 0 : i32
    %c0_i32_1 = arith.constant 0 : i32
    return %c0_i32, %c0_i32_0 : i32, i32
  }
  func.func @transform_5(%arg0: i32) -> (i32, i32) {
    %c0_i32 = arith.constant 0 : i32
    %c0_i32_0 = arith.constant 0 : i32
    %c0_i32_1 = arith.constant 0 : i32
    return %c0_i32, %c0_i32_0 : i32, i32
  }
  func.func @transform_6(%arg0: i32) -> (i32, i32) {
    %c0_i32 = arith.constant 0 : i32
    %c0_i32_0 = arith.constant 0 : i32
    %c0_i32_1 = arith.constant 0 : i32
    return %c0_i32, %c0_i32_0 : i32, i32
  }
  func.func @transform_7(%arg0: i32) -> (i32, i32) {
    %c0_i32 = arith.constant 0 : i32
    %c0_i32_0 = arith.constant 0 : i32
    %c0_i32_1 = arith.constant 0 : i32
    return %c0_i32, %c0_i32_0 : i32, i32
  }
  func.func @transform_8(%arg0: i32) -> (i32, i32) {
    %c0_i32 = arith.constant 0 : i32
    %c0_i32_0 = arith.constant 0 : i32
    %c0_i32_1 = arith.constant 0 : i32
    return %c0_i32, %c0_i32_0 : i32, i32
  }
  func.func @transform_9(%arg0: i32) -> (i32, i32) {
    %c0_i32 = arith.constant 0 : i32
    %c0_i32_0 = arith.constant 0 : i32
    %c0_i32_1 = arith.constant 0 : i32
    return %c0_i32, %c0_i32_0 : i32, i32
  }
  func.func @transform_10(%arg0: i32) -> (i32, i32) {
    %c0_i32 = arith.constant 0 : i32
    %c0_i32_0 = arith.constant 0 : i32
    %c0_i32_1 = arith.constant 0 : i32
    return %c0_i32, %c0_i32_0 : i32, i32
  }
  func.func @transform_11(%arg0: i32) -> (i32, i32) {
    %c0_i32 = arith.constant 0 : i32
    %c0_i32_0 = arith.constant 0 : i32
    %c0_i32_1 = arith.constant 0 : i32
    return %c0_i32, %c0_i32_0 : i32, i32
  }
  func.func @transform_12(%arg0: i32) -> (i32, i32, i32) {
    %c0_i32 = arith.constant 0 : i32
    %c0_i32_0 = arith.constant 0 : i32
    %c0_i32_1 = arith.constant 0 : i32
    return %arg0, %c0_i32, %c0_i32_0 : i32, i32, i32
  }
}

module attributes {stable_mosaic.version = 11 : i64} {
  func.func @_lstm_fc_kernel(%arg0: i32, %arg1: memref<16x4x256xf32, #tpu.memory_space<vmem>>, %arg2: memref<64x256xf32, #tpu.memory_space<vmem>>, %arg3: memref<1x64xf32, #tpu.memory_space<vmem>>, %arg4: memref<1x1xf32, #tpu.memory_space<smem>>, %arg5: memref<16x4xf32, #tpu.memory_space<vmem>>, %arg6: memref<4x64xf32, #tpu.memory_space<vmem>>, %arg7: memref<4x64xf32, #tpu.memory_space<vmem>>) attributes {dimension_semantics = [#tpu.dimension_semantics<arbitrary>], iteration_bounds = array<i64: 1>, scalar_prefetch = 0 : i64, scratch_operands = 2 : i64, tpu.core_type = #tpu.core_type<tc>, window_params = [{transform_indices = @transform_0, window_bounds = array<i64: 16, 4, 256>}, {pipeline_mode = #tpu.pipeline_mode<synchronous>, transform_indices = @transform_1, window_bounds = array<i64: 64, 256>}, {pipeline_mode = #tpu.pipeline_mode<synchronous>, transform_indices = @transform_2, window_bounds = array<i64: 1, 64>}, {transform_indices = @transform_3, window_bounds = array<i64: 1, 1>}, {transform_indices = @transform_4, window_bounds = array<i64: 16, 4>}]} {
    %c0_i32 = arith.constant 0 : i32
    %0 = arith.cmpi eq, %arg0, %c0_i32 : i32
    %1 = arith.extui %0 : i1 to i32
    %c0_i32_0 = arith.constant 0 : i32
    %2 = arith.cmpi ne, %1, %c0_i32_0 : i32
    scf.if %2 {
      %cst_209 = arith.constant 0.000000e+00 : f32
      %594 = vector.broadcast %cst_209 : f32 to vector<4x64xf32>
      %c0_210 = arith.constant 0 : index
      %c0_211 = arith.constant 0 : index
      %595 = vector.load %arg6[%c0_210, %c0_211] : memref<4x64xf32, #tpu.memory_space<vmem>>, vector<4x64xf32>
      tpu.vector_store %arg6[%c0_210, %c0_211], %594 {strides = array<i32>} : memref<4x64xf32, #tpu.memory_space<vmem>>, vector<4x64xf32>,
      %cst_212 = arith.constant 0.000000e+00 : f32
      %596 = vector.broadcast %cst_212 : f32 to vector<4x64xf32>
      %c0_213 = arith.constant 0 : index
      %c0_214 = arith.constant 0 : index
      %597 = vector.load %arg7[%c0_213, %c0_214] : memref<4x64xf32, #tpu.memory_space<vmem>>, vector<4x64xf32>
      tpu.vector_store %arg7[%c0_213, %c0_214], %596 {strides = array<i32>} : memref<4x64xf32, #tpu.memory_space<vmem>>, vector<4x64xf32>,
    } else {
    }
    %c0 = arith.constant 0 : index
    %c0_1 = arith.constant 0 : index
    %3 = vector.load %arg6[%c0, %c0_1] : memref<4x64xf32, #tpu.memory_space<vmem>>, vector<4x64xf32>
    %c0_2 = arith.constant 0 : index
    %c0_3 = arith.constant 0 : index
    %4 = vector.load %arg7[%c0_2, %c0_3] : memref<4x64xf32, #tpu.memory_space<vmem>>, vector<4x64xf32>
    %c0_4 = arith.constant 0 : index
    %c0_5 = arith.constant 0 : index
    %5 = vector.load %arg2[%c0_4, %c0_5] : memref<64x256xf32, #tpu.memory_space<vmem>>, vector<64x256xf32>
    %c0_6 = arith.constant 0 : index
    %c0_7 = arith.constant 0 : index
    %c0_8 = arith.constant 0 : index
    %6 = vector.load %arg1[%c0_6, %c0_7, %c0_8] : memref<16x4x256xf32, #tpu.memory_space<vmem>>, vector<1x4x256xf32>
    %7 = vector.shape_cast %6 : vector<1x4x256xf32> to vector<4x256xf32>
    %cst = arith.constant dense<0.000000e+00> : vector<4x256xf32>
    %8 = tpu.matmul %3, %5, %cst {dimension_numbers = #tpu.dot_dimension_numbers<[1], [0], [0], [1], [0, 0, 1, 1], [], []>} : vector<4x64xf32>, vector<64x256xf32>, vector<4x256xf32> -> vector<4x256xf32>
    %9 = arith.addf %7, %8 : vector<4x256xf32>
    %10 = vector.extract_strided_slice %9 {offsets = [0, 0], sizes = [4, 64], strides = [1, 1]} : vector<4x256xf32> to vector<4x64xf32>
    %cst_9 = arith.constant 0.000000e+00 : f32
    %11 = vector.broadcast %cst_9 : f32 to vector<4x64xf32>
    %12 = arith.subf %11, %10 : vector<4x64xf32>
    %13 = math.exp %12 : vector<4x64xf32>
    %cst_10 = arith.constant 1.000000e+00 : f32
    %14 = vector.broadcast %cst_10 : f32 to vector<4x64xf32>
    %15 = arith.addf %14, %13 : vector<4x64xf32>
    %cst_11 = arith.constant 1.000000e+00 : f32
    %16 = vector.broadcast %cst_11 : f32 to vector<4x64xf32>
    %17 = arith.divf %16, %15 : vector<4x64xf32>
    %18 = vector.extract_strided_slice %9 {offsets = [0, 64], sizes = [4, 64], strides = [1, 1]} : vector<4x256xf32> to vector<4x64xf32>
    %cst_12 = arith.constant 0.000000e+00 : f32
    %19 = vector.broadcast %cst_12 : f32 to vector<4x64xf32>
    %20 = arith.subf %19, %18 : vector<4x64xf32>
    %21 = math.exp %20 : vector<4x64xf32>
    %cst_13 = arith.constant 1.000000e+00 : f32
    %22 = vector.broadcast %cst_13 : f32 to vector<4x64xf32>
    %23 = arith.addf %22, %21 : vector<4x64xf32>
    %cst_14 = arith.constant 1.000000e+00 : f32
    %24 = vector.broadcast %cst_14 : f32 to vector<4x64xf32>
    %25 = arith.divf %24, %23 : vector<4x64xf32>
    %26 = vector.extract_strided_slice %9 {offsets = [0, 128], sizes = [4, 64], strides = [1, 1]} : vector<4x256xf32> to vector<4x64xf32>
    %27 = math.tanh %26 : vector<4x64xf32>
    %28 = vector.extract_strided_slice %9 {offsets = [0, 192], sizes = [4, 64], strides = [1, 1]} : vector<4x256xf32> to vector<4x64xf32>
    %cst_15 = arith.constant 0.000000e+00 : f32
    %29 = vector.broadcast %cst_15 : f32 to vector<4x64xf32>
    %30 = arith.subf %29, %28 : vector<4x64xf32>
    %31 = math.exp %30 : vector<4x64xf32>
    %cst_16 = arith.constant 1.000000e+00 : f32
    %32 = vector.broadcast %cst_16 : f32 to vector<4x64xf32>
    %33 = arith.addf %32, %31 : vector<4x64xf32>
    %cst_17 = arith.constant 1.000000e+00 : f32
    %34 = vector.broadcast %cst_17 : f32 to vector<4x64xf32>
    %35 = arith.divf %34, %33 : vector<4x64xf32>
    %36 = arith.mulf %25, %4 : vector<4x64xf32>
    %37 = arith.mulf %17, %27 : vector<4x64xf32>
    %38 = arith.addf %36, %37 : vector<4x64xf32>
    %39 = math.tanh %38 : vector<4x64xf32>
    %40 = arith.mulf %35, %39 : vector<4x64xf32>
    %c1 = arith.constant 1 : index
    %c0_18 = arith.constant 0 : index
    %c0_19 = arith.constant 0 : index
    %41 = vector.load %arg1[%c1, %c0_18, %c0_19] : memref<16x4x256xf32, #tpu.memory_space<vmem>>, vector<1x4x256xf32>
    %42 = vector.shape_cast %41 : vector<1x4x256xf32> to vector<4x256xf32>
    %cst_20 = arith.constant dense<0.000000e+00> : vector<4x256xf32>
    %43 = tpu.matmul %40, %5, %cst_20 {dimension_numbers = #tpu.dot_dimension_numbers<[1], [0], [0], [1], [0, 0, 1, 1], [], []>} : vector<4x64xf32>, vector<64x256xf32>, vector<4x256xf32> -> vector<4x256xf32>
    %44 = arith.addf %42, %43 : vector<4x256xf32>
    %45 = vector.extract_strided_slice %44 {offsets = [0, 0], sizes = [4, 64], strides = [1, 1]} : vector<4x256xf32> to vector<4x64xf32>
    %cst_21 = arith.constant 0.000000e+00 : f32
    %46 = vector.broadcast %cst_21 : f32 to vector<4x64xf32>
    %47 = arith.subf %46, %45 : vector<4x64xf32>
    %48 = math.exp %47 : vector<4x64xf32>
    %cst_22 = arith.constant 1.000000e+00 : f32
    %49 = vector.broadcast %cst_22 : f32 to vector<4x64xf32>
    %50 = arith.addf %49, %48 : vector<4x64xf32>
    %cst_23 = arith.constant 1.000000e+00 : f32
    %51 = vector.broadcast %cst_23 : f32 to vector<4x64xf32>
    %52 = arith.divf %51, %50 : vector<4x64xf32>
    %53 = vector.extract_strided_slice %44 {offsets = [0, 64], sizes = [4, 64], strides = [1, 1]} : vector<4x256xf32> to vector<4x64xf32>
    %cst_24 = arith.constant 0.000000e+00 : f32
    %54 = vector.broadcast %cst_24 : f32 to vector<4x64xf32>
    %55 = arith.subf %54, %53 : vector<4x64xf32>
    %56 = math.exp %55 : vector<4x64xf32>
    %cst_25 = arith.constant 1.000000e+00 : f32
    %57 = vector.broadcast %cst_25 : f32 to vector<4x64xf32>
    %58 = arith.addf %57, %56 : vector<4x64xf32>
    %cst_26 = arith.constant 1.000000e+00 : f32
    %59 = vector.broadcast %cst_26 : f32 to vector<4x64xf32>
    %60 = arith.divf %59, %58 : vector<4x64xf32>
    %61 = vector.extract_strided_slice %44 {offsets = [0, 128], sizes = [4, 64], strides = [1, 1]} : vector<4x256xf32> to vector<4x64xf32>
    %62 = math.tanh %61 : vector<4x64xf32>
    %63 = vector.extract_strided_slice %44 {offsets = [0, 192], sizes = [4, 64], strides = [1, 1]} : vector<4x256xf32> to vector<4x64xf32>
    %cst_27 = arith.constant 0.000000e+00 : f32
    %64 = vector.broadcast %cst_27 : f32 to vector<4x64xf32>
    %65 = arith.subf %64, %63 : vector<4x64xf32>
    %66 = math.exp %65 : vector<4x64xf32>
    %cst_28 = arith.constant 1.000000e+00 : f32
    %67 = vector.broadcast %cst_28 : f32 to vector<4x64xf32>
    %68 = arith.addf %67, %66 : vector<4x64xf32>
    %cst_29 = arith.constant 1.000000e+00 : f32
    %69 = vector.broadcast %cst_29 : f32 to vector<4x64xf32>
    %70 = arith.divf %69, %68 : vector<4x64xf32>
    %71 = arith.mulf %60, %38 : vector<4x64xf32>
    %72 = arith.mulf %52, %62 : vector<4x64xf32>
    %73 = arith.addf %71, %72 : vector<4x64xf32>
    %74 = math.tanh %73 : vector<4x64xf32>
    %75 = arith.mulf %70, %74 : vector<4x64xf32>
    %c2 = arith.constant 2 : index
    %c0_30 = arith.constant 0 : index
    %c0_31 = arith.constant 0 : index
    %76 = vector.load %arg1[%c2, %c0_30, %c0_31] : memref<16x4x256xf32, #tpu.memory_space<vmem>>, vector<1x4x256xf32>
    %77 = vector.shape_cast %76 : vector<1x4x256xf32> to vector<4x256xf32>
    %cst_32 = arith.constant dense<0.000000e+00> : vector<4x256xf32>
    %78 = tpu.matmul %75, %5, %cst_32 {dimension_numbers = #tpu.dot_dimension_numbers<[1], [0], [0], [1], [0, 0, 1, 1], [], []>} : vector<4x64xf32>, vector<64x256xf32>, vector<4x256xf32> -> vector<4x256xf32>
    %79 = arith.addf %77, %78 : vector<4x256xf32>
    %80 = vector.extract_strided_slice %79 {offsets = [0, 0], sizes = [4, 64], strides = [1, 1]} : vector<4x256xf32> to vector<4x64xf32>
    %cst_33 = arith.constant 0.000000e+00 : f32
    %81 = vector.broadcast %cst_33 : f32 to vector<4x64xf32>
    %82 = arith.subf %81, %80 : vector<4x64xf32>
    %83 = math.exp %82 : vector<4x64xf32>
    %cst_34 = arith.constant 1.000000e+00 : f32
    %84 = vector.broadcast %cst_34 : f32 to vector<4x64xf32>
    %85 = arith.addf %84, %83 : vector<4x64xf32>
    %cst_35 = arith.constant 1.000000e+00 : f32
    %86 = vector.broadcast %cst_35 : f32 to vector<4x64xf32>
    %87 = arith.divf %86, %85 : vector<4x64xf32>
    %88 = vector.extract_strided_slice %79 {offsets = [0, 64], sizes = [4, 64], strides = [1, 1]} : vector<4x256xf32> to vector<4x64xf32>
    %cst_36 = arith.constant 0.000000e+00 : f32
    %89 = vector.broadcast %cst_36 : f32 to vector<4x64xf32>
    %90 = arith.subf %89, %88 : vector<4x64xf32>
    %91 = math.exp %90 : vector<4x64xf32>
    %cst_37 = arith.constant 1.000000e+00 : f32
    %92 = vector.broadcast %cst_37 : f32 to vector<4x64xf32>
    %93 = arith.addf %92, %91 : vector<4x64xf32>
    %cst_38 = arith.constant 1.000000e+00 : f32
    %94 = vector.broadcast %cst_38 : f32 to vector<4x64xf32>
    %95 = arith.divf %94, %93 : vector<4x64xf32>
    %96 = vector.extract_strided_slice %79 {offsets = [0, 128], sizes = [4, 64], strides = [1, 1]} : vector<4x256xf32> to vector<4x64xf32>
    %97 = math.tanh %96 : vector<4x64xf32>
    %98 = vector.extract_strided_slice %79 {offsets = [0, 192], sizes = [4, 64], strides = [1, 1]} : vector<4x256xf32> to vector<4x64xf32>
    %cst_39 = arith.constant 0.000000e+00 : f32
    %99 = vector.broadcast %cst_39 : f32 to vector<4x64xf32>
    %100 = arith.subf %99, %98 : vector<4x64xf32>
    %101 = math.exp %100 : vector<4x64xf32>
    %cst_40 = arith.constant 1.000000e+00 : f32
    %102 = vector.broadcast %cst_40 : f32 to vector<4x64xf32>
    %103 = arith.addf %102, %101 : vector<4x64xf32>
    %cst_41 = arith.constant 1.000000e+00 : f32
    %104 = vector.broadcast %cst_41 : f32 to vector<4x64xf32>
    %105 = arith.divf %104, %103 : vector<4x64xf32>
    %106 = arith.mulf %95, %73 : vector<4x64xf32>
    %107 = arith.mulf %87, %97 : vector<4x64xf32>
    %108 = arith.addf %106, %107 : vector<4x64xf32>
    %109 = math.tanh %108 : vector<4x64xf32>
    %110 = arith.mulf %105, %109 : vector<4x64xf32>
    %c3 = arith.constant 3 : index
    %c0_42 = arith.constant 0 : index
    %c0_43 = arith.constant 0 : index
    %111 = vector.load %arg1[%c3, %c0_42, %c0_43] : memref<16x4x256xf32, #tpu.memory_space<vmem>>, vector<1x4x256xf32>
    %112 = vector.shape_cast %111 : vector<1x4x256xf32> to vector<4x256xf32>
    %cst_44 = arith.constant dense<0.000000e+00> : vector<4x256xf32>
    %113 = tpu.matmul %110, %5, %cst_44 {dimension_numbers = #tpu.dot_dimension_numbers<[1], [0], [0], [1], [0, 0, 1, 1], [], []>} : vector<4x64xf32>, vector<64x256xf32>, vector<4x256xf32> -> vector<4x256xf32>
    %114 = arith.addf %112, %113 : vector<4x256xf32>
    %115 = vector.extract_strided_slice %114 {offsets = [0, 0], sizes = [4, 64], strides = [1, 1]} : vector<4x256xf32> to vector<4x64xf32>
    %cst_45 = arith.constant 0.000000e+00 : f32
    %116 = vector.broadcast %cst_45 : f32 to vector<4x64xf32>
    %117 = arith.subf %116, %115 : vector<4x64xf32>
    %118 = math.exp %117 : vector<4x64xf32>
    %cst_46 = arith.constant 1.000000e+00 : f32
    %119 = vector.broadcast %cst_46 : f32 to vector<4x64xf32>
    %120 = arith.addf %119, %118 : vector<4x64xf32>
    %cst_47 = arith.constant 1.000000e+00 : f32
    %121 = vector.broadcast %cst_47 : f32 to vector<4x64xf32>
    %122 = arith.divf %121, %120 : vector<4x64xf32>
    %123 = vector.extract_strided_slice %114 {offsets = [0, 64], sizes = [4, 64], strides = [1, 1]} : vector<4x256xf32> to vector<4x64xf32>
    %cst_48 = arith.constant 0.000000e+00 : f32
    %124 = vector.broadcast %cst_48 : f32 to vector<4x64xf32>
    %125 = arith.subf %124, %123 : vector<4x64xf32>
    %126 = math.exp %125 : vector<4x64xf32>
    %cst_49 = arith.constant 1.000000e+00 : f32
    %127 = vector.broadcast %cst_49 : f32 to vector<4x64xf32>
    %128 = arith.addf %127, %126 : vector<4x64xf32>
    %cst_50 = arith.constant 1.000000e+00 : f32
    %129 = vector.broadcast %cst_50 : f32 to vector<4x64xf32>
    %130 = arith.divf %129, %128 : vector<4x64xf32>
    %131 = vector.extract_strided_slice %114 {offsets = [0, 128], sizes = [4, 64], strides = [1, 1]} : vector<4x256xf32> to vector<4x64xf32>
    %132 = math.tanh %131 : vector<4x64xf32>
    %133 = vector.extract_strided_slice %114 {offsets = [0, 192], sizes = [4, 64], strides = [1, 1]} : vector<4x256xf32> to vector<4x64xf32>
    %cst_51 = arith.constant 0.000000e+00 : f32
    %134 = vector.broadcast %cst_51 : f32 to vector<4x64xf32>
    %135 = arith.subf %134, %133 : vector<4x64xf32>
    %136 = math.exp %135 : vector<4x64xf32>
    %cst_52 = arith.constant 1.000000e+00 : f32
    %137 = vector.broadcast %cst_52 : f32 to vector<4x64xf32>
    %138 = arith.addf %137, %136 : vector<4x64xf32>
    %cst_53 = arith.constant 1.000000e+00 : f32
    %139 = vector.broadcast %cst_53 : f32 to vector<4x64xf32>
    %140 = arith.divf %139, %138 : vector<4x64xf32>
    %141 = arith.mulf %130, %108 : vector<4x64xf32>
    %142 = arith.mulf %122, %132 : vector<4x64xf32>
    %143 = arith.addf %141, %142 : vector<4x64xf32>
    %144 = math.tanh %143 : vector<4x64xf32>
    %145 = arith.mulf %140, %144 : vector<4x64xf32>
    %c4 = arith.constant 4 : index
    %c0_54 = arith.constant 0 : index
    %c0_55 = arith.constant 0 : index
    %146 = vector.load %arg1[%c4, %c0_54, %c0_55] : memref<16x4x256xf32, #tpu.memory_space<vmem>>, vector<1x4x256xf32>
    %147 = vector.shape_cast %146 : vector<1x4x256xf32> to vector<4x256xf32>
    %cst_56 = arith.constant dense<0.000000e+00> : vector<4x256xf32>
    %148 = tpu.matmul %145, %5, %cst_56 {dimension_numbers = #tpu.dot_dimension_numbers<[1], [0], [0], [1], [0, 0, 1, 1], [], []>} : vector<4x64xf32>, vector<64x256xf32>, vector<4x256xf32> -> vector<4x256xf32>
    %149 = arith.addf %147, %148 : vector<4x256xf32>
    %150 = vector.extract_strided_slice %149 {offsets = [0, 0], sizes = [4, 64], strides = [1, 1]} : vector<4x256xf32> to vector<4x64xf32>
    %cst_57 = arith.constant 0.000000e+00 : f32
    %151 = vector.broadcast %cst_57 : f32 to vector<4x64xf32>
    %152 = arith.subf %151, %150 : vector<4x64xf32>
    %153 = math.exp %152 : vector<4x64xf32>
    %cst_58 = arith.constant 1.000000e+00 : f32
    %154 = vector.broadcast %cst_58 : f32 to vector<4x64xf32>
    %155 = arith.addf %154, %153 : vector<4x64xf32>
    %cst_59 = arith.constant 1.000000e+00 : f32
    %156 = vector.broadcast %cst_59 : f32 to vector<4x64xf32>
    %157 = arith.divf %156, %155 : vector<4x64xf32>
    %158 = vector.extract_strided_slice %149 {offsets = [0, 64], sizes = [4, 64], strides = [1, 1]} : vector<4x256xf32> to vector<4x64xf32>
    %cst_60 = arith.constant 0.000000e+00 : f32
    %159 = vector.broadcast %cst_60 : f32 to vector<4x64xf32>
    %160 = arith.subf %159, %158 : vector<4x64xf32>
    %161 = math.exp %160 : vector<4x64xf32>
    %cst_61 = arith.constant 1.000000e+00 : f32
    %162 = vector.broadcast %cst_61 : f32 to vector<4x64xf32>
    %163 = arith.addf %162, %161 : vector<4x64xf32>
    %cst_62 = arith.constant 1.000000e+00 : f32
    %164 = vector.broadcast %cst_62 : f32 to vector<4x64xf32>
    %165 = arith.divf %164, %163 : vector<4x64xf32>
    %166 = vector.extract_strided_slice %149 {offsets = [0, 128], sizes = [4, 64], strides = [1, 1]} : vector<4x256xf32> to vector<4x64xf32>
    %167 = math.tanh %166 : vector<4x64xf32>
    %168 = vector.extract_strided_slice %149 {offsets = [0, 192], sizes = [4, 64], strides = [1, 1]} : vector<4x256xf32> to vector<4x64xf32>
    %cst_63 = arith.constant 0.000000e+00 : f32
    %169 = vector.broadcast %cst_63 : f32 to vector<4x64xf32>
    %170 = arith.subf %169, %168 : vector<4x64xf32>
    %171 = math.exp %170 : vector<4x64xf32>
    %cst_64 = arith.constant 1.000000e+00 : f32
    %172 = vector.broadcast %cst_64 : f32 to vector<4x64xf32>
    %173 = arith.addf %172, %171 : vector<4x64xf32>
    %cst_65 = arith.constant 1.000000e+00 : f32
    %174 = vector.broadcast %cst_65 : f32 to vector<4x64xf32>
    %175 = arith.divf %174, %173 : vector<4x64xf32>
    %176 = arith.mulf %165, %143 : vector<4x64xf32>
    %177 = arith.mulf %157, %167 : vector<4x64xf32>
    %178 = arith.addf %176, %177 : vector<4x64xf32>
    %179 = math.tanh %178 : vector<4x64xf32>
    %180 = arith.mulf %175, %179 : vector<4x64xf32>
    %c5 = arith.constant 5 : index
    %c0_66 = arith.constant 0 : index
    %c0_67 = arith.constant 0 : index
    %181 = vector.load %arg1[%c5, %c0_66, %c0_67] : memref<16x4x256xf32, #tpu.memory_space<vmem>>, vector<1x4x256xf32>
    %182 = vector.shape_cast %181 : vector<1x4x256xf32> to vector<4x256xf32>
    %cst_68 = arith.constant dense<0.000000e+00> : vector<4x256xf32>
    %183 = tpu.matmul %180, %5, %cst_68 {dimension_numbers = #tpu.dot_dimension_numbers<[1], [0], [0], [1], [0, 0, 1, 1], [], []>} : vector<4x64xf32>, vector<64x256xf32>, vector<4x256xf32> -> vector<4x256xf32>
    %184 = arith.addf %182, %183 : vector<4x256xf32>
    %185 = vector.extract_strided_slice %184 {offsets = [0, 0], sizes = [4, 64], strides = [1, 1]} : vector<4x256xf32> to vector<4x64xf32>
    %cst_69 = arith.constant 0.000000e+00 : f32
    %186 = vector.broadcast %cst_69 : f32 to vector<4x64xf32>
    %187 = arith.subf %186, %185 : vector<4x64xf32>
    %188 = math.exp %187 : vector<4x64xf32>
    %cst_70 = arith.constant 1.000000e+00 : f32
    %189 = vector.broadcast %cst_70 : f32 to vector<4x64xf32>
    %190 = arith.addf %189, %188 : vector<4x64xf32>
    %cst_71 = arith.constant 1.000000e+00 : f32
    %191 = vector.broadcast %cst_71 : f32 to vector<4x64xf32>
    %192 = arith.divf %191, %190 : vector<4x64xf32>
    %193 = vector.extract_strided_slice %184 {offsets = [0, 64], sizes = [4, 64], strides = [1, 1]} : vector<4x256xf32> to vector<4x64xf32>
    %cst_72 = arith.constant 0.000000e+00 : f32
    %194 = vector.broadcast %cst_72 : f32 to vector<4x64xf32>
    %195 = arith.subf %194, %193 : vector<4x64xf32>
    %196 = math.exp %195 : vector<4x64xf32>
    %cst_73 = arith.constant 1.000000e+00 : f32
    %197 = vector.broadcast %cst_73 : f32 to vector<4x64xf32>
    %198 = arith.addf %197, %196 : vector<4x64xf32>
    %cst_74 = arith.constant 1.000000e+00 : f32
    %199 = vector.broadcast %cst_74 : f32 to vector<4x64xf32>
    %200 = arith.divf %199, %198 : vector<4x64xf32>
    %201 = vector.extract_strided_slice %184 {offsets = [0, 128], sizes = [4, 64], strides = [1, 1]} : vector<4x256xf32> to vector<4x64xf32>
    %202 = math.tanh %201 : vector<4x64xf32>
    %203 = vector.extract_strided_slice %184 {offsets = [0, 192], sizes = [4, 64], strides = [1, 1]} : vector<4x256xf32> to vector<4x64xf32>
    %cst_75 = arith.constant 0.000000e+00 : f32
    %204 = vector.broadcast %cst_75 : f32 to vector<4x64xf32>
    %205 = arith.subf %204, %203 : vector<4x64xf32>
    %206 = math.exp %205 : vector<4x64xf32>
    %cst_76 = arith.constant 1.000000e+00 : f32
    %207 = vector.broadcast %cst_76 : f32 to vector<4x64xf32>
    %208 = arith.addf %207, %206 : vector<4x64xf32>
    %cst_77 = arith.constant 1.000000e+00 : f32
    %209 = vector.broadcast %cst_77 : f32 to vector<4x64xf32>
    %210 = arith.divf %209, %208 : vector<4x64xf32>
    %211 = arith.mulf %200, %178 : vector<4x64xf32>
    %212 = arith.mulf %192, %202 : vector<4x64xf32>
    %213 = arith.addf %211, %212 : vector<4x64xf32>
    %214 = math.tanh %213 : vector<4x64xf32>
    %215 = arith.mulf %210, %214 : vector<4x64xf32>
    %c6 = arith.constant 6 : index
    %c0_78 = arith.constant 0 : index
    %c0_79 = arith.constant 0 : index
    %216 = vector.load %arg1[%c6, %c0_78, %c0_79] : memref<16x4x256xf32, #tpu.memory_space<vmem>>, vector<1x4x256xf32>
    %217 = vector.shape_cast %216 : vector<1x4x256xf32> to vector<4x256xf32>
    %cst_80 = arith.constant dense<0.000000e+00> : vector<4x256xf32>
    %218 = tpu.matmul %215, %5, %cst_80 {dimension_numbers = #tpu.dot_dimension_numbers<[1], [0], [0], [1], [0, 0, 1, 1], [], []>} : vector<4x64xf32>, vector<64x256xf32>, vector<4x256xf32> -> vector<4x256xf32>
    %219 = arith.addf %217, %218 : vector<4x256xf32>
    %220 = vector.extract_strided_slice %219 {offsets = [0, 0], sizes = [4, 64], strides = [1, 1]} : vector<4x256xf32> to vector<4x64xf32>
    %cst_81 = arith.constant 0.000000e+00 : f32
    %221 = vector.broadcast %cst_81 : f32 to vector<4x64xf32>
    %222 = arith.subf %221, %220 : vector<4x64xf32>
    %223 = math.exp %222 : vector<4x64xf32>
    %cst_82 = arith.constant 1.000000e+00 : f32
    %224 = vector.broadcast %cst_82 : f32 to vector<4x64xf32>
    %225 = arith.addf %224, %223 : vector<4x64xf32>
    %cst_83 = arith.constant 1.000000e+00 : f32
    %226 = vector.broadcast %cst_83 : f32 to vector<4x64xf32>
    %227 = arith.divf %226, %225 : vector<4x64xf32>
    %228 = vector.extract_strided_slice %219 {offsets = [0, 64], sizes = [4, 64], strides = [1, 1]} : vector<4x256xf32> to vector<4x64xf32>
    %cst_84 = arith.constant 0.000000e+00 : f32
    %229 = vector.broadcast %cst_84 : f32 to vector<4x64xf32>
    %230 = arith.subf %229, %228 : vector<4x64xf32>
    %231 = math.exp %230 : vector<4x64xf32>
    %cst_85 = arith.constant 1.000000e+00 : f32
    %232 = vector.broadcast %cst_85 : f32 to vector<4x64xf32>
    %233 = arith.addf %232, %231 : vector<4x64xf32>
    %cst_86 = arith.constant 1.000000e+00 : f32
    %234 = vector.broadcast %cst_86 : f32 to vector<4x64xf32>
    %235 = arith.divf %234, %233 : vector<4x64xf32>
    %236 = vector.extract_strided_slice %219 {offsets = [0, 128], sizes = [4, 64], strides = [1, 1]} : vector<4x256xf32> to vector<4x64xf32>
    %237 = math.tanh %236 : vector<4x64xf32>
    %238 = vector.extract_strided_slice %219 {offsets = [0, 192], sizes = [4, 64], strides = [1, 1]} : vector<4x256xf32> to vector<4x64xf32>
    %cst_87 = arith.constant 0.000000e+00 : f32
    %239 = vector.broadcast %cst_87 : f32 to vector<4x64xf32>
    %240 = arith.subf %239, %238 : vector<4x64xf32>
    %241 = math.exp %240 : vector<4x64xf32>
    %cst_88 = arith.constant 1.000000e+00 : f32
    %242 = vector.broadcast %cst_88 : f32 to vector<4x64xf32>
    %243 = arith.addf %242, %241 : vector<4x64xf32>
    %cst_89 = arith.constant 1.000000e+00 : f32
    %244 = vector.broadcast %cst_89 : f32 to vector<4x64xf32>
    %245 = arith.divf %244, %243 : vector<4x64xf32>
    %246 = arith.mulf %235, %213 : vector<4x64xf32>
    %247 = arith.mulf %227, %237 : vector<4x64xf32>
    %248 = arith.addf %246, %247 : vector<4x64xf32>
    %249 = math.tanh %248 : vector<4x64xf32>
    %250 = arith.mulf %245, %249 : vector<4x64xf32>
    %c7 = arith.constant 7 : index
    %c0_90 = arith.constant 0 : index
    %c0_91 = arith.constant 0 : index
    %251 = vector.load %arg1[%c7, %c0_90, %c0_91] : memref<16x4x256xf32, #tpu.memory_space<vmem>>, vector<1x4x256xf32>
    %252 = vector.shape_cast %251 : vector<1x4x256xf32> to vector<4x256xf32>
    %cst_92 = arith.constant dense<0.000000e+00> : vector<4x256xf32>
    %253 = tpu.matmul %250, %5, %cst_92 {dimension_numbers = #tpu.dot_dimension_numbers<[1], [0], [0], [1], [0, 0, 1, 1], [], []>} : vector<4x64xf32>, vector<64x256xf32>, vector<4x256xf32> -> vector<4x256xf32>
    %254 = arith.addf %252, %253 : vector<4x256xf32>
    %255 = vector.extract_strided_slice %254 {offsets = [0, 0], sizes = [4, 64], strides = [1, 1]} : vector<4x256xf32> to vector<4x64xf32>
    %cst_93 = arith.constant 0.000000e+00 : f32
    %256 = vector.broadcast %cst_93 : f32 to vector<4x64xf32>
    %257 = arith.subf %256, %255 : vector<4x64xf32>
    %258 = math.exp %257 : vector<4x64xf32>
    %cst_94 = arith.constant 1.000000e+00 : f32
    %259 = vector.broadcast %cst_94 : f32 to vector<4x64xf32>
    %260 = arith.addf %259, %258 : vector<4x64xf32>
    %cst_95 = arith.constant 1.000000e+00 : f32
    %261 = vector.broadcast %cst_95 : f32 to vector<4x64xf32>
    %262 = arith.divf %261, %260 : vector<4x64xf32>
    %263 = vector.extract_strided_slice %254 {offsets = [0, 64], sizes = [4, 64], strides = [1, 1]} : vector<4x256xf32> to vector<4x64xf32>
    %cst_96 = arith.constant 0.000000e+00 : f32
    %264 = vector.broadcast %cst_96 : f32 to vector<4x64xf32>
    %265 = arith.subf %264, %263 : vector<4x64xf32>
    %266 = math.exp %265 : vector<4x64xf32>
    %cst_97 = arith.constant 1.000000e+00 : f32
    %267 = vector.broadcast %cst_97 : f32 to vector<4x64xf32>
    %268 = arith.addf %267, %266 : vector<4x64xf32>
    %cst_98 = arith.constant 1.000000e+00 : f32
    %269 = vector.broadcast %cst_98 : f32 to vector<4x64xf32>
    %270 = arith.divf %269, %268 : vector<4x64xf32>
    %271 = vector.extract_strided_slice %254 {offsets = [0, 128], sizes = [4, 64], strides = [1, 1]} : vector<4x256xf32> to vector<4x64xf32>
    %272 = math.tanh %271 : vector<4x64xf32>
    %273 = vector.extract_strided_slice %254 {offsets = [0, 192], sizes = [4, 64], strides = [1, 1]} : vector<4x256xf32> to vector<4x64xf32>
    %cst_99 = arith.constant 0.000000e+00 : f32
    %274 = vector.broadcast %cst_99 : f32 to vector<4x64xf32>
    %275 = arith.subf %274, %273 : vector<4x64xf32>
    %276 = math.exp %275 : vector<4x64xf32>
    %cst_100 = arith.constant 1.000000e+00 : f32
    %277 = vector.broadcast %cst_100 : f32 to vector<4x64xf32>
    %278 = arith.addf %277, %276 : vector<4x64xf32>
    %cst_101 = arith.constant 1.000000e+00 : f32
    %279 = vector.broadcast %cst_101 : f32 to vector<4x64xf32>
    %280 = arith.divf %279, %278 : vector<4x64xf32>
    %281 = arith.mulf %270, %248 : vector<4x64xf32>
    %282 = arith.mulf %262, %272 : vector<4x64xf32>
    %283 = arith.addf %281, %282 : vector<4x64xf32>
    %284 = math.tanh %283 : vector<4x64xf32>
    %285 = arith.mulf %280, %284 : vector<4x64xf32>
    %c8 = arith.constant 8 : index
    %c0_102 = arith.constant 0 : index
    %c0_103 = arith.constant 0 : index
    %286 = vector.load %arg1[%c8, %c0_102, %c0_103] : memref<16x4x256xf32, #tpu.memory_space<vmem>>, vector<1x4x256xf32>
    %287 = vector.shape_cast %286 : vector<1x4x256xf32> to vector<4x256xf32>
    %cst_104 = arith.constant dense<0.000000e+00> : vector<4x256xf32>
    %288 = tpu.matmul %285, %5, %cst_104 {dimension_numbers = #tpu.dot_dimension_numbers<[1], [0], [0], [1], [0, 0, 1, 1], [], []>} : vector<4x64xf32>, vector<64x256xf32>, vector<4x256xf32> -> vector<4x256xf32>
    %289 = arith.addf %287, %288 : vector<4x256xf32>
    %290 = vector.extract_strided_slice %289 {offsets = [0, 0], sizes = [4, 64], strides = [1, 1]} : vector<4x256xf32> to vector<4x64xf32>
    %cst_105 = arith.constant 0.000000e+00 : f32
    %291 = vector.broadcast %cst_105 : f32 to vector<4x64xf32>
    %292 = arith.subf %291, %290 : vector<4x64xf32>
    %293 = math.exp %292 : vector<4x64xf32>
    %cst_106 = arith.constant 1.000000e+00 : f32
    %294 = vector.broadcast %cst_106 : f32 to vector<4x64xf32>
    %295 = arith.addf %294, %293 : vector<4x64xf32>
    %cst_107 = arith.constant 1.000000e+00 : f32
    %296 = vector.broadcast %cst_107 : f32 to vector<4x64xf32>
    %297 = arith.divf %296, %295 : vector<4x64xf32>
    %298 = vector.extract_strided_slice %289 {offsets = [0, 64], sizes = [4, 64], strides = [1, 1]} : vector<4x256xf32> to vector<4x64xf32>
    %cst_108 = arith.constant 0.000000e+00 : f32
    %299 = vector.broadcast %cst_108 : f32 to vector<4x64xf32>
    %300 = arith.subf %299, %298 : vector<4x64xf32>
    %301 = math.exp %300 : vector<4x64xf32>
    %cst_109 = arith.constant 1.000000e+00 : f32
    %302 = vector.broadcast %cst_109 : f32 to vector<4x64xf32>
    %303 = arith.addf %302, %301 : vector<4x64xf32>
    %cst_110 = arith.constant 1.000000e+00 : f32
    %304 = vector.broadcast %cst_110 : f32 to vector<4x64xf32>
    %305 = arith.divf %304, %303 : vector<4x64xf32>
    %306 = vector.extract_strided_slice %289 {offsets = [0, 128], sizes = [4, 64], strides = [1, 1]} : vector<4x256xf32> to vector<4x64xf32>
    %307 = math.tanh %306 : vector<4x64xf32>
    %308 = vector.extract_strided_slice %289 {offsets = [0, 192], sizes = [4, 64], strides = [1, 1]} : vector<4x256xf32> to vector<4x64xf32>
    %cst_111 = arith.constant 0.000000e+00 : f32
    %309 = vector.broadcast %cst_111 : f32 to vector<4x64xf32>
    %310 = arith.subf %309, %308 : vector<4x64xf32>
    %311 = math.exp %310 : vector<4x64xf32>
    %cst_112 = arith.constant 1.000000e+00 : f32
    %312 = vector.broadcast %cst_112 : f32 to vector<4x64xf32>
    %313 = arith.addf %312, %311 : vector<4x64xf32>
    %cst_113 = arith.constant 1.000000e+00 : f32
    %314 = vector.broadcast %cst_113 : f32 to vector<4x64xf32>
    %315 = arith.divf %314, %313 : vector<4x64xf32>
    %316 = arith.mulf %305, %283 : vector<4x64xf32>
    %317 = arith.mulf %297, %307 : vector<4x64xf32>
    %318 = arith.addf %316, %317 : vector<4x64xf32>
    %319 = math.tanh %318 : vector<4x64xf32>
    %320 = arith.mulf %315, %319 : vector<4x64xf32>
    %c9 = arith.constant 9 : index
    %c0_114 = arith.constant 0 : index
    %c0_115 = arith.constant 0 : index
    %321 = vector.load %arg1[%c9, %c0_114, %c0_115] : memref<16x4x256xf32, #tpu.memory_space<vmem>>, vector<1x4x256xf32>
    %322 = vector.shape_cast %321 : vector<1x4x256xf32> to vector<4x256xf32>
    %cst_116 = arith.constant dense<0.000000e+00> : vector<4x256xf32>
    %323 = tpu.matmul %320, %5, %cst_116 {dimension_numbers = #tpu.dot_dimension_numbers<[1], [0], [0], [1], [0, 0, 1, 1], [], []>} : vector<4x64xf32>, vector<64x256xf32>, vector<4x256xf32> -> vector<4x256xf32>
    %324 = arith.addf %322, %323 : vector<4x256xf32>
    %325 = vector.extract_strided_slice %324 {offsets = [0, 0], sizes = [4, 64], strides = [1, 1]} : vector<4x256xf32> to vector<4x64xf32>
    %cst_117 = arith.constant 0.000000e+00 : f32
    %326 = vector.broadcast %cst_117 : f32 to vector<4x64xf32>
    %327 = arith.subf %326, %325 : vector<4x64xf32>
    %328 = math.exp %327 : vector<4x64xf32>
    %cst_118 = arith.constant 1.000000e+00 : f32
    %329 = vector.broadcast %cst_118 : f32 to vector<4x64xf32>
    %330 = arith.addf %329, %328 : vector<4x64xf32>
    %cst_119 = arith.constant 1.000000e+00 : f32
    %331 = vector.broadcast %cst_119 : f32 to vector<4x64xf32>
    %332 = arith.divf %331, %330 : vector<4x64xf32>
    %333 = vector.extract_strided_slice %324 {offsets = [0, 64], sizes = [4, 64], strides = [1, 1]} : vector<4x256xf32> to vector<4x64xf32>
    %cst_120 = arith.constant 0.000000e+00 : f32
    %334 = vector.broadcast %cst_120 : f32 to vector<4x64xf32>
    %335 = arith.subf %334, %333 : vector<4x64xf32>
    %336 = math.exp %335 : vector<4x64xf32>
    %cst_121 = arith.constant 1.000000e+00 : f32
    %337 = vector.broadcast %cst_121 : f32 to vector<4x64xf32>
    %338 = arith.addf %337, %336 : vector<4x64xf32>
    %cst_122 = arith.constant 1.000000e+00 : f32
    %339 = vector.broadcast %cst_122 : f32 to vector<4x64xf32>
    %340 = arith.divf %339, %338 : vector<4x64xf32>
    %341 = vector.extract_strided_slice %324 {offsets = [0, 128], sizes = [4, 64], strides = [1, 1]} : vector<4x256xf32> to vector<4x64xf32>
    %342 = math.tanh %341 : vector<4x64xf32>
    %343 = vector.extract_strided_slice %324 {offsets = [0, 192], sizes = [4, 64], strides = [1, 1]} : vector<4x256xf32> to vector<4x64xf32>
    %cst_123 = arith.constant 0.000000e+00 : f32
    %344 = vector.broadcast %cst_123 : f32 to vector<4x64xf32>
    %345 = arith.subf %344, %343 : vector<4x64xf32>
    %346 = math.exp %345 : vector<4x64xf32>
    %cst_124 = arith.constant 1.000000e+00 : f32
    %347 = vector.broadcast %cst_124 : f32 to vector<4x64xf32>
    %348 = arith.addf %347, %346 : vector<4x64xf32>
    %cst_125 = arith.constant 1.000000e+00 : f32
    %349 = vector.broadcast %cst_125 : f32 to vector<4x64xf32>
    %350 = arith.divf %349, %348 : vector<4x64xf32>
    %351 = arith.mulf %340, %318 : vector<4x64xf32>
    %352 = arith.mulf %332, %342 : vector<4x64xf32>
    %353 = arith.addf %351, %352 : vector<4x64xf32>
    %354 = math.tanh %353 : vector<4x64xf32>
    %355 = arith.mulf %350, %354 : vector<4x64xf32>
    %c10 = arith.constant 10 : index
    %c0_126 = arith.constant 0 : index
    %c0_127 = arith.constant 0 : index
    %356 = vector.load %arg1[%c10, %c0_126, %c0_127] : memref<16x4x256xf32, #tpu.memory_space<vmem>>, vector<1x4x256xf32>
    %357 = vector.shape_cast %356 : vector<1x4x256xf32> to vector<4x256xf32>
    %cst_128 = arith.constant dense<0.000000e+00> : vector<4x256xf32>
    %358 = tpu.matmul %355, %5, %cst_128 {dimension_numbers = #tpu.dot_dimension_numbers<[1], [0], [0], [1], [0, 0, 1, 1], [], []>} : vector<4x64xf32>, vector<64x256xf32>, vector<4x256xf32> -> vector<4x256xf32>
    %359 = arith.addf %357, %358 : vector<4x256xf32>
    %360 = vector.extract_strided_slice %359 {offsets = [0, 0], sizes = [4, 64], strides = [1, 1]} : vector<4x256xf32> to vector<4x64xf32>
    %cst_129 = arith.constant 0.000000e+00 : f32
    %361 = vector.broadcast %cst_129 : f32 to vector<4x64xf32>
    %362 = arith.subf %361, %360 : vector<4x64xf32>
    %363 = math.exp %362 : vector<4x64xf32>
    %cst_130 = arith.constant 1.000000e+00 : f32
    %364 = vector.broadcast %cst_130 : f32 to vector<4x64xf32>
    %365 = arith.addf %364, %363 : vector<4x64xf32>
    %cst_131 = arith.constant 1.000000e+00 : f32
    %366 = vector.broadcast %cst_131 : f32 to vector<4x64xf32>
    %367 = arith.divf %366, %365 : vector<4x64xf32>
    %368 = vector.extract_strided_slice %359 {offsets = [0, 64], sizes = [4, 64], strides = [1, 1]} : vector<4x256xf32> to vector<4x64xf32>
    %cst_132 = arith.constant 0.000000e+00 : f32
    %369 = vector.broadcast %cst_132 : f32 to vector<4x64xf32>
    %370 = arith.subf %369, %368 : vector<4x64xf32>
    %371 = math.exp %370 : vector<4x64xf32>
    %cst_133 = arith.constant 1.000000e+00 : f32
    %372 = vector.broadcast %cst_133 : f32 to vector<4x64xf32>
    %373 = arith.addf %372, %371 : vector<4x64xf32>
    %cst_134 = arith.constant 1.000000e+00 : f32
    %374 = vector.broadcast %cst_134 : f32 to vector<4x64xf32>
    %375 = arith.divf %374, %373 : vector<4x64xf32>
    %376 = vector.extract_strided_slice %359 {offsets = [0, 128], sizes = [4, 64], strides = [1, 1]} : vector<4x256xf32> to vector<4x64xf32>
    %377 = math.tanh %376 : vector<4x64xf32>
    %378 = vector.extract_strided_slice %359 {offsets = [0, 192], sizes = [4, 64], strides = [1, 1]} : vector<4x256xf32> to vector<4x64xf32>
    %cst_135 = arith.constant 0.000000e+00 : f32
    %379 = vector.broadcast %cst_135 : f32 to vector<4x64xf32>
    %380 = arith.subf %379, %378 : vector<4x64xf32>
    %381 = math.exp %380 : vector<4x64xf32>
    %cst_136 = arith.constant 1.000000e+00 : f32
    %382 = vector.broadcast %cst_136 : f32 to vector<4x64xf32>
    %383 = arith.addf %382, %381 : vector<4x64xf32>
    %cst_137 = arith.constant 1.000000e+00 : f32
    %384 = vector.broadcast %cst_137 : f32 to vector<4x64xf32>
    %385 = arith.divf %384, %383 : vector<4x64xf32>
    %386 = arith.mulf %375, %353 : vector<4x64xf32>
    %387 = arith.mulf %367, %377 : vector<4x64xf32>
    %388 = arith.addf %386, %387 : vector<4x64xf32>
    %389 = math.tanh %388 : vector<4x64xf32>
    %390 = arith.mulf %385, %389 : vector<4x64xf32>
    %c11 = arith.constant 11 : index
    %c0_138 = arith.constant 0 : index
    %c0_139 = arith.constant 0 : index
    %391 = vector.load %arg1[%c11, %c0_138, %c0_139] : memref<16x4x256xf32, #tpu.memory_space<vmem>>, vector<1x4x256xf32>
    %392 = vector.shape_cast %391 : vector<1x4x256xf32> to vector<4x256xf32>
    %cst_140 = arith.constant dense<0.000000e+00> : vector<4x256xf32>
    %393 = tpu.matmul %390, %5, %cst_140 {dimension_numbers = #tpu.dot_dimension_numbers<[1], [0], [0], [1], [0, 0, 1, 1], [], []>} : vector<4x64xf32>, vector<64x256xf32>, vector<4x256xf32> -> vector<4x256xf32>
    %394 = arith.addf %392, %393 : vector<4x256xf32>
    %395 = vector.extract_strided_slice %394 {offsets = [0, 0], sizes = [4, 64], strides = [1, 1]} : vector<4x256xf32> to vector<4x64xf32>
    %cst_141 = arith.constant 0.000000e+00 : f32
    %396 = vector.broadcast %cst_141 : f32 to vector<4x64xf32>
    %397 = arith.subf %396, %395 : vector<4x64xf32>
    %398 = math.exp %397 : vector<4x64xf32>
    %cst_142 = arith.constant 1.000000e+00 : f32
    %399 = vector.broadcast %cst_142 : f32 to vector<4x64xf32>
    %400 = arith.addf %399, %398 : vector<4x64xf32>
    %cst_143 = arith.constant 1.000000e+00 : f32
    %401 = vector.broadcast %cst_143 : f32 to vector<4x64xf32>
    %402 = arith.divf %401, %400 : vector<4x64xf32>
    %403 = vector.extract_strided_slice %394 {offsets = [0, 64], sizes = [4, 64], strides = [1, 1]} : vector<4x256xf32> to vector<4x64xf32>
    %cst_144 = arith.constant 0.000000e+00 : f32
    %404 = vector.broadcast %cst_144 : f32 to vector<4x64xf32>
    %405 = arith.subf %404, %403 : vector<4x64xf32>
    %406 = math.exp %405 : vector<4x64xf32>
    %cst_145 = arith.constant 1.000000e+00 : f32
    %407 = vector.broadcast %cst_145 : f32 to vector<4x64xf32>
    %408 = arith.addf %407, %406 : vector<4x64xf32>
    %cst_146 = arith.constant 1.000000e+00 : f32
    %409 = vector.broadcast %cst_146 : f32 to vector<4x64xf32>
    %410 = arith.divf %409, %408 : vector<4x64xf32>
    %411 = vector.extract_strided_slice %394 {offsets = [0, 128], sizes = [4, 64], strides = [1, 1]} : vector<4x256xf32> to vector<4x64xf32>
    %412 = math.tanh %411 : vector<4x64xf32>
    %413 = vector.extract_strided_slice %394 {offsets = [0, 192], sizes = [4, 64], strides = [1, 1]} : vector<4x256xf32> to vector<4x64xf32>
    %cst_147 = arith.constant 0.000000e+00 : f32
    %414 = vector.broadcast %cst_147 : f32 to vector<4x64xf32>
    %415 = arith.subf %414, %413 : vector<4x64xf32>
    %416 = math.exp %415 : vector<4x64xf32>
    %cst_148 = arith.constant 1.000000e+00 : f32
    %417 = vector.broadcast %cst_148 : f32 to vector<4x64xf32>
    %418 = arith.addf %417, %416 : vector<4x64xf32>
    %cst_149 = arith.constant 1.000000e+00 : f32
    %419 = vector.broadcast %cst_149 : f32 to vector<4x64xf32>
    %420 = arith.divf %419, %418 : vector<4x64xf32>
    %421 = arith.mulf %410, %388 : vector<4x64xf32>
    %422 = arith.mulf %402, %412 : vector<4x64xf32>
    %423 = arith.addf %421, %422 : vector<4x64xf32>
    %424 = math.tanh %423 : vector<4x64xf32>
    %425 = arith.mulf %420, %424 : vector<4x64xf32>
    %c12 = arith.constant 12 : index
    %c0_150 = arith.constant 0 : index
    %c0_151 = arith.constant 0 : index
    %426 = vector.load %arg1[%c12, %c0_150, %c0_151] : memref<16x4x256xf32, #tpu.memory_space<vmem>>, vector<1x4x256xf32>
    %427 = vector.shape_cast %426 : vector<1x4x256xf32> to vector<4x256xf32>
    %cst_152 = arith.constant dense<0.000000e+00> : vector<4x256xf32>
    %428 = tpu.matmul %425, %5, %cst_152 {dimension_numbers = #tpu.dot_dimension_numbers<[1], [0], [0], [1], [0, 0, 1, 1], [], []>} : vector<4x64xf32>, vector<64x256xf32>, vector<4x256xf32> -> vector<4x256xf32>
    %429 = arith.addf %427, %428 : vector<4x256xf32>
    %430 = vector.extract_strided_slice %429 {offsets = [0, 0], sizes = [4, 64], strides = [1, 1]} : vector<4x256xf32> to vector<4x64xf32>
    %cst_153 = arith.constant 0.000000e+00 : f32
    %431 = vector.broadcast %cst_153 : f32 to vector<4x64xf32>
    %432 = arith.subf %431, %430 : vector<4x64xf32>
    %433 = math.exp %432 : vector<4x64xf32>
    %cst_154 = arith.constant 1.000000e+00 : f32
    %434 = vector.broadcast %cst_154 : f32 to vector<4x64xf32>
    %435 = arith.addf %434, %433 : vector<4x64xf32>
    %cst_155 = arith.constant 1.000000e+00 : f32
    %436 = vector.broadcast %cst_155 : f32 to vector<4x64xf32>
    %437 = arith.divf %436, %435 : vector<4x64xf32>
    %438 = vector.extract_strided_slice %429 {offsets = [0, 64], sizes = [4, 64], strides = [1, 1]} : vector<4x256xf32> to vector<4x64xf32>
    %cst_156 = arith.constant 0.000000e+00 : f32
    %439 = vector.broadcast %cst_156 : f32 to vector<4x64xf32>
    %440 = arith.subf %439, %438 : vector<4x64xf32>
    %441 = math.exp %440 : vector<4x64xf32>
    %cst_157 = arith.constant 1.000000e+00 : f32
    %442 = vector.broadcast %cst_157 : f32 to vector<4x64xf32>
    %443 = arith.addf %442, %441 : vector<4x64xf32>
    %cst_158 = arith.constant 1.000000e+00 : f32
    %444 = vector.broadcast %cst_158 : f32 to vector<4x64xf32>
    %445 = arith.divf %444, %443 : vector<4x64xf32>
    %446 = vector.extract_strided_slice %429 {offsets = [0, 128], sizes = [4, 64], strides = [1, 1]} : vector<4x256xf32> to vector<4x64xf32>
    %447 = math.tanh %446 : vector<4x64xf32>
    %448 = vector.extract_strided_slice %429 {offsets = [0, 192], sizes = [4, 64], strides = [1, 1]} : vector<4x256xf32> to vector<4x64xf32>
    %cst_159 = arith.constant 0.000000e+00 : f32
    %449 = vector.broadcast %cst_159 : f32 to vector<4x64xf32>
    %450 = arith.subf %449, %448 : vector<4x64xf32>
    %451 = math.exp %450 : vector<4x64xf32>
    %cst_160 = arith.constant 1.000000e+00 : f32
    %452 = vector.broadcast %cst_160 : f32 to vector<4x64xf32>
    %453 = arith.addf %452, %451 : vector<4x64xf32>
    %cst_161 = arith.constant 1.000000e+00 : f32
    %454 = vector.broadcast %cst_161 : f32 to vector<4x64xf32>
    %455 = arith.divf %454, %453 : vector<4x64xf32>
    %456 = arith.mulf %445, %423 : vector<4x64xf32>
    %457 = arith.mulf %437, %447 : vector<4x64xf32>
    %458 = arith.addf %456, %457 : vector<4x64xf32>
    %459 = math.tanh %458 : vector<4x64xf32>
    %460 = arith.mulf %455, %459 : vector<4x64xf32>
    %c13 = arith.constant 13 : index
    %c0_162 = arith.constant 0 : index
    %c0_163 = arith.constant 0 : index
    %461 = vector.load %arg1[%c13, %c0_162, %c0_163] : memref<16x4x256xf32, #tpu.memory_space<vmem>>, vector<1x4x256xf32>
    %462 = vector.shape_cast %461 : vector<1x4x256xf32> to vector<4x256xf32>
    %cst_164 = arith.constant dense<0.000000e+00> : vector<4x256xf32>
    %463 = tpu.matmul %460, %5, %cst_164 {dimension_numbers = #tpu.dot_dimension_numbers<[1], [0], [0], [1], [0, 0, 1, 1], [], []>} : vector<4x64xf32>, vector<64x256xf32>, vector<4x256xf32> -> vector<4x256xf32>
    %464 = arith.addf %462, %463 : vector<4x256xf32>
    %465 = vector.extract_strided_slice %464 {offsets = [0, 0], sizes = [4, 64], strides = [1, 1]} : vector<4x256xf32> to vector<4x64xf32>
    %cst_165 = arith.constant 0.000000e+00 : f32
    %466 = vector.broadcast %cst_165 : f32 to vector<4x64xf32>
    %467 = arith.subf %466, %465 : vector<4x64xf32>
    %468 = math.exp %467 : vector<4x64xf32>
    %cst_166 = arith.constant 1.000000e+00 : f32
    %469 = vector.broadcast %cst_166 : f32 to vector<4x64xf32>
    %470 = arith.addf %469, %468 : vector<4x64xf32>
    %cst_167 = arith.constant 1.000000e+00 : f32
    %471 = vector.broadcast %cst_167 : f32 to vector<4x64xf32>
    %472 = arith.divf %471, %470 : vector<4x64xf32>
    %473 = vector.extract_strided_slice %464 {offsets = [0, 64], sizes = [4, 64], strides = [1, 1]} : vector<4x256xf32> to vector<4x64xf32>
    %cst_168 = arith.constant 0.000000e+00 : f32
    %474 = vector.broadcast %cst_168 : f32 to vector<4x64xf32>
    %475 = arith.subf %474, %473 : vector<4x64xf32>
    %476 = math.exp %475 : vector<4x64xf32>
    %cst_169 = arith.constant 1.000000e+00 : f32
    %477 = vector.broadcast %cst_169 : f32 to vector<4x64xf32>
    %478 = arith.addf %477, %476 : vector<4x64xf32>
    %cst_170 = arith.constant 1.000000e+00 : f32
    %479 = vector.broadcast %cst_170 : f32 to vector<4x64xf32>
    %480 = arith.divf %479, %478 : vector<4x64xf32>
    %481 = vector.extract_strided_slice %464 {offsets = [0, 128], sizes = [4, 64], strides = [1, 1]} : vector<4x256xf32> to vector<4x64xf32>
    %482 = math.tanh %481 : vector<4x64xf32>
    %483 = vector.extract_strided_slice %464 {offsets = [0, 192], sizes = [4, 64], strides = [1, 1]} : vector<4x256xf32> to vector<4x64xf32>
    %cst_171 = arith.constant 0.000000e+00 : f32
    %484 = vector.broadcast %cst_171 : f32 to vector<4x64xf32>
    %485 = arith.subf %484, %483 : vector<4x64xf32>
    %486 = math.exp %485 : vector<4x64xf32>
    %cst_172 = arith.constant 1.000000e+00 : f32
    %487 = vector.broadcast %cst_172 : f32 to vector<4x64xf32>
    %488 = arith.addf %487, %486 : vector<4x64xf32>
    %cst_173 = arith.constant 1.000000e+00 : f32
    %489 = vector.broadcast %cst_173 : f32 to vector<4x64xf32>
    %490 = arith.divf %489, %488 : vector<4x64xf32>
    %491 = arith.mulf %480, %458 : vector<4x64xf32>
    %492 = arith.mulf %472, %482 : vector<4x64xf32>
    %493 = arith.addf %491, %492 : vector<4x64xf32>
    %494 = math.tanh %493 : vector<4x64xf32>
    %495 = arith.mulf %490, %494 : vector<4x64xf32>
    %c14 = arith.constant 14 : index
    %c0_174 = arith.constant 0 : index
    %c0_175 = arith.constant 0 : index
    %496 = vector.load %arg1[%c14, %c0_174, %c0_175] : memref<16x4x256xf32, #tpu.memory_space<vmem>>, vector<1x4x256xf32>
    %497 = vector.shape_cast %496 : vector<1x4x256xf32> to vector<4x256xf32>
    %cst_176 = arith.constant dense<0.000000e+00> : vector<4x256xf32>
    %498 = tpu.matmul %495, %5, %cst_176 {dimension_numbers = #tpu.dot_dimension_numbers<[1], [0], [0], [1], [0, 0, 1, 1], [], []>} : vector<4x64xf32>, vector<64x256xf32>, vector<4x256xf32> -> vector<4x256xf32>
    %499 = arith.addf %497, %498 : vector<4x256xf32>
    %500 = vector.extract_strided_slice %499 {offsets = [0, 0], sizes = [4, 64], strides = [1, 1]} : vector<4x256xf32> to vector<4x64xf32>
    %cst_177 = arith.constant 0.000000e+00 : f32
    %501 = vector.broadcast %cst_177 : f32 to vector<4x64xf32>
    %502 = arith.subf %501, %500 : vector<4x64xf32>
    %503 = math.exp %502 : vector<4x64xf32>
    %cst_178 = arith.constant 1.000000e+00 : f32
    %504 = vector.broadcast %cst_178 : f32 to vector<4x64xf32>
    %505 = arith.addf %504, %503 : vector<4x64xf32>
    %cst_179 = arith.constant 1.000000e+00 : f32
    %506 = vector.broadcast %cst_179 : f32 to vector<4x64xf32>
    %507 = arith.divf %506, %505 : vector<4x64xf32>
    %508 = vector.extract_strided_slice %499 {offsets = [0, 64], sizes = [4, 64], strides = [1, 1]} : vector<4x256xf32> to vector<4x64xf32>
    %cst_180 = arith.constant 0.000000e+00 : f32
    %509 = vector.broadcast %cst_180 : f32 to vector<4x64xf32>
    %510 = arith.subf %509, %508 : vector<4x64xf32>
    %511 = math.exp %510 : vector<4x64xf32>
    %cst_181 = arith.constant 1.000000e+00 : f32
    %512 = vector.broadcast %cst_181 : f32 to vector<4x64xf32>
    %513 = arith.addf %512, %511 : vector<4x64xf32>
    %cst_182 = arith.constant 1.000000e+00 : f32
    %514 = vector.broadcast %cst_182 : f32 to vector<4x64xf32>
    %515 = arith.divf %514, %513 : vector<4x64xf32>
    %516 = vector.extract_strided_slice %499 {offsets = [0, 128], sizes = [4, 64], strides = [1, 1]} : vector<4x256xf32> to vector<4x64xf32>
    %517 = math.tanh %516 : vector<4x64xf32>
    %518 = vector.extract_strided_slice %499 {offsets = [0, 192], sizes = [4, 64], strides = [1, 1]} : vector<4x256xf32> to vector<4x64xf32>
    %cst_183 = arith.constant 0.000000e+00 : f32
    %519 = vector.broadcast %cst_183 : f32 to vector<4x64xf32>
    %520 = arith.subf %519, %518 : vector<4x64xf32>
    %521 = math.exp %520 : vector<4x64xf32>
    %cst_184 = arith.constant 1.000000e+00 : f32
    %522 = vector.broadcast %cst_184 : f32 to vector<4x64xf32>
    %523 = arith.addf %522, %521 : vector<4x64xf32>
    %cst_185 = arith.constant 1.000000e+00 : f32
    %524 = vector.broadcast %cst_185 : f32 to vector<4x64xf32>
    %525 = arith.divf %524, %523 : vector<4x64xf32>
    %526 = arith.mulf %515, %493 : vector<4x64xf32>
    %527 = arith.mulf %507, %517 : vector<4x64xf32>
    %528 = arith.addf %526, %527 : vector<4x64xf32>
    %529 = math.tanh %528 : vector<4x64xf32>
    %530 = arith.mulf %525, %529 : vector<4x64xf32>
    %c15 = arith.constant 15 : index
    %c0_186 = arith.constant 0 : index
    %c0_187 = arith.constant 0 : index
    %531 = vector.load %arg1[%c15, %c0_186, %c0_187] : memref<16x4x256xf32, #tpu.memory_space<vmem>>, vector<1x4x256xf32>
    %532 = vector.shape_cast %531 : vector<1x4x256xf32> to vector<4x256xf32>
    %cst_188 = arith.constant dense<0.000000e+00> : vector<4x256xf32>
    %533 = tpu.matmul %530, %5, %cst_188 {dimension_numbers = #tpu.dot_dimension_numbers<[1], [0], [0], [1], [0, 0, 1, 1], [], []>} : vector<4x64xf32>, vector<64x256xf32>, vector<4x256xf32> -> vector<4x256xf32>
    %534 = arith.addf %532, %533 : vector<4x256xf32>
    %535 = vector.extract_strided_slice %534 {offsets = [0, 0], sizes = [4, 64], strides = [1, 1]} : vector<4x256xf32> to vector<4x64xf32>
    %cst_189 = arith.constant 0.000000e+00 : f32
    %536 = vector.broadcast %cst_189 : f32 to vector<4x64xf32>
    %537 = arith.subf %536, %535 : vector<4x64xf32>
    %538 = math.exp %537 : vector<4x64xf32>
    %cst_190 = arith.constant 1.000000e+00 : f32
    %539 = vector.broadcast %cst_190 : f32 to vector<4x64xf32>
    %540 = arith.addf %539, %538 : vector<4x64xf32>
    %cst_191 = arith.constant 1.000000e+00 : f32
    %541 = vector.broadcast %cst_191 : f32 to vector<4x64xf32>
    %542 = arith.divf %541, %540 : vector<4x64xf32>
    %543 = vector.extract_strided_slice %534 {offsets = [0, 64], sizes = [4, 64], strides = [1, 1]} : vector<4x256xf32> to vector<4x64xf32>
    %cst_192 = arith.constant 0.000000e+00 : f32
    %544 = vector.broadcast %cst_192 : f32 to vector<4x64xf32>
    %545 = arith.subf %544, %543 : vector<4x64xf32>
    %546 = math.exp %545 : vector<4x64xf32>
    %cst_193 = arith.constant 1.000000e+00 : f32
    %547 = vector.broadcast %cst_193 : f32 to vector<4x64xf32>
    %548 = arith.addf %547, %546 : vector<4x64xf32>
    %cst_194 = arith.constant 1.000000e+00 : f32
    %549 = vector.broadcast %cst_194 : f32 to vector<4x64xf32>
    %550 = arith.divf %549, %548 : vector<4x64xf32>
    %551 = vector.extract_strided_slice %534 {offsets = [0, 128], sizes = [4, 64], strides = [1, 1]} : vector<4x256xf32> to vector<4x64xf32>
    %552 = math.tanh %551 : vector<4x64xf32>
    %553 = vector.extract_strided_slice %534 {offsets = [0, 192], sizes = [4, 64], strides = [1, 1]} : vector<4x256xf32> to vector<4x64xf32>
    %cst_195 = arith.constant 0.000000e+00 : f32
    %554 = vector.broadcast %cst_195 : f32 to vector<4x64xf32>
    %555 = arith.subf %554, %553 : vector<4x64xf32>
    %556 = math.exp %555 : vector<4x64xf32>
    %cst_196 = arith.constant 1.000000e+00 : f32
    %557 = vector.broadcast %cst_196 : f32 to vector<4x64xf32>
    %558 = arith.addf %557, %556 : vector<4x64xf32>
    %cst_197 = arith.constant 1.000000e+00 : f32
    %559 = vector.broadcast %cst_197 : f32 to vector<4x64xf32>
    %560 = arith.divf %559, %558 : vector<4x64xf32>
    %561 = arith.mulf %550, %528 : vector<4x64xf32>
    %562 = arith.mulf %542, %552 : vector<4x64xf32>
    %563 = arith.addf %561, %562 : vector<4x64xf32>
    %564 = math.tanh %563 : vector<4x64xf32>
    %565 = arith.mulf %560, %564 : vector<4x64xf32>
    %c0_198 = arith.constant 0 : index
    %c0_199 = arith.constant 0 : index
    %566 = vector.load %arg6[%c0_198, %c0_199] : memref<4x64xf32, #tpu.memory_space<vmem>>, vector<4x64xf32>
    tpu.vector_store %arg6[%c0_198, %c0_199], %565 {strides = array<i32>} : memref<4x64xf32, #tpu.memory_space<vmem>>, vector<4x64xf32>,
    %c0_200 = arith.constant 0 : index
    %c0_201 = arith.constant 0 : index
    %567 = vector.load %arg7[%c0_200, %c0_201] : memref<4x64xf32, #tpu.memory_space<vmem>>, vector<4x64xf32>
    tpu.vector_store %arg7[%c0_200, %c0_201], %563 {strides = array<i32>} : memref<4x64xf32, #tpu.memory_space<vmem>>, vector<4x64xf32>,
    %568 = vector.shape_cast %40 : vector<4x64xf32> to vector<1x4x64xf32>
    %569 = vector.shape_cast %75 : vector<4x64xf32> to vector<1x4x64xf32>
    %570 = vector.shape_cast %110 : vector<4x64xf32> to vector<1x4x64xf32>
    %571 = vector.shape_cast %145 : vector<4x64xf32> to vector<1x4x64xf32>
    %572 = vector.shape_cast %180 : vector<4x64xf32> to vector<1x4x64xf32>
    %573 = vector.shape_cast %215 : vector<4x64xf32> to vector<1x4x64xf32>
    %574 = vector.shape_cast %250 : vector<4x64xf32> to vector<1x4x64xf32>
    %575 = vector.shape_cast %285 : vector<4x64xf32> to vector<1x4x64xf32>
    %576 = vector.shape_cast %320 : vector<4x64xf32> to vector<1x4x64xf32>
    %577 = vector.shape_cast %355 : vector<4x64xf32> to vector<1x4x64xf32>
    %578 = vector.shape_cast %390 : vector<4x64xf32> to vector<1x4x64xf32>
    %579 = vector.shape_cast %425 : vector<4x64xf32> to vector<1x4x64xf32>
    %580 = vector.shape_cast %460 : vector<4x64xf32> to vector<1x4x64xf32>
    %581 = vector.shape_cast %495 : vector<4x64xf32> to vector<1x4x64xf32>
    %582 = vector.shape_cast %530 : vector<4x64xf32> to vector<1x4x64xf32>
    %583 = vector.shape_cast %565 : vector<4x64xf32> to vector<1x4x64xf32>
    %584 = tpu.concatenate %568, %569, %570, %571, %572, %573, %574, %575, %576, %577, %578, %579, %580, %581, %582, %583 in 0 : vector<1x4x64xf32>, vector<1x4x64xf32>, vector<1x4x64xf32>, vector<1x4x64xf32>, vector<1x4x64xf32>, vector<1x4x64xf32>, vector<1x4x64xf32>, vector<1x4x64xf32>, vector<1x4x64xf32>, vector<1x4x64xf32>, vector<1x4x64xf32>, vector<1x4x64xf32>, vector<1x4x64xf32>, vector<1x4x64xf32>, vector<1x4x64xf32>, vector<1x4x64xf32> -> vector<16x4x64xf32>
    %c0_202 = arith.constant 0 : index
    %c0_203 = arith.constant 0 : index
    %585 = vector.load %arg3[%c0_202, %c0_203] : memref<1x64xf32, #tpu.memory_space<vmem>>, vector<1x64xf32>
    %586 = vector.shape_cast %585 : vector<1x64xf32> to vector<1x1x64xf32>
    %587 = vector.broadcast %586 : vector<1x1x64xf32> to vector<16x4x64xf32>
    %588 = arith.mulf %584, %587 : vector<16x4x64xf32>
    %cst_204 = arith.constant dense<0.000000e+00> : vector<16x4xf32>
    %589 = vector.multi_reduction <add>, %588, %cst_204 [2] : vector<16x4x64xf32> to vector<16x4xf32>
    %c0_205 = arith.constant 0 : index
    %c0_206 = arith.constant 0 : index
    %590 = memref.load %arg4[%c0_205, %c0_206] : memref<1x1xf32, #tpu.memory_space<smem>>
    %591 = vector.broadcast %590 : f32 to vector<16x4xf32>
    %592 = arith.addf %589, %591 : vector<16x4xf32>
    %c0_207 = arith.constant 0 : index
    %c0_208 = arith.constant 0 : index
    %593 = vector.load %arg5[%c0_207, %c0_208] : memref<16x4xf32, #tpu.memory_space<vmem>>, vector<16x4xf32>
    tpu.vector_store %arg5[%c0_207, %c0_208], %592 {strides = array<i32>} : memref<16x4xf32, #tpu.memory_space<vmem>>, vector<16x4xf32>,
    return
  }
  func.func @transform_0(%arg0: i32) -> (i32, i32, i32) {
    %c0_i32 = arith.constant 0 : i32
    %c0_i32_0 = arith.constant 0 : i32
    %c0_i32_1 = arith.constant 0 : i32
    return %arg0, %c0_i32, %c0_i32_0 : i32, i32, i32
  }
  func.func @transform_1(%arg0: i32) -> (i32, i32) {
    %c0_i32 = arith.constant 0 : i32
    %c0_i32_0 = arith.constant 0 : i32
    %c0_i32_1 = arith.constant 0 : i32
    return %c0_i32, %c0_i32_0 : i32, i32
  }
  func.func @transform_2(%arg0: i32) -> (i32, i32) {
    %c0_i32 = arith.constant 0 : i32
    %c0_i32_0 = arith.constant 0 : i32
    %c0_i32_1 = arith.constant 0 : i32
    return %c0_i32, %c0_i32_0 : i32, i32
  }
  func.func @transform_3(%arg0: i32) -> (i32, i32) {
    %c0_i32 = arith.constant 0 : i32
    %c0_i32_0 = arith.constant 0 : i32
    %c0_i32_1 = arith.constant 0 : i32
    return %c0_i32, %c0_i32_0 : i32, i32
  }
  func.func @transform_4(%arg0: i32) -> (i32, i32) {
    %c0_i32 = arith.constant 0 : i32
    %c0_i32_0 = arith.constant 0 : i32
    return %arg0, %c0_i32 : i32, i32
  }
}

module attributes {stable_mosaic.version = 11 : i64} {
  func.func @_last_query_attn_kernel(%arg0: i32, %arg1: memref<4x64xf32, #tpu.memory_space<vmem>>, %arg2: memref<4x16x64xf32, #tpu.memory_space<vmem>>, %arg3: memref<64x64xf32, #tpu.memory_space<vmem>>, %arg4: memref<1x64xf32, #tpu.memory_space<vmem>>, %arg5: memref<64x128xf32, #tpu.memory_space<vmem>>, %arg6: memref<1x128xf32, #tpu.memory_space<vmem>>, %arg7: memref<64x64xf32, #tpu.memory_space<vmem>>, %arg8: memref<1x64xf32, #tpu.memory_space<vmem>>, %arg9: memref<4x64xf32, #tpu.memory_space<vmem>>, %arg10: memref<4x64xf32, #tpu.memory_space<vmem>>, %arg11: memref<4x2xf32, #tpu.memory_space<vmem>>, %arg12: memref<4x2xf32, #tpu.memory_space<vmem>>, %arg13: memref<4x64xf32, #tpu.memory_space<vmem>>) attributes {dimension_semantics = [#tpu.dimension_semantics<arbitrary>], iteration_bounds = array<i64: 1>, scalar_prefetch = 0 : i64, scratch_operands = 4 : i64, tpu.core_type = #tpu.core_type<tc>, window_params = [{pipeline_mode = #tpu.pipeline_mode<synchronous>, transform_indices = @transform_0, window_bounds = array<i64: 4, 64>}, {transform_indices = @transform_1, window_bounds = array<i64: 4, 16, 64>}, {pipeline_mode = #tpu.pipeline_mode<synchronous>, transform_indices = @transform_2, window_bounds = array<i64: 64, 64>}, {pipeline_mode = #tpu.pipeline_mode<synchronous>, transform_indices = @transform_3, window_bounds = array<i64: 1, 64>}, {pipeline_mode = #tpu.pipeline_mode<synchronous>, transform_indices = @transform_4, window_bounds = array<i64: 64, 128>}, {pipeline_mode = #tpu.pipeline_mode<synchronous>, transform_indices = @transform_5, window_bounds = array<i64: 1, 128>}, {pipeline_mode = #tpu.pipeline_mode<synchronous>, transform_indices = @transform_6, window_bounds = array<i64: 64, 64>}, {pipeline_mode = #tpu.pipeline_mode<synchronous>, transform_indices = @transform_7, window_bounds = array<i64: 1, 64>}, {pipeline_mode = #tpu.pipeline_mode<synchronous>, transform_indices = @transform_8, window_bounds = array<i64: 4, 64>}]} {
    %c0_i32 = arith.constant 0 : i32
    %0 = arith.cmpi eq, %arg0, %c0_i32 : i32
    %1 = arith.extui %0 : i1 to i32
    %c0_i32_0 = arith.constant 0 : i32
    %2 = arith.cmpi ne, %1, %c0_i32_0 : i32
    scf.if %2 {
      %c0_31 = arith.constant 0 : index
      %c0_32 = arith.constant 0 : index
      %82 = vector.load %arg1[%c0_31, %c0_32] : memref<4x64xf32, #tpu.memory_space<vmem>>, vector<4x64xf32>
      %c0_33 = arith.constant 0 : index
      %c0_34 = arith.constant 0 : index
      %83 = vector.load %arg3[%c0_33, %c0_34] : memref<64x64xf32, #tpu.memory_space<vmem>>, vector<64x64xf32>
      %cst_35 = arith.constant dense<0.000000e+00> : vector<4x64xf32>
      %84 = tpu.matmul %82, %83, %cst_35 {dimension_numbers = #tpu.dot_dimension_numbers<[1], [0], [0], [1], [0, 0, 1, 1], [], []>} : vector<4x64xf32>, vector<64x64xf32>, vector<4x64xf32> -> vector<4x64xf32>
      %c0_36 = arith.constant 0 : index
      %c0_37 = arith.constant 0 : index
      %85 = vector.load %arg4[%c0_36, %c0_37] : memref<1x64xf32, #tpu.memory_space<vmem>>, vector<1x64xf32>
      %86 = vector.broadcast %85 : vector<1x64xf32> to vector<4x64xf32>
      %87 = arith.addf %84, %86 : vector<4x64xf32>
      %c0_38 = arith.constant 0 : index
      %c0_39 = arith.constant 0 : index
      %88 = vector.load %arg10[%c0_38, %c0_39] : memref<4x64xf32, #tpu.memory_space<vmem>>, vector<4x64xf32>
      tpu.vector_store %arg10[%c0_38, %c0_39], %87 {strides = array<i32>} : memref<4x64xf32, #tpu.memory_space<vmem>>, vector<4x64xf32>,
      %cst_40 = arith.constant 0xFF800000 : f32
      %89 = vector.broadcast %cst_40 : f32 to vector<4x2xf32>
      %c0_41 = arith.constant 0 : index
      %c0_42 = arith.constant 0 : index
      %90 = vector.load %arg11[%c0_41, %c0_42] : memref<4x2xf32, #tpu.memory_space<vmem>>, vector<4x2xf32>
      tpu.vector_store %arg11[%c0_41, %c0_42], %89 {strides = array<i32>} : memref<4x2xf32, #tpu.memory_space<vmem>>, vector<4x2xf32>,
      %cst_43 = arith.constant 0.000000e+00 : f32
      %91 = vector.broadcast %cst_43 : f32 to vector<4x2xf32>
      %c0_44 = arith.constant 0 : index
      %c0_45 = arith.constant 0 : index
      %92 = vector.load %arg12[%c0_44, %c0_45] : memref<4x2xf32, #tpu.memory_space<vmem>>, vector<4x2xf32>
      tpu.vector_store %arg12[%c0_44, %c0_45], %91 {strides = array<i32>} : memref<4x2xf32, #tpu.memory_space<vmem>>, vector<4x2xf32>,
      %cst_46 = arith.constant 0.000000e+00 : f32
      %93 = vector.broadcast %cst_46 : f32 to vector<4x64xf32>
      %c0_47 = arith.constant 0 : index
      %c0_48 = arith.constant 0 : index
      %94 = vector.load %arg13[%c0_47, %c0_48] : memref<4x64xf32, #tpu.memory_space<vmem>>, vector<4x64xf32>
      tpu.vector_store %arg13[%c0_47, %c0_48], %93 {strides = array<i32>} : memref<4x64xf32, #tpu.memory_space<vmem>>, vector<4x64xf32>,
    } else {
    }
    %c0 = arith.constant 0 : index
    %c0_1 = arith.constant 0 : index
    %c0_2 = arith.constant 0 : index
    %3 = vector.load %arg2[%c0, %c0_1, %c0_2] : memref<4x16x64xf32, #tpu.memory_space<vmem>>, vector<4x16x64xf32>
    %4 = vector.shape_cast %3 : vector<4x16x64xf32> to vector<64x64xf32>
    %c0_3 = arith.constant 0 : index
    %c0_4 = arith.constant 0 : index
    %5 = vector.load %arg5[%c0_3, %c0_4] : memref<64x128xf32, #tpu.memory_space<vmem>>, vector<64x128xf32>
    %cst = arith.constant dense<0.000000e+00> : vector<64x128xf32>
    %6 = tpu.matmul %4, %5, %cst {dimension_numbers = #tpu.dot_dimension_numbers<[1], [0], [0], [1], [0, 0, 1, 1], [], []>} : vector<64x64xf32>, vector<64x128xf32>, vector<64x128xf32> -> vector<64x128xf32>
    %c0_5 = arith.constant 0 : index
    %c0_6 = arith.constant 0 : index
    %7 = vector.load %arg6[%c0_5, %c0_6] : memref<1x128xf32, #tpu.memory_space<vmem>>, vector<1x128xf32>
    %8 = vector.broadcast %7 : vector<1x128xf32> to vector<64x128xf32>
    %9 = arith.addf %6, %8 : vector<64x128xf32>
    %10 = vector.shape_cast %9 : vector<64x128xf32> to vector<4x16x128xf32>
    %c0_7 = arith.constant 0 : index
    %c0_8 = arith.constant 0 : index
    %11 = vector.load %arg10[%c0_7, %c0_8] : memref<4x64xf32, #tpu.memory_space<vmem>>, vector<4x64xf32>
    %c0_9 = arith.constant 0 : index
    %c0_10 = arith.constant 0 : index
    %12 = vector.load %arg11[%c0_9, %c0_10] : memref<4x2xf32, #tpu.memory_space<vmem>>, vector<4x2xf32>
    %c0_11 = arith.constant 0 : index
    %c0_12 = arith.constant 0 : index
    %13 = vector.load %arg12[%c0_11, %c0_12] : memref<4x2xf32, #tpu.memory_space<vmem>>, vector<4x2xf32>
    %c0_13 = arith.constant 0 : index
    %c0_14 = arith.constant 0 : index
    %14 = vector.load %arg13[%c0_13, %c0_14] : memref<4x64xf32, #tpu.memory_space<vmem>>, vector<4x64xf32>
    %15 = vector.extract_strided_slice %11 {offsets = [0, 0], sizes = [4, 32], strides = [1, 1]} : vector<4x64xf32> to vector<4x32xf32>
    %16 = vector.shape_cast %15 : vector<4x32xf32> to vector<4x1x32xf32>
    %17 = vector.extract_strided_slice %10 {offsets = [0, 0, 0], sizes = [4, 16, 32], strides = [1, 1, 1]} : vector<4x16x128xf32> to vector<4x16x32xf32>
    %18 = vector.broadcast %16 : vector<4x1x32xf32> to vector<4x16x32xf32>
    %19 = arith.mulf %18, %17 : vector<4x16x32xf32>
    %cst_15 = arith.constant dense<0.000000e+00> : vector<4x16xf32>
    %20 = vector.multi_reduction <add>, %19, %cst_15 [2] : vector<4x16x32xf32> to vector<4x16xf32>
    %21 = vector.extract_strided_slice %12 {offsets = [0, 0], sizes = [4, 1], strides = [1, 1]} : vector<4x2xf32> to vector<4x1xf32>
    %cst_16 = arith.constant dense<0xFF800000> : vector<4xf32>
    %22 = vector.multi_reduction <maximumf>, %20, %cst_16 [1] : vector<4x16xf32> to vector<4xf32>
    %23 = vector.shape_cast %22 : vector<4xf32> to vector<4x1xf32>
    %24 = arith.maximumf %21, %23 : vector<4x1xf32>
    %25 = arith.subf %21, %24 : vector<4x1xf32>
    %26 = math.exp %25 : vector<4x1xf32>
    %27 = vector.broadcast %24 : vector<4x1xf32> to vector<4x16xf32>
    %28 = arith.subf %20, %27 : vector<4x16xf32>
    %29 = math.exp %28 : vector<4x16xf32>
    %30 = vector.extract_strided_slice %13 {offsets = [0, 0], sizes = [4, 1], strides = [1, 1]} : vector<4x2xf32> to vector<4x1xf32>
    %31 = arith.mulf %26, %30 : vector<4x1xf32>
    %cst_17 = arith.constant dense<0.000000e+00> : vector<4xf32>
    %32 = vector.multi_reduction <add>, %29, %cst_17 [1] : vector<4x16xf32> to vector<4xf32>
    %33 = vector.shape_cast %32 : vector<4xf32> to vector<4x1xf32>
    %34 = arith.addf %31, %33 : vector<4x1xf32>
    %35 = vector.shape_cast %29 : vector<4x16xf32> to vector<4x16x1xf32>
    %36 = vector.extract_strided_slice %10 {offsets = [0, 0, 64], sizes = [4, 16, 32], strides = [1, 1, 1]} : vector<4x16x128xf32> to vector<4x16x32xf32>
    %37 = vector.broadcast %35 : vector<4x16x1xf32> to vector<4x16x32xf32>
    %38 = arith.mulf %37, %36 : vector<4x16x32xf32>
    %cst_18 = arith.constant dense<0.000000e+00> : vector<4x32xf32>
    %39 = vector.multi_reduction <add>, %38, %cst_18 [1] : vector<4x16x32xf32> to vector<4x32xf32>
    %40 = vector.extract_strided_slice %14 {offsets = [0, 0], sizes = [4, 32], strides = [1, 1]} : vector<4x64xf32> to vector<4x32xf32>
    %41 = vector.broadcast %26 : vector<4x1xf32> to vector<4x32xf32>
    %42 = arith.mulf %41, %40 : vector<4x32xf32>
    %43 = arith.addf %42, %39 : vector<4x32xf32>
    %44 = vector.extract_strided_slice %11 {offsets = [0, 32], sizes = [4, 32], strides = [1, 1]} : vector<4x64xf32> to vector<4x32xf32>
    %45 = vector.shape_cast %44 : vector<4x32xf32> to vector<4x1x32xf32>
    %46 = vector.extract_strided_slice %10 {offsets = [0, 0, 32], sizes = [4, 16, 32], strides = [1, 1, 1]} : vector<4x16x128xf32> to vector<4x16x32xf32>
    %47 = vector.broadcast %45 : vector<4x1x32xf32> to vector<4x16x32xf32>
    %48 = arith.mulf %47, %46 : vector<4x16x32xf32>
    %cst_19 = arith.constant dense<0.000000e+00> : vector<4x16xf32>
    %49 = vector.multi_reduction <add>, %48, %cst_19 [2] : vector<4x16x32xf32> to vector<4x16xf32>
    %50 = vector.extract_strided_slice %12 {offsets = [0, 1], sizes = [4, 1], strides = [1, 1]} : vector<4x2xf32> to vector<4x1xf32>
    %cst_20 = arith.constant dense<0xFF800000> : vector<4xf32>
    %51 = vector.multi_reduction <maximumf>, %49, %cst_20 [1] : vector<4x16xf32> to vector<4xf32>
    %52 = vector.shape_cast %51 : vector<4xf32> to vector<4x1xf32>
    %53 = arith.maximumf %50, %52 : vector<4x1xf32>
    %54 = arith.subf %50, %53 : vector<4x1xf32>
    %55 = math.exp %54 : vector<4x1xf32>
    %56 = vector.broadcast %53 : vector<4x1xf32> to vector<4x16xf32>
    %57 = arith.subf %49, %56 : vector<4x16xf32>
    %58 = math.exp %57 : vector<4x16xf32>
    %59 = vector.extract_strided_slice %13 {offsets = [0, 1], sizes = [4, 1], strides = [1, 1]} : vector<4x2xf32> to vector<4x1xf32>
    %60 = arith.mulf %55, %59 : vector<4x1xf32>
    %cst_21 = arith.constant dense<0.000000e+00> : vector<4xf32>
    %61 = vector.multi_reduction <add>, %58, %cst_21 [1] : vector<4x16xf32> to vector<4xf32>
    %62 = vector.shape_cast %61 : vector<4xf32> to vector<4x1xf32>
    %63 = arith.addf %60, %62 : vector<4x1xf32>
    %64 = vector.shape_cast %58 : vector<4x16xf32> to vector<4x16x1xf32>
    %65 = vector.extract_strided_slice %10 {offsets = [0, 0, 96], sizes = [4, 16, 32], strides = [1, 1, 1]} : vector<4x16x128xf32> to vector<4x16x32xf32>
    %66 = vector.broadcast %64 : vector<4x16x1xf32> to vector<4x16x32xf32>
    %67 = arith.mulf %66, %65 : vector<4x16x32xf32>
    %cst_22 = arith.constant dense<0.000000e+00> : vector<4x32xf32>
    %68 = vector.multi_reduction <add>, %67, %cst_22 [1] : vector<4x16x32xf32> to vector<4x32xf32>
    %69 = vector.extract_strided_slice %14 {offsets = [0, 32], sizes = [4, 32], strides = [1, 1]} : vector<4x64xf32> to vector<4x32xf32>
    %70 = vector.broadcast %55 : vector<4x1xf32> to vector<4x32xf32>
    %71 = arith.mulf %70, %69 : vector<4x32xf32>
    %72 = arith.addf %71, %68 : vector<4x32xf32>
    %73 = tpu.concatenate %24, %53 in 1 : vector<4x1xf32>, vector<4x1xf32> -> vector<4x2xf32>
    %c0_23 = arith.constant 0 : index
    %c0_24 = arith.constant 0 : index
    %74 = vector.load %arg11[%c0_23, %c0_24] : memref<4x2xf32, #tpu.memory_space<vmem>>, vector<4x2xf32>
    tpu.vector_store %arg11[%c0_23, %c0_24], %73 {strides = array<i32>} : memref<4x2xf32, #tpu.memory_space<vmem>>, vector<4x2xf32>,
    %75 = tpu.concatenate %34, %63 in 1 : vector<4x1xf32>, vector<4x1xf32> -> vector<4x2xf32>
    %c0_25 = arith.constant 0 : index
    %c0_26 = arith.constant 0 : index
    %76 = vector.load %arg12[%c0_25, %c0_26] : memref<4x2xf32, #tpu.memory_space<vmem>>, vector<4x2xf32>
    tpu.vector_store %arg12[%c0_25, %c0_26], %75 {strides = array<i32>} : memref<4x2xf32, #tpu.memory_space<vmem>>, vector<4x2xf32>,
    %77 = tpu.concatenate %43, %72 in 1 : vector<4x32xf32>, vector<4x32xf32> -> vector<4x64xf32>
    %c0_27 = arith.constant 0 : index
    %c0_28 = arith.constant 0 : index
    %78 = vector.load %arg13[%c0_27, %c0_28] : memref<4x64xf32, #tpu.memory_space<vmem>>, vector<4x64xf32>
    tpu.vector_store %arg13[%c0_27, %c0_28], %77 {strides = array<i32>} : memref<4x64xf32, #tpu.memory_space<vmem>>, vector<4x64xf32>,
    %c0_i32_29 = arith.constant 0 : i32
    %79 = arith.cmpi eq, %arg0, %c0_i32_29 : i32
    %80 = arith.extui %79 : i1 to i32
    %c0_i32_30 = arith.constant 0 : i32
    %81 = arith.cmpi ne, %80, %c0_i32_30 : i32
    scf.if %81 {
      %c0_31 = arith.constant 0 : index
      %c0_32 = arith.constant 0 : index
      %82 = vector.load %arg12[%c0_31, %c0_32] : memref<4x2xf32, #tpu.memory_space<vmem>>, vector<4x2xf32>
      %83 = tpu.reciprocal %82 {approx = true} : vector<4x2xf32> -> vector<4x2xf32>
      %c0_33 = arith.constant 0 : index
      %c0_34 = arith.constant 0 : index
      %84 = vector.load %arg13[%c0_33, %c0_34] : memref<4x64xf32, #tpu.memory_space<vmem>>, vector<4x64xf32>
      %85 = vector.extract_strided_slice %84 {offsets = [0, 0], sizes = [4, 32], strides = [1, 1]} : vector<4x64xf32> to vector<4x32xf32>
      %86 = vector.extract_strided_slice %83 {offsets = [0, 0], sizes = [4, 1], strides = [1, 1]} : vector<4x2xf32> to vector<4x1xf32>
      %87 = vector.broadcast %86 : vector<4x1xf32> to vector<4x32xf32>
      %88 = arith.mulf %85, %87 : vector<4x32xf32>
      %89 = vector.extract_strided_slice %84 {offsets = [0, 32], sizes = [4, 32], strides = [1, 1]} : vector<4x64xf32> to vector<4x32xf32>
      %90 = vector.extract_strided_slice %83 {offsets = [0, 1], sizes = [4, 1], strides = [1, 1]} : vector<4x2xf32> to vector<4x1xf32>
      %91 = vector.broadcast %90 : vector<4x1xf32> to vector<4x32xf32>
      %92 = arith.mulf %89, %91 : vector<4x32xf32>
      %93 = tpu.concatenate %88, %92 in 1 : vector<4x32xf32>, vector<4x32xf32> -> vector<4x64xf32>
      %c0_35 = arith.constant 0 : index
      %c0_36 = arith.constant 0 : index
      %94 = vector.load %arg7[%c0_35, %c0_36] : memref<64x64xf32, #tpu.memory_space<vmem>>, vector<64x64xf32>
      %cst_37 = arith.constant dense<0.000000e+00> : vector<4x64xf32>
      %95 = tpu.matmul %93, %94, %cst_37 {dimension_numbers = #tpu.dot_dimension_numbers<[1], [0], [0], [1], [0, 0, 1, 1], [], []>} : vector<4x64xf32>, vector<64x64xf32>, vector<4x64xf32> -> vector<4x64xf32>
      %c0_38 = arith.constant 0 : index
      %c0_39 = arith.constant 0 : index
      %96 = vector.load %arg8[%c0_38, %c0_39] : memref<1x64xf32, #tpu.memory_space<vmem>>, vector<1x64xf32>
      %97 = vector.broadcast %96 : vector<1x64xf32> to vector<4x64xf32>
      %98 = arith.addf %95, %97 : vector<4x64xf32>
      %c0_40 = arith.constant 0 : index
      %c0_41 = arith.constant 0 : index
      %99 = vector.load %arg9[%c0_40, %c0_41] : memref<4x64xf32, #tpu.memory_space<vmem>>, vector<4x64xf32>
      tpu.vector_store %arg9[%c0_40, %c0_41], %98 {strides = array<i32>} : memref<4x64xf32, #tpu.memory_space<vmem>>, vector<4x64xf32>,
    } else {
    }
    return
  }
  func.func @transform_0(%arg0: i32) -> (i32, i32) {
    %c0_i32 = arith.constant 0 : i32
    %c0_i32_0 = arith.constant 0 : i32
    %c0_i32_1 = arith.constant 0 : i32
    return %c0_i32, %c0_i32_0 : i32, i32
  }
  func.func @transform_1(%arg0: i32) -> (i32, i32, i32) {
    %c0_i32 = arith.constant 0 : i32
    %c0_i32_0 = arith.constant 0 : i32
    %c0_i32_1 = arith.constant 0 : i32
    return %c0_i32, %arg0, %c0_i32_0 : i32, i32, i32
  }
  func.func @transform_2(%arg0: i32) -> (i32, i32) {
    %c0_i32 = arith.constant 0 : i32
    %c0_i32_0 = arith.constant 0 : i32
    %c0_i32_1 = arith.constant 0 : i32
    return %c0_i32, %c0_i32_0 : i32, i32
  }
  func.func @transform_3(%arg0: i32) -> (i32, i32) {
    %c0_i32 = arith.constant 0 : i32
    %c0_i32_0 = arith.constant 0 : i32
    %c0_i32_1 = arith.constant 0 : i32
    return %c0_i32, %c0_i32_0 : i32, i32
  }
  func.func @transform_4(%arg0: i32) -> (i32, i32) {
    %c0_i32 = arith.constant 0 : i32
    %c0_i32_0 = arith.constant 0 : i32
    %c0_i32_1 = arith.constant 0 : i32
    return %c0_i32, %c0_i32_0 : i32, i32
  }
  func.func @transform_5(%arg0: i32) -> (i32, i32) {
    %c0_i32 = arith.constant 0 : i32
    %c0_i32_0 = arith.constant 0 : i32
    %c0_i32_1 = arith.constant 0 : i32
    return %c0_i32, %c0_i32_0 : i32, i32
  }
  func.func @transform_6(%arg0: i32) -> (i32, i32) {
    %c0_i32 = arith.constant 0 : i32
    %c0_i32_0 = arith.constant 0 : i32
    %c0_i32_1 = arith.constant 0 : i32
    return %c0_i32, %c0_i32_0 : i32, i32
  }
  func.func @transform_7(%arg0: i32) -> (i32, i32) {
    %c0_i32 = arith.constant 0 : i32
    %c0_i32_0 = arith.constant 0 : i32
    %c0_i32_1 = arith.constant 0 : i32
    return %c0_i32, %c0_i32_0 : i32, i32
  }
  func.func @transform_8(%arg0: i32) -> (i32, i32) {
    %c0_i32 = arith.constant 0 : i32
    %c0_i32_0 = arith.constant 0 : i32
    %c0_i32_1 = arith.constant 0 : i32
    return %c0_i32, %c0_i32_0 : i32, i32
  }
}

</mosaic_0001>

<bundles_post_ra>
// kernel: last_query_forward.3
= control target key start
LH: loop header
LB: loop body
LE: loop exit
PB: predicated region body
PF: predicated region fallthrough
CT: control target
= control target key end

     0   :  { %vm125_vm0 = vcmask 11264   ;;  %v1255_v0 = vmov 0.0|0.0   ;;  %vm1256_vm1 = vmmov 0   ;;  %v1257_v4 = vmov 0.0   ;;  %s1263_s10 = smov 64   ;;  %s1713_s2 = inlined_call_operand.vmem [shape: f32[64,64], index: 2, kind: input, shape index: {}]   ;;  %s1714_s4 = inlined_call_operand.vmem [shape: f32[64,128], index: 4, kind: input, shape index: {}]   ;;  %s1715_s1 = inlined_call_operand.vmem [shape: f32[4,16,64], index: 1, kind: input, shape index: {}]   ;;  %s1716_s0 = inlined_call_operand.vmem [shape: f32[4,64], index: 0, kind: input, shape index: {}]   ;;  %s1717_s3 = inlined_call_operand.vmem [shape: f32[1,64], index: 3, kind: input, shape index: {}]   ;;  %s1718_s5 = inlined_call_operand.vmem [shape: f32[1,128], index: 5, kind: input, shape index: {}]   ;;  %s1719_s6 = inlined_call_operand.vmem [shape: f32[64,64], index: 6, kind: input, shape index: {}]   ;;  %s1720_s7 = inlined_call_operand.vmem [shape: f32[1,64], index: 7, kind: input, shape index: {}]   ;;  %s1721_s8 = inlined_call_operand.vmem [shape: f32[4,64], index: 8, kind: output, shape index: {}]  }
   0x1   :  { %1162 = vmatprep.subr.bf16.mxu0 %v1255_v0  ;;  %v34_v1 = vld [vmem:[%s1713_s2] sm:$0xff]  ;;  %v35_v2 = vld [vmem:[%s1713_s2 + $0x8] sm:$0xff]  ;;  %1112 = vmatprep.mubr.msk.f32.mxu0 %vm1256_vm1, %v1257_v4  ;;  %127 = vst.msk [vmem:[#allocation4] sm:$0xf] %vm125_vm0, %v1257_v4  ;;  %v36_v7 = vld [vmem:[%s1713_s2 + $0x10] sm:$0xff]  ;;  %v1258_v9 = vmov -inf   ;;  %v298_v39 = vlaneseq }
   0x2   :  { %v137_v3 = vld [vmem:[%s1714_s4] sm:$0xff]  ;;  %v1163_v5 = vpack.c.bf16 %v35_v2, %v34_v1  ;;  %v138_v6 = vld [vmem:[%s1714_s4 + $0x8] sm:$0xff]  ;;  %v37_v8 = vld [vmem:[%s1713_s2 + $0x18] sm:$0xff]  ;;  %126 = vst.msk [vmem:[#allocation3] sm:$0xf] %vm125_vm0, %v1258_v9  ;;  %vm49_vm2 = vcmask 523264  }
   0x3   :  { %v1174_v10 = vpack.c.bf16 %v138_v6, %v137_v3  ;;  %v139_v11 = vld [vmem:[%s1714_s4 + $0x10] sm:$0xff]  ;;  %v140_v12 = vld [vmem:[%s1714_s4 + $0x18] sm:$0xff]  ;;  %v1166_v13 = vpack.c.bf16 %v37_v8, %v36_v7  ;;  %v141_v15 = vld [vmem:[%s1714_s4 + $0x20] sm:$0xff]  ;;  %vm123_vm3 = vcmask 519168   ;;  %v1259_v37 = vmov 1966171168  }
   0x4   :  { %1164 = vmatpush3.bf16.msra.mxu0 %v1163_v5  ;;  %v1178_v14 = vpack.c.bf16 %v140_v12, %v139_v11  ;;  %v142_v16 = vld [vmem:[%s1714_s4 + $0x28] sm:$0xff]  ;;  %v38_v17 = vld [vmem:[%s1713_s2 + $0x20] sm:$0xff]  ;;  %v143_v22 = vld [vmem:[%s1714_s4 + $0x30] sm:$0xff]  ;;  %128 = vst.msk [vmem:[#allocation5] sm:$0xf] %vm123_vm3, %v1257_v4  ;;  %v296_v38 = vunpack.c.l.s4 %v1259_v37  ;;  %v1412_v46 = vshrl.u32 %v298_v39, 7 }
   0x5   :  { %1175 = vmatprep.subr.bf16.mxu1 %v1174_v10  ;;  %1165 = vmatprep.subr.bf16.mxu0 %v1255_v0  ;;  %v39_v18 = vld [vmem:[%s1713_s2 + $0x28] sm:$0xff]  ;;  %v129_v19 = vld [vmem:[%s1715_s1] sm:$0xff]  ;;  %v1182_v20 = vpack.c.bf16 %v142_v16, %v141_v15  ;;  %v144_v23 = vld [vmem:[%s1714_s4 + $0x38] sm:$0xff]  ;;  %vm339_vm4 = vcmask 261120   ;;  %vm383_vm5 = vcmask 130112   ;;  %vm412_vm6 = vcmask 1041409  }
   0x6   :  { %1177 = vmatpush3.bf16.msra.mxu1 %v1174_v10  ;;  %1131 = vmatprep.mubr.msk.f32.mxu1 %vm49_vm2, %v129_v19  ;;  %v1169_v21 = vpack.c.bf16 %v39_v18, %v38_v17  ;;  %v40_v24 = vld [vmem:[%s1713_s2 + $0x30] sm:$0xff]  ;;  %v41_v25 = vld [vmem:[%s1713_s2 + $0x38] sm:$0xff]  ;;  %v1186_v26 = vpack.c.bf16 %v144_v23, %v143_v22  ;;  %v33_v28 = vld [vmem:[%s1716_s0] sm:$0xf]  ;;  %v297_v45 = vunpack.c.0.s8 %v296_v38  ;;  %v1419_v51 = vsub.s32 0, %v1412_v46 }
   0x7   :  { %1179 = vmatprep.subr.bf16.mxu1 %v1178_v14  ;;  %v1172_v27 = vpack.c.bf16 %v41_v25, %v40_v24  ;;  %v130_v29 = vld [vmem:[%s1715_s1 + $0x8] sm:$0xff]  ;;  %v131_v30 = vld [vmem:[%s1715_s1 + $0x10] sm:$0xff]  ;;  %v132_v31 = vld [vmem:[%s1715_s1 + $0x18] sm:$0xff]  ;;  %vm414_vm7 = vcmask 1042434   ;;  %vm416_vm8 = vcmask 1043459   ;;  %vm419_vm9 = vcmask 125952  }
   0x8   :  { %1167 = vmatpush3.bf16.msra.mxu0 %v1166_v13  ;;  %v133_v32 = vld [vmem:[%s1715_s1 + $0x20] sm:$0xff]  ;;  %v134_v33 = vld [vmem:[%s1715_s1 + $0x28] sm:$0xff]  ;;  %v135_v34 = vld [vmem:[%s1715_s1 + $0x30] sm:$0xff]  ;;  %v300_v49 = vsub.s32 %v297_v45, %v1412_v46  ;;  %v373_v45 = vand.u32 127, %v298_v39  ;;  %vm928_vm10 = vcmask 7168   ;;  %vm568_vm11 = vcmask 785920  }
   0x9   :  { %1168 = vmatprep.subr.bf16.mxu0 %v1255_v0  ;;  %v136_v35 = vld [vmem:[%s1715_s1 + $0x38] sm:$0xff]  ;;  %v1048_v36 = vld [vmem:[%s1717_s3] ss:$0 sm:$0xff]  ;;  %vm874_vm12 = vcmask 1048320  }
   0xa   :  { %1181 = vmatpush3.bf16.msra.mxu1 %v1178_v14  ;;  %v1050_v50 = vld [vmem:[%s1718_s5] ss:$0 sm:$0xff]  ;;  %s1260_s5 = smov 96  }
   0xb   :  { %1183 = vmatprep.subr.bf16.mxu1 %v1182_v20 }
   0xc   :  { %1170 = vmatpush3.bf16.msra.mxu0 %v1169_v21 }
   0xd   :  { %1171 = vmatprep.subr.bf16.mxu0 %v1255_v0 }
   0xe   :  { %1185 = vmatpush3.bf16.msra.mxu1 %v1182_v20 }
   0xf   :  { %1187 = vmatprep.subr.bf16.mxu1 %v1186_v26 }
  0x10   :  { %1173 = vmatpush3.bf16.msra.mxu0 %v1172_v27 }
  0x11   :  { %1190 = vmatprep.subr.bf16.mxu0 %v1255_v0 }
  0x12   :  { %1189 = vmatpush3.bf16.msra.mxu1 %v1186_v26 }
  0x13   :  { %1113 = vmatmul.mubr.msk.f32.vlgmr.msra.gmra.mrb[0].mxu0 %vm49_vm2, %v33_v28 }
  0x14   :  { %1159 = vmatprep.mubr.msk.f32.mxu0 %vm1256_vm1, %v1257_v4 }
  0x15   :  { %1132 = vmatmul.mubr.msk.f32.vlgmr.msra.gmra.mrb[0].mxu1 %vm49_vm2, %v130_v29 }
  0x16   :  { %1134 = vmatprep.mubr.msk.f32.mxu1 %vm49_vm2, %v131_v30 }
  0x19   :  { %1135 = vmatmul.mubr.msk.f32.gmra.mrb[2].mxu1 %vm49_vm2, %v132_v31 }
  0x1a   :  { %1137 = vmatprep.mubr.msk.f32.mxu1 %vm49_vm2, %v133_v32 }
  0x1d   :  { %1138 = vmatmul.mubr.msk.f32.gmra.mrb[4].mxu1 %vm49_vm2, %v134_v33 }
  0x1e   :  { %1140 = vmatprep.mubr.msk.f32.mxu1 %vm49_vm2, %v135_v34 }
  0x21   :  { %1141 = vmatmul.mubr.msk.f32.gmra.mrb[6].mxu1 %vm49_vm2, %v136_v35 }
  0xe6   :  { %v119_v40 = vpop.f32.mrb[0].mxu0 }
  0xe7   :  { %v120_v41 = vadd.f32 %v1048_v36, %v119_v40  ;;  %v1114_v42 = vpop.f32.mrb[1].mxu0 }
  0xe8   :  { %v1133_v43 = vpop.f32.mrb[0].mxu1 }
  0xe9   :  { %124 = vst.msk [vmem:[#allocation2] sm:$0xf] %vm123_vm3, %v120_v41  ;;  %v243_v44 = vpop.f32.mrb[1].mxu1  ;;  %v1426_v62 = vadd.f32 %v1133_v43, %v1050_v50 }
  0xea   :  { %v1421_v54 = vadd.f32 %v1050_v50, %v243_v44 }
  0xec   :  { %v1136_v47 = vpop.f32.mrb[2].mxu1 }
  0xed   :  { %v253_v48 = vpop.f32.mrb[3].mxu1  ;;  %v1430_v4 = vadd.f32 %v1136_v47, %v1050_v50  ;;  %v378_v47 = vadd.s32 4294967288, %v373_v45 }
  0xee   :  { %v1423_v58 = vadd.f32 %v1050_v50, %v253_v48 }
  0xf0   :  { %v1139_v52 = vpop.f32.mrb[4].mxu1  ;;  %v1059_v53 = vld.sshfl [vmem:[#allocation2] sm:$0x33 pattern:$0x75316420] }
  0xf1   :  { %v263_v55 = vpop.f32.mrb[5].mxu1  ;;  %v301_v56 = vrot.slane %v1059_v53, %v300_v49  ;;  %v294_v57 = vcombine.high %v1059_v53, %v1059_v53  ;;  %v1437_v10 = vadd.f32 %v1139_v52, %v1050_v50  ;;  %v1478_v53 = vsub.s32 %v373_v45, %v1412_v46 }
  0xf2   :  { %v1433_v6 = vadd.f32 %v1050_v50, %v263_v55  ;;  %v1262_v45 = vmov 1  }
  0xf3   :  { %v314_v59 = vrot.slane %v301_v56, %v1419_v51  ;;  %v308_v60 = vrot.slane %v294_v57, %v300_v49  ;;  %v309_v2 = vcombine.high %v301_v56, %v301_v56  ;;  %v1471_v49 = vsub.s32 %v378_v47, %v1412_v46  ;;  %1212 = vset.pattern.permute.xlu0 %v1262_v45  ;;  %v1554_v47 = vld [vmem:[#allocation3] sm:$0xf] }
  0xf4   :  { %v1142_v61 = vpop.f32.mrb[6].mxu1 }
  0xf5   :  { %v273_v63 = vpop.f32.mrb[7].mxu1  ;;  %v331_v1 = vmul.f32 %v314_v59, %v1421_v54  ;;  %v318_v3 = vrot.slane %v308_v60, %v1419_v51  ;;  %v310_v7 = vcombine.high %v308_v60, %v308_v60  ;;  %v332_v8 = vmul.f32 %v314_v59, %v1426_v62 }
  0xf6   :  { %v322_v9 = vrot.slane %v309_v2, %v1419_v51  ;;  %v1440_v12 = vadd.f32 %v1050_v50, %v273_v63  ;;  %v1444_v15 = vadd.f32 %v1142_v61, %v1050_v50 }
  0xf7   :  { %630 = vrot.lane.b32.xlu0 %v331_v1, %s1260_s5  ;;  %v333_v5 = vmul.f32 %v318_v3, %v1423_v58  ;;  %v334_v11 = vmul.f32 %v318_v3, %v1430_v4  ;;  %v326_v14 = vrot.slane %v310_v7, %v1419_v51  ;;  %v340_v19 = vsel %vm339_vm4, %v331_v1, 0.0 }
  0xf8   :  { %v335_v13 = vmul.f32 %v322_v9, %v1433_v6  ;;  %v336_v16 = vmul.f32 %v322_v9, %v1437_v10  ;;  %v343_v21 = vsel %vm339_vm4, %v332_v8, 0.0 }
  0xf9   :  { %634 = vrot.lane.b32.xlu1 %v333_v5, %s1260_s5  ;;  %v337_v17 = vmul.f32 %v326_v14, %v1440_v12  ;;  %v338_v18 = vmul.f32 %v326_v14, %v1444_v15  ;;  %v346_v20 = vsel %vm339_vm4, %v333_v5, 0.0  ;;  %v349_v22 = vsel %vm339_vm4, %v334_v11, 0.0 }
  0xfa   :  { %v352_v23 = vsel %vm339_vm4, %v335_v13, 0.0  ;;  %v355_v24 = vsel %vm339_vm4, %v336_v16, 0.0 }
  0xfb   :  { %632 = vrot.lane.b32.xlu0 %v332_v8, %s1260_s5  ;;  %v358_v25 = vsel %vm339_vm4, %v337_v17, 0.0  ;;  %v361_v26 = vsel %vm339_vm4, %v338_v18, 0.0 }
  0xfd   :  { %636 = vrot.lane.b32.xlu1 %v334_v11, %s1260_s5 }
  0xff   :  { %638 = vrot.lane.b32.xlu0 %v335_v13, %s1260_s5 }
 0x101   :  { %640 = vrot.lane.b32.xlu1 %v336_v16, %s1260_s5 }
 0x103   :  { %642 = vrot.lane.b32.xlu0 %v337_v17, %s1260_s5 }
 0x105   :  { %644 = vrot.lane.b32.xlu1 %v338_v18, %s1260_s5  ;;  %v1261_v18 = vmov 0  }
 0x106   :  { %1211 = vset.pattern.permute.xlu1 %v1261_v18 }
 0x122   :  { %341 = vadd.xlane.f32.xlu0 %v340_v19 }
 0x126   :  { %347 = vadd.xlane.f32.xlu0 %v346_v20 }
 0x129   :  { %344 = vadd.xlane.f32.xlu1 %v343_v21 }
 0x12a   :  { %350 = vadd.xlane.f32.xlu0 %v349_v22 }
 0x12d   :  { %353 = vadd.xlane.f32.xlu1 %v352_v23 }
 0x12e   :  { %356 = vadd.xlane.f32.xlu0 %v355_v24 }
 0x131   :  { %359 = vadd.xlane.f32.xlu1 %v358_v25 }
 0x132   :  { %362 = vadd.xlane.f32.xlu0 %v361_v26 }
 0x169   :  { %v631_v27 = vpop.permute.xlu0 %630 }
 0x16a   :  { %v654_v28 = vsel %vm339_vm4, %v631_v27, 0.0 }
 0x16b   :  { %v635_v29 = vpop.permute.xlu1 %634  ;;  %655 = vadd.xlane.f32.xlu1 %v654_v28 }
 0x16c   :  { %v660_v32 = vsel %vm339_vm4, %v635_v29, 0.0 }
 0x16d   :  { %v633_v30 = vpop.permute.xlu0 %632 }
 0x16e   :  { %v657_v31 = vsel %vm339_vm4, %v633_v30, 0.0 }
 0x16f   :  { %v637_v33 = vpop.permute.xlu1 %636  ;;  %658 = vadd.xlane.f32.xlu0 %v657_v31  ;;  %661 = vadd.xlane.f32.xlu1 %v660_v32 }
 0x170   :  { %v663_v35 = vsel %vm339_vm4, %v637_v33, 0.0 }
 0x171   :  { %v639_v34 = vpop.permute.xlu0 %638 }
 0x172   :  { %v666_v36 = vsel %vm339_vm4, %v639_v34, 0.0 }
 0x173   :  { %v641_v37 = vpop.permute.xlu1 %640  ;;  %664 = vadd.xlane.f32.xlu0 %v663_v35  ;;  %667 = vadd.xlane.f32.xlu1 %v666_v36 }
 0x174   :  { %v669_v40 = vsel %vm339_vm4, %v641_v37, 0.0 }
 0x175   :  { %v643_v38 = vpop.permute.xlu0 %642 }
 0x176   :  { %v672_v41 = vsel %vm339_vm4, %v643_v38, 0.0 }
 0x177   :  { %v645_v42 = vpop.permute.xlu1 %644  ;;  %670 = vadd.xlane.f32.xlu0 %v669_v40  ;;  %673 = vadd.xlane.f32.xlu1 %v672_v41 }
 0x178   :  { %v675_v43 = vsel %vm339_vm4, %v645_v42, 0.0 }
 0x17b   :  { %676 = vadd.xlane.f32.xlu0 %v675_v43 }
 0x1af   :  { %v1465_v44 = vpop.xlane.xlu0 %341 }
 0x1b0   :  { %v377_v60 = vrot.slane %v1465_v44, %v1478_v53 }
 0x1b3   :  { %v1468_v48 = vpop.xlane.xlu0 %347 }
 0x1b4   :  { %v388_v61 = vrot.slane %v1468_v48, %v1478_v53 }
 0x1b6   :  { %v1473_v50 = vpop.xlane.xlu1 %344 }
 0x1b7   :  { %v1475_v52 = vpop.xlane.xlu0 %350  ;;  %v382_v55 = vrot.slane %v1473_v50, %v1471_v49 }
 0x1b8   :  { %v392_v56 = vrot.slane %v1475_v52, %v1471_v49 }
 0x1b9   :  { %v384_v1 = vsel %vm383_vm5, %v382_v55, %v377_v60 }
 0x1ba   :  { %v1484_v39 = vpop.xlane.xlu1 %353  ;;  %v393_v2 = vsel %vm383_vm5, %v392_v56, %v388_v61 }
 0x1bb   :  { %v397_v57 = vrot.slane %v1484_v39, %v1478_v53  ;;  %v1488_v59 = vpop.xlane.xlu0 %356  ;;  %v413_v11 = vsel %vm412_vm6, %v393_v2, %v384_v1  ;;  %v437_v1 = vsub.s32 1, %v1412_v46  ;;  %v445_v2 = vsub.s32 3, %v1412_v46 }
 0x1bc   :  { %v401_v63 = vrot.slane %v1488_v59, %v1471_v49 }
 0x1be   :  { %v1498_v3 = vpop.xlane.xlu1 %359  ;;  %v402_v8 = vsel %vm383_vm5, %v401_v63, %v397_v57  ;;  %v441_v63 = vsub.s32 2, %v1412_v46 }
 0x1bf   :  { %v406_v5 = vrot.slane %v1498_v3, %v1478_v53  ;;  %v1502_v7 = vpop.xlane.xlu0 %362  ;;  %v415_v14 = vsel %vm414_vm7, %v402_v8, %v413_v11 }
 0x1c0   :  { %v410_v9 = vrot.slane %v1502_v7, %v1471_v49 }
 0x1c2   :  { %v411_v13 = vsel %vm383_vm5, %v410_v9, %v406_v5 }
 0x1c3   :  { %v417_v16 = vsel %vm416_vm8, %v411_v13, %v415_v14 }
 0x1c4   :  { %v420_v17 = vsel %vm419_vm9, %v417_v16, -inf }
 0x1c5   :  { %421 = vmax.xlane.f32.xlu1 %v420_v17 }
 0x1f8   :  { %v1513_v19 = vpop.xlane.xlu1 %655 }
 0x1f9   :  { %v689_v31 = vrot.slane %v1513_v19, %v1478_v53 }
 0x1fc   :  { %v1515_v20 = vpop.xlane.xlu0 %658  ;;  %v1517_v21 = vpop.xlane.xlu1 %661 }
 0x1fd   :  { %v693_v26 = vrot.slane %v1515_v20, %v1471_v49  ;;  %v698_v27 = vrot.slane %v1517_v21, %v1478_v53 }
 0x1ff   :  { %v694_v35 = vsel %vm383_vm5, %v693_v26, %v689_v31 }
 0x200   :  { %v1519_v22 = vpop.xlane.xlu0 %664  ;;  %v1521_v23 = vpop.xlane.xlu1 %667 }
 0x201   :  { %v702_v24 = vrot.slane %v1519_v22, %v1471_v49  ;;  %v707_v29 = vrot.slane %v1521_v23, %v1478_v53 }
 0x203   :  { %v703_v32 = vsel %vm383_vm5, %v702_v24, %v698_v27 }
 0x204   :  { %v1525_v25 = vpop.xlane.xlu0 %670  ;;  %v1535_v30 = vpop.xlane.xlu1 %673  ;;  %v722_v38 = vsel %vm412_vm6, %v703_v32, %v694_v35 }
 0x205   :  { %v711_v28 = vrot.slane %v1525_v25, %v1471_v49  ;;  %v716_v36 = vrot.slane %v1535_v30, %v1478_v53 }
 0x207   :  { %v712_v34 = vsel %vm383_vm5, %v711_v28, %v707_v29 }
 0x208   :  { %v1540_v33 = vpop.xlane.xlu0 %676  ;;  %v723_v41 = vsel %vm414_vm7, %v712_v34, %v722_v38 }
 0x209   :  { %v720_v37 = vrot.slane %v1540_v33, %v1471_v49 }
 0x20b   :  { %v721_v40 = vsel %vm383_vm5, %v720_v37, %v716_v36 }
 0x20c   :  { %v724_v42 = vsel %vm416_vm8, %v721_v40, %v723_v41 }
 0x20d   :  { %v726_v43 = vsel %vm419_vm9, %v724_v42, -inf }
 0x20e   :  { %727 = vmax.xlane.f32.xlu0 %v726_v43 }
 0x252   :  { %v422_v55 = vpop.xlane.xlu1 %421 }
 0x253   :  { %v1557_v56 = vmax.f32 %v1554_v47, %v422_v55 }
 0x255   :  { %429 = vperm.xlu1 %1211, %v1557_v56  }
 0x29b   :  { %v728_v57 = vpop.xlane.xlu0 %727 }
 0x29c   :  { %v1561_v60 = vmax.f32 %v1554_v47, %v728_v57 }
 0x29e   :  { %v929_v61 = vsel %vm928_vm10, %v1557_v56, %v1561_v60  ;;  %735 = vperm.xlu0 %1212, %v1561_v60  }
 0x29f   :  { %931 = vst.msk [vmem:[#allocation3] sm:$0xf] %vm125_vm0, %v929_v61 }
 0x2a2   :  { %1213 = vset.pattern.permute.xlu0 %v1261_v18 }
 0x2d4   :  { %v430_v5 = vpop.permute.xlu1 %429 }
 0x2d5   :  { %v434_v8 = vrot.slane %v430_v5, %v1419_v51  ;;  %v442_v9 = vrot.slane %v430_v5, %v441_v63  ;;  %v438_v11 = vrot.slane %v430_v5, %v437_v1  ;;  %v446_v13 = vrot.slane %v430_v5, %v445_v2 }
 0x2d7   :  { %v451_v14 = vsub.f32 %v1465_v44, %v434_v8  ;;  %v452_v16 = vsub.f32 %v1473_v50, %v434_v8  ;;  %v455_v17 = vsub.f32 %v1484_v39, %v442_v9  ;;  %v453_v26 = vsub.f32 %v1468_v48, %v438_v11 }
 0x2d8   :  { %v458_v28 = vsub.f32 %v1502_v7, %v446_v13  ;;  %v454_v31 = vsub.f32 %v1475_v52, %v438_v11  ;;  %v456_v44 = vsub.f32 %v1488_v59, %v442_v9  ;;  %v457_v48 = vsub.f32 %v1498_v3, %v446_v13 }
 0x2d9   :  { %v459_v24 = vmul.f32 1.442695, %v451_v14  ;;  %v461_v27 = vmul.f32 1.442695, %v452_v16  ;;  %v467_v46 = vmul.f32 1.442695, %v455_v17 }
 0x2da   :  { %v463_v29 = vmul.f32 1.442695, %v453_v26  ;;  %v473_v32 = vmul.f32 1.442695, %v458_v28  ;;  %v465_v50 = vmul.f32 1.442695, %v454_v31 }
 0x2db   :  { %1217 = vpow2.f32 %v459_v24  ;;  %v469_v34 = vmul.f32 1.442695, %v456_v44  ;;  %v471_v36 = vmul.f32 1.442695, %v457_v48 }
 0x2dc   :  { %1219 = vpow2.f32 %v461_v27 }
 0x2dd   :  { %1221 = vpow2.f32 %v467_v46 }
 0x2de   :  { %1223 = vpow2.f32 %v463_v29 }
 0x2df   :  { %1225 = vpow2.f32 %v473_v32 }
 0x2e0   :  { %1227 = vpow2.f32 %v465_v50 }
 0x2e1   :  { %1229 = vpow2.f32 %v469_v34 }
 0x2e2   :  { %1231 = vpow2.f32 %v471_v36 }
 0x2e5   :  { %v1218_v39 = vpop.eup %1217 }
 0x2e6   :  { %485 = vperm.xlu1 %1211, %v1218_v39   ;;  %v1220_v7 = vpop.eup %1219 }
 0x2e7   :  { %v1222_v35 = vpop.eup %1221 }
 0x2e8   :  { %497 = vperm.xlu0 %1213, %v1222_v35   ;;  %v1224_v52 = vpop.eup %1223 }
 0x2e9   :  { %v1226_v37 = vpop.eup %1225 }
 0x2ea   :  { %488 = vperm.xlu1 %1211, %v1220_v7   ;;  %v1228_v59 = vpop.eup %1227 }
 0x2eb   :  { %v1230_v38 = vpop.eup %1229 }
 0x2ec   :  { %506 = vperm.xlu0 %1213, %v1226_v37   ;;  %v1232_v40 = vpop.eup %1231 }
 0x2ee   :  { %491 = vperm.xlu1 %1211, %v1224_v52  }
 0x2f2   :  { %494 = vperm.xlu1 %1211, %v1228_v59  }
 0x2f6   :  { %500 = vperm.xlu1 %1211, %v1230_v38  }
 0x2fa   :  { %503 = vperm.xlu1 %1211, %v1232_v40  }
 0x31d   :  { %v736_v3 = vpop.permute.xlu0 %735 }
 0x31e   :  { %v740_v41 = vrot.slane %v736_v3, %v1419_v51  ;;  %v748_v42 = vrot.slane %v736_v3, %v441_v63  ;;  %v744_v43 = vrot.slane %v736_v3, %v437_v1  ;;  %v752_v61 = vrot.slane %v736_v3, %v445_v2 }
 0x320   :  { %v757_v55 = vsub.f32 %v1513_v19, %v740_v41  ;;  %v758_v57 = vsub.f32 %v1515_v20, %v740_v41  ;;  %v762_v5 = vsub.f32 %v1525_v25, %v748_v42  ;;  %v759_v9 = vsub.f32 %v1517_v21, %v744_v43 }
 0x321   :  { %v764_v13 = vsub.f32 %v1540_v33, %v752_v61  ;;  %v760_v16 = vsub.f32 %v1519_v22, %v744_v43  ;;  %v761_v19 = vsub.f32 %v1521_v23, %v748_v42  ;;  %v763_v21 = vsub.f32 %v1535_v30, %v752_v61 }
 0x322   :  { %v765_v8 = vmul.f32 1.442695, %v757_v55  ;;  %v767_v11 = vmul.f32 1.442695, %v758_v57  ;;  %v775_v14 = vmul.f32 1.442695, %v762_v5 }
 0x323   :  { %v769_v51 = vmul.f32 1.442695, %v759_v9  ;;  %v779_v63 = vmul.f32 1.442695, %v764_v13  ;;  %v771_v20 = vmul.f32 1.442695, %v760_v16 }
 0x324   :  { %1233 = vpow2.f32 %v765_v8  ;;  %v773_v1 = vmul.f32 1.442695, %v761_v19  ;;  %v777_v22 = vmul.f32 1.442695, %v763_v21 }
 0x325   :  { %1235 = vpow2.f32 %v767_v11 }
 0x326   :  { %1237 = vpow2.f32 %v775_v14 }
 0x327   :  { %1239 = vpow2.f32 %v769_v51 }
 0x328   :  { %1241 = vpow2.f32 %v779_v63 }
 0x329   :  { %1243 = vpow2.f32 %v771_v20 }
 0x32a   :  { %1245 = vpow2.f32 %v773_v1 }
 0x32b   :  { %1247 = vpow2.f32 %v777_v22 }
 0x32e   :  { %v1234_v25 = vpop.eup %1233 }
 0x32f   :  { %791 = vperm.xlu1 %1211, %v1234_v25   ;;  %v1236_v2 = vpop.eup %1235 }
 0x330   :  { %v1238_v33 = vpop.eup %1237 }
 0x331   :  { %806 = vperm.xlu0 %1213, %v1238_v33   ;;  %v1240_v17 = vpop.eup %1239 }
 0x332   :  { %v1242_v24 = vpop.eup %1241 }
 0x333   :  { %794 = vperm.xlu1 %1211, %v1236_v2   ;;  %v1244_v23 = vpop.eup %1243 }
 0x334   :  { %v1246_v26 = vpop.eup %1245 }
 0x335   :  { %812 = vperm.xlu0 %1213, %v1242_v24   ;;  %v1248_v27 = vpop.eup %1247  ;;  %v730_v24 = vsub.f32 %v1554_v47, %v1561_v60 }
 0x337   :  { %797 = vperm.xlu1 %1211, %v1240_v17  }
 0x33b   :  { %800 = vperm.xlu1 %1211, %v1244_v23  }
 0x33f   :  { %803 = vperm.xlu1 %1211, %v1246_v26  }
 0x343   :  { %809 = vperm.xlu1 %1211, %v1248_v27  }
 0x347   :  { %1214 = vset.pattern.permute.xlu1 %v1262_v45 }
 0x365   :  { %v486_v30 = vpop.permute.xlu1 %485 }
 0x366   :  { %v560_v44 = vmul.f32 %v486_v30, %v1421_v54  ;;  %v511_v55 = vrot.slane %v486_v30, %v1478_v53 }
 0x367   :  { %v498_v29 = vpop.permute.xlu0 %497 }
 0x368   :  { %v564_v48 = vmul.f32 %v498_v29, %v1433_v6  ;;  %v569_v52 = vsel %vm568_vm11, %v560_v44, 0.0  ;;  %v529_v43 = vrot.slane %v498_v29, %v1478_v53 }
 0x369   :  { %v489_v28 = vpop.permute.xlu1 %488 }
 0x36a   :  { %v561_v31 = vmul.f32 %v489_v28, %v1426_v62  ;;  %v515_v40 = vrot.slane %v489_v28, %v1471_v49  ;;  %v587_v61 = vsel %vm568_vm11, %v564_v48, 0.0 }
 0x36b   :  { %v507_v37 = vpop.permute.xlu0 %506 }
 0x36c   :  { %v570_v34 = vsel %vm568_vm11, %v561_v31, 0.0  ;;  %v567_v5 = vmul.f32 %v507_v37, %v1444_v15  ;;  %v542_v51 = vrot.slane %v507_v37, %v1471_v49  ;;  %v516_v63 = vsel %vm383_vm5, %v515_v40, %v511_v55 }
 0x36d   :  { %v492_v46 = vpop.permute.xlu1 %491  ;;  %v571_v57 = vadd.f32 %v570_v34, %v569_v52  ;;  %v731_v31 = vmul.f32 1.442695, %v730_v24 }
 0x36e   :  { %v562_v32 = vmul.f32 %v492_v46, %v1423_v58  ;;  %v520_v3 = vrot.slane %v492_v46, %v1478_v53  ;;  %v597_v2 = vsel %vm568_vm11, %v567_v5, 0.0 }
 0x36f   :  { %v572_v25 = vrot.slane %v571_v57, 4  ;;  %1249 = vpow2.f32 %v731_v31 }
 0x370   :  { %v578_v7 = vsel %vm568_vm11, %v562_v32, 0.0 }
 0x371   :  { %v495_v50 = vpop.permute.xlu1 %494  ;;  %v573_v46 = vadd.f32 %v572_v25, %v571_v57 }
 0x372   :  { %v563_v39 = vmul.f32 %v495_v50, %v1430_v4  ;;  %v524_v35 = vrot.slane %v495_v50, %v1471_v49 }
 0x374   :  { %v579_v36 = vsel %vm568_vm11, %v563_v39, 0.0  ;;  %v525_v8 = vsel %vm383_vm5, %v524_v35, %v520_v3  ;;  %v574_v39 = vrot.slane %v573_v46, 2 }
 0x375   :  { %v580_v59 = vadd.f32 %v579_v36, %v578_v7  ;;  %v501_v38 = vpop.permute.xlu1 %500  ;;  %v544_v1 = vsel %vm412_vm6, %v525_v8, %v516_v63 }
 0x376   :  { %v533_v41 = vrot.slane %v501_v38, %v1471_v49  ;;  %v565_v42 = vmul.f32 %v501_v38, %v1437_v10  ;;  %v575_v60 = vadd.f32 %v574_v39, %v573_v46 }
 0x377   :  { %v581_v11 = vrot.slane %v580_v59, 4 }
 0x378   :  { %v588_v9 = vsel %vm568_vm11, %v565_v42, 0.0  ;;  %v534_v16 = vsel %vm383_vm5, %v533_v41, %v529_v43  ;;  %v576_v37 = vrot.slane %v575_v60, 1 }
 0x379   :  { %v589_v13 = vadd.f32 %v588_v9, %v587_v61  ;;  %v504_v14 = vpop.permute.xlu1 %503  ;;  %v545_v17 = vsel %vm414_vm7, %v534_v16, %v544_v1  ;;  %v582_v23 = vadd.f32 %v581_v11, %v580_v59  ;;  %v1625_v3 = vpop.eup %1249 }
 0x37a   :  { %v538_v19 = vrot.slane %v504_v14, %v1478_v53  ;;  %v566_v20 = vmul.f32 %v504_v14, %v1440_v12  ;;  %v577_v41 = vadd.f32 %v576_v37, %v575_v60 }
 0x37b   :  { %v590_v21 = vrot.slane %v589_v13, 4  ;;  %v583_v32 = vrot.slane %v582_v23, 2 }
 0x37c   :  { %v596_v33 = vsel %vm568_vm11, %v566_v20, 0.0  ;;  %v543_v22 = vsel %vm383_vm5, %v542_v51, %v538_v19 }
 0x37d   :  { %v598_v26 = vadd.f32 %v597_v2, %v596_v33  ;;  %v546_v27 = vsel %vm416_vm8, %v543_v22, %v545_v17  ;;  %v591_v30 = vadd.f32 %v590_v21, %v589_v13  ;;  %v584_v34 = vadd.f32 %v583_v32, %v582_v23 }
 0x37e   :  { %v548_v28 = vsel %vm419_vm9, %v546_v27, 0.0 }
 0x37f   :  { %v599_v29 = vrot.slane %v598_v26, 4  ;;  %549 = vadd.xlane.f32.xlu1 %v548_v28  ;;  %v592_v50 = vrot.slane %v591_v30, 2  ;;  %v585_v36 = vrot.slane %v584_v34, 1 }
 0x381   :  { %v600_v44 = vadd.f32 %v599_v29, %v598_v26  ;;  %v593_v7 = vadd.f32 %v592_v50, %v591_v30  ;;  %v586_v38 = vadd.f32 %v585_v36, %v584_v34  ;;  %v424_v36 = vsub.f32 %v1554_v47, %v1557_v56 }
 0x383   :  { %v601_v48 = vrot.slane %v600_v44, 2  ;;  %v594_v52 = vrot.slane %v593_v7, 1  ;;  %v615_v43 = vsel %vm412_vm6, %v586_v38, %v577_v41 }
 0x385   :  { %v602_v35 = vadd.f32 %v601_v48, %v600_v44  ;;  %v595_v40 = vadd.f32 %v594_v52, %v593_v7 }
 0x387   :  { %v603_v59 = vrot.slane %v602_v35, 1  ;;  %v616_v55 = vsel %vm414_vm7, %v595_v40, %v615_v43  ;;  %v425_v40 = vmul.f32 1.442695, %v424_v36  ;;  %v1060_v36 = vld [vmem:[%s1720_s7] ss:$0 sm:$0xff] }
 0x389   :  { %v604_v42 = vadd.f32 %v603_v59, %v602_v35  ;;  %1251 = vpow2.f32 %v425_v40 }
 0x38b   :  { %v617_v57 = vsel %vm416_vm8, %v604_v42, %v616_v55 }
 0x390   :  { %913 = vperm.xlu1 %1214, %v1625_v3  }
 0x393   :  { %v1252_v56 = vpop.eup %1251 }
 0x394   :  { %618 = vrot.lane.b32.xlu1 %v617_v57, %s1263_s10 }
 0x395   :  { %1215 = vset.pattern.permute.xlu1 %v1261_v18 }
 0x3ae   :  { %v792_v61 = vpop.permute.xlu1 %791 }
 0x3af   :  { %v866_v13 = vmul.f32 %v792_v61, %v1421_v54 }
 0x3b0   :  { %v807_v9 = vpop.permute.xlu0 %806 }
 0x3b1   :  { %v871_v63 = vmul.f32 %v807_v9, %v1437_v10  ;;  %v875_v2 = vsel %vm874_vm12, %v866_v13, 0.0 }
 0x3b2   :  { %v795_v5 = vpop.permute.xlu1 %794 }
 0x3b3   :  { %v867_v16 = vmul.f32 %v795_v5, %v1426_v62  ;;  %v821_v20 = vrot.slane %v795_v5, %v1471_v49  ;;  %v817_v62 = vrot.slane %v792_v61, %v1478_v53  ;;  %v894_v24 = vsel %vm874_vm12, %v871_v63, 0.0 }
 0x3b4   :  { %v813_v19 = vpop.permute.xlu0 %812 }
 0x3b5   :  { %v873_v33 = vmul.f32 %v813_v19, %v1444_v15  ;;  %v876_v22 = vsel %vm874_vm12, %v867_v16, 0.0  ;;  %v848_v30 = vrot.slane %v813_v19, %v1471_v49 }
 0x3b6   :  { %v798_v8 = vpop.permute.xlu1 %797  ;;  %v877_v29 = vadd.f32 %v876_v22, %v875_v2  ;;  %v960_v2 = vld [vmem:[%s1719_s6 + $0x28] sm:$0xff] }
 0x3b7   :  { %v868_v18 = vmul.f32 %v798_v8, %v1423_v58  ;;  %v826_v21 = vrot.slane %v798_v8, %v1478_v53  ;;  %v903_v44 = vsel %vm874_vm12, %v873_v33, 0.0  ;;  %v284_v33 = vld [vmem:[#allocation4] sm:$0xf] }
 0x3b9   :  { %v884_v23 = vsel %vm874_vm12, %v868_v18, 0.0 }
 0x3ba   :  { %v801_v11 = vpop.permute.xlu1 %800 }
 0x3bb   :  { %v869_v14 = vmul.f32 %v801_v11, %v1430_v4  ;;  %v830_v51 = vrot.slane %v801_v11, %v1471_v49  ;;  %v839_v4 = vrot.slane %v807_v9, %v1471_v49 }
 0x3bd   :  { %v885_v10 = vsel %vm874_vm12, %v869_v14, 0.0  ;;  %v831_v58 = vsel %vm383_vm5, %v830_v51, %v826_v21  ;;  %v956_v21 = vld [vmem:[%s1719_s6 + $0x8] sm:$0xff] }
 0x3be   :  { %v804_v25 = vpop.permute.xlu1 %803  ;;  %v886_v28 = vadd.f32 %v885_v10, %v884_v23 }
 0x3bf   :  { %v835_v1 = vrot.slane %v804_v25, %v1478_v53  ;;  %v870_v54 = vmul.f32 %v804_v25, %v1433_v6  ;;  %v822_v6 = vsel %vm383_vm5, %v821_v20, %v817_v62  ;;  %v955_v25 = vld [vmem:[%s1719_s6] sm:$0xff] }
 0x3c0   :  { %v850_v32 = vsel %vm412_vm6, %v831_v58, %v822_v6  ;;  %v887_v7 = vrot.slane %v886_v28, 4  ;;  %v475_v58 = vmul.f32 %v1252_v56, %v284_v33 }
 0x3c1   :  { %v893_v17 = vsel %vm874_vm12, %v870_v54, 0.0  ;;  %v840_v27 = vsel %vm383_vm5, %v839_v4, %v835_v1  ;;  %v957_v1 = vld [vmem:[%s1719_s6 + $0x10] sm:$0xff]  ;;  %v1191_v54 = vpack.c.bf16 %v956_v21, %v955_v25  ;;  %v958_v4 = vld [vmem:[%s1719_s6 + $0x18] sm:$0xff] }
 0x3c2   :  { %v810_v26 = vpop.permute.xlu1 %809  ;;  %v895_v31 = vadd.f32 %v894_v24, %v893_v17  ;;  %v851_v48 = vsel %vm414_vm7, %v840_v27, %v850_v32  ;;  %v888_v52 = vadd.f32 %v887_v7, %v886_v28  ;;  %v1194_v62 = vpack.c.bf16 %v958_v4, %v957_v1 }
 0x3c3   :  { %v844_v15 = vrot.slane %v810_v26, %v1478_v53  ;;  %v872_v46 = vmul.f32 %v810_v26, %v1440_v12  ;;  %v878_v12 = vrot.slane %v877_v29, 4  ;;  %1192 = vmatpush3.bf16.msra.mxu0 %v1191_v54  ;;  %v781_v17 = vmul.f32 %v1625_v3, %v284_v33 }
 0x3c4   :  { %v896_v60 = vrot.slane %v895_v31, 4  ;;  %v889_v41 = vrot.slane %v888_v52, 2  ;;  %1193 = vmatprep.subr.bf16.mxu0 %v1255_v0 }
 0x3c5   :  { %v902_v50 = vsel %vm874_vm12, %v872_v46, 0.0  ;;  %v849_v39 = vsel %vm383_vm5, %v848_v30, %v844_v15  ;;  %v879_v59 = vadd.f32 %v878_v12, %v877_v29  ;;  %v285_v30 = vld [vmem:[#allocation5] sm:$0xf] }
 0x3c6   :  { %v904_v34 = vadd.f32 %v903_v44, %v902_v50  ;;  %v852_v49 = vsel %vm416_vm8, %v849_v39, %v851_v48  ;;  %v897_v37 = vadd.f32 %v896_v60, %v895_v31  ;;  %v890_v57 = vadd.f32 %v889_v41, %v888_v52  ;;  %v961_v39 = vld [vmem:[%s1719_s6 + $0x30] sm:$0xff]  ;;  %v962_v48 = vld [vmem:[%s1719_s6 + $0x38] sm:$0xff] }
 0x3c7   :  { %v854_v53 = vsel %vm419_vm9, %v852_v49, 0.0  ;;  %v880_v43 = vrot.slane %v879_v59, 2  ;;  %1195 = vmatpush3.bf16.msra.mxu0 %v1194_v62 }
 0x3c8   :  { %855 = vadd.xlane.f32.xlu0 %v854_v53  ;;  %v905_v35 = vrot.slane %v904_v34, 4  ;;  %v898_v42 = vrot.slane %v897_v37, 2  ;;  %v891_v9 = vrot.slane %v890_v57, 1  ;;  %1196 = vmatprep.subr.bf16.mxu0 %v1255_v0 }
 0x3c9   :  { %v881_v5 = vadd.f32 %v880_v43, %v879_v59 }
 0x3ca   :  { %v906_v38 = vadd.f32 %v905_v35, %v904_v34  ;;  %v899_v61 = vadd.f32 %v898_v42, %v897_v37  ;;  %v892_v16 = vadd.f32 %v891_v9, %v890_v57  ;;  %v1200_v34 = vpack.c.bf16 %v962_v48, %v961_v39 }
 0x3cb   :  { %v882_v13 = vrot.slane %v881_v5, 1 }
 0x3cc   :  { %v907_v55 = vrot.slane %v906_v38, 2  ;;  %v900_v11 = vrot.slane %v899_v61, 1 }
 0x3cd   :  { %v883_v51 = vadd.f32 %v882_v13, %v881_v5 }
 0x3ce   :  { %v908_v8 = vadd.f32 %v907_v55, %v906_v38  ;;  %v901_v47 = vadd.f32 %v900_v11, %v899_v61 }
 0x3cf   :  { %v921_v19 = vsel %vm412_vm6, %v892_v16, %v883_v51 }
 0x3d0   :  { %v909_v14 = vrot.slane %v908_v8, 1  ;;  %v922_v20 = vsel %vm414_vm7, %v901_v47, %v921_v19 }
 0x3d2   :  { %v910_v63 = vadd.f32 %v909_v14, %v908_v8 }
 0x3d4   :  { %v923_v18 = vsel %vm416_vm8, %v910_v63, %v922_v20 }
 0x3de   :  { %607 = vperm.xlu0 %1213, %v1252_v56  }
 0x3e2   :  { %924 = vrot.lane.b32.xlu0 %v923_v18, %s1263_s10 }
 0x3e3   :  { %1216 = vset.pattern.permute.xlu0 %v1262_v45  ;;  %v959_v45 = vld [vmem:[%s1719_s6 + $0x20] sm:$0xff] }
 0x3e4   :  { %v1197_v10 = vpack.c.bf16 %v960_v2, %v959_v45 }
 0x3e6   :  { %1198 = vmatpush3.bf16.msra.mxu0 %v1197_v10 }
 0x3e7   :  { %1199 = vmatprep.subr.bf16.mxu0 %v1255_v0 }
 0x3ea   :  { %1201 = vmatpush3.bf16.msra.mxu0 %v1200_v34 }
 0x40c   :  { %v550_v22 = vpop.xlane.xlu1 %549 }
 0x40d   :  { %v551_v6 = vadd.f32 %v550_v22, %v475_v58 }
 0x410   :  { %v914_v27 = vpop.permute.xlu1 %913 }
 0x411   :  { %v916_v46 = vmul.f32 %v914_v27, %v285_v30 }
 0x414   :  { %v619_v31 = vpop.permute.xlu1 %618 }
 0x455   :  { %v856_v24 = vpop.xlane.xlu0 %855 }
 0x456   :  { %v857_v23 = vadd.f32 %v856_v24, %v781_v17 }
 0x458   :  { %v932_v26 = vsel %vm928_vm10, %v551_v6, %v857_v23 }
 0x459   :  { %933 = vst.msk [vmem:[#allocation4] sm:$0xf] %vm125_vm0, %v932_v26 }
 0x45d   :  { %v608_v28 = vpop.permute.xlu0 %607 }
 0x45e   :  { %v610_v15 = vmul.f32 %v608_v28, %v285_v30 }
 0x460   :  { %v940_v29 = vld [vmem:[#allocation4] sm:$0xf]  ;;  %v621_v32 = vadd.f32 %v619_v31, %v610_v15 }
 0x461   :  { %v925_v0 = vpop.permute.xlu0 %924  ;;  %1253 = vrcp.f32 %v940_v29 }
 0x462   :  { %v927_v44 = vadd.f32 %v925_v0, %v916_v46 }
 0x464   :  { %v934_v3 = vsel %vm339_vm4, %v621_v32, %v927_v44 }
 0x465   :  { %936 = vst.msk [vmem:[#allocation5] sm:$0xf] %vm123_vm3, %v934_v3 }
 0x46b   :  { %v1254_v50 = vpop.eup %1253 }
 0x46c   :  { %950 = vperm.xlu0 %1216, %v1254_v50   ;;  %945 = vperm.xlu1 %1215, %v1254_v50   ;;  %v942_v49 = vld [vmem:[#allocation5] sm:$0xf] }
 0x4eb   :  { %v951_v7 = vpop.permute.xlu0 %950  ;;  %v946_v53 = vpop.permute.xlu1 %945 }
 0x4ec   :  { %v953_v60 = vmul.f32 %v951_v7, %v942_v49  ;;  %v948_v12 = vmul.f32 %v946_v53, %v942_v49 }
 0x4ee   :  { %v954_v35 = vsel %vm339_vm4, %v948_v12, %v953_v60 }
 0x4ef   :  { %1160 = vmatmul.mubr.msk.f32.vlgmr.msra.gmra.mrb[2].mxu0 %vm49_vm2, %v954_v35 }
 0x5c2   :  { %v1039_v52 = vpop.f32.mrb[2].mxu0 }
 0x5c3   :  { %v1040_v37 = vadd.f32 %v1060_v36, %v1039_v52  ;;  %v1161_v59 = vpop.f32.mrb[3].mxu0 }
 0x5c5   :  { %1043 = vst.msk [vmem:[%s1721_s8] sm:$0xf] %vm123_vm3, %v1040_v37 }

// kernel: last_query_forward.4
= control target key start
LH: loop header
LB: loop body
LE: loop exit
PB: predicated region body
PF: predicated region fallthrough
CT: control target
= control target key end

     0   :  { %v62_v0 = vlaneseq  ;;  %v1345_v1 = vmov 1966171168   ;;  %vm105_vm0 = vcmask 523264   ;;  %s1846_s1 = inlined_call_operand.vmem [shape: f32[4,64], index: 1, kind: input, shape index: {}]   ;;  %s1847_s0 = inlined_call_operand.vmem [shape: f32[4,16,64], index: 0, kind: input, shape index: {}]   ;;  %s1848_s4 = inlined_call_operand.vmem [shape: f32[64,64], index: 4, kind: input, shape index: {}]   ;;  %s1849_s2 = inlined_call_operand.vmem [shape: f32[1,64], index: 2, kind: input, shape index: {}]   ;;  %s1850_s3 = inlined_call_operand.vmem [shape: f32[1,64], index: 3, kind: input, shape index: {}]   ;;  %s1851_s6 = inlined_call_operand.vmem [shape: f32[64,64], index: 6, kind: input, shape index: {}]   ;;  %s1852_s5 = inlined_call_operand.vmem [shape: f32[1,64], index: 5, kind: input, shape index: {}]   ;;  %s1853_s7 = inlined_call_operand.vmem [shape: f32[1,64], index: 7, kind: input, shape index: {}]   ;;  %s1854_s10 = inlined_call_operand.vmem [shape: f32[64,256], index: 10, kind: input, shape index: {}]   ;;  %s1855_s8 = inlined_call_operand.vmem [shape: f32[1,64], index: 8, kind: input, shape index: {}]   ;;  %s1856_s9 = inlined_call_operand.vmem [shape: f32[1,64], index: 9, kind: input, shape index: {}]   ;;  %s1857_s11 = inlined_call_operand.vmem [shape: f32[1,256], index: 11, kind: input, shape index: {}]   ;;  %s1858_s12 = inlined_call_operand.vmem [shape: f32[16,4,256], index: 12, kind: output, shape index: {}]  }
   0x1   :  { %v60_v2 = vunpack.c.l.s4 %v1345_v1  ;;  %v1126_v3 = vld.sshfl [vmem:[%s1846_s1] sm:$0x33 pattern:$0x75316420]  ;;  %v1431_v12 = vld [vmem:[%s1847_s0 + $0x10] sm:$0xff]  ;;  %v1436_v13 = vld [vmem:[%s1847_s0 + $0x8] sm:$0xff] }
   0x2   :  { %v1417_v4 = vshrl.u32 %v62_v0, 7  ;;  %v58_v6 = vcombine.high %v1126_v3, %v1126_v3  ;;  %v1426_v9 = vld [vmem:[%s1847_s0] sm:$0xff]  ;;  %v1441_v14 = vld [vmem:[%s1847_s0 + $0x18] sm:$0xff]  ;;  %v1458_v25 = vld [vmem:[%s1847_s0 + $0x28] sm:$0xff] }
   0x3   :  { %v61_v5 = vunpack.c.0.s8 %v60_v2  ;;  %v1452_v23 = vld [vmem:[%s1847_s0 + $0x20] sm:$0xff]  ;;  %v1470_v33 = vld [vmem:[%s1847_s0 + $0x30] sm:$0xff]  ;;  %v1475_v34 = vld [vmem:[%s1847_s0 + $0x38] sm:$0xff] }
   0x4   :  { %v1421_v8 = vsub.s32 0, %v1417_v4 }
   0x5   :  { %v64_v7 = vsub.s32 %v61_v5, %v1417_v4 }
   0x7   :  { %v65_v10 = vrot.slane %v1126_v3, %v64_v7  ;;  %v72_v11 = vrot.slane %v58_v6, %v64_v7 }
   0x9   :  { %v78_v15 = vrot.slane %v65_v10, %v1421_v8  ;;  %v82_v16 = vrot.slane %v72_v11, %v1421_v8  ;;  %v73_v17 = vcombine.high %v65_v10, %v65_v10  ;;  %v74_v18 = vcombine.high %v72_v11, %v72_v11 }
   0xb   :  { %v95_v19 = vadd.f32 %v78_v15, %v1426_v9  ;;  %v97_v20 = vadd.f32 %v82_v16, %v1431_v12  ;;  %v96_v21 = vadd.f32 %v78_v15, %v1436_v13  ;;  %v98_v22 = vadd.f32 %v82_v16, %v1441_v14 }
   0xc   :  { %v86_v24 = vrot.slane %v73_v17, %v1421_v8  ;;  %v90_v28 = vrot.slane %v74_v18, %v1421_v8 }
   0xd   :  { %v106_v26 = vsel %vm105_vm0, %v95_v19, 0.0  ;;  %v112_v27 = vsel %vm105_vm0, %v97_v20, 0.0  ;;  %v109_v29 = vsel %vm105_vm0, %v96_v21, 0.0  ;;  %v115_v30 = vsel %vm105_vm0, %v98_v22, 0.0 }
   0xe   :  { %107 = vadd.xlane.f32.xlu0 %v106_v26  ;;  %113 = vadd.xlane.f32.xlu1 %v112_v27  ;;  %v99_v31 = vadd.f32 %v86_v24, %v1452_v23  ;;  %v100_v32 = vadd.f32 %v86_v24, %v1458_v25  ;;  %v101_v37 = vadd.f32 %v90_v28, %v1470_v33  ;;  %v239_v24 = vld [vmem:[%s1848_s4] sm:$0xff]  ;;  %v240_v26 = vld [vmem:[%s1848_s4 + $0x8] sm:$0xff] }
   0xf   :  { %v102_v38 = vadd.f32 %v90_v28, %v1475_v34  ;;  %v1245_v27 = vpack.c.bf16 %v240_v26, %v239_v24  ;;  %v241_v28 = vld [vmem:[%s1848_s4 + $0x10] sm:$0xff] }
  0x10   :  { %v118_v35 = vsel %vm105_vm0, %v99_v31, 0.0  ;;  %v121_v36 = vsel %vm105_vm0, %v100_v32, 0.0  ;;  %v124_v39 = vsel %vm105_vm0, %v101_v37, 0.0 }
  0x11   :  { %v127_v40 = vsel %vm105_vm0, %v102_v38, 0.0  ;;  %1246 = vmatprep.subr.bf16.mxu1 %v1245_v27 }
  0x12   :  { %110 = vadd.xlane.f32.xlu0 %v109_v29  ;;  %116 = vadd.xlane.f32.xlu1 %v115_v30  ;;  %v242_v29 = vld [vmem:[%s1848_s4 + $0x18] sm:$0xff] }
  0x13   :  { %1248 = vmatpush3.bf16.msra.mxu1 %v1245_v27  ;;  %v1249_v30 = vpack.c.bf16 %v242_v29, %v241_v28 }
  0x15   :  { %1250 = vmatprep.subr.bf16.mxu1 %v1249_v30 }
  0x16   :  { %119 = vadd.xlane.f32.xlu0 %v118_v35  ;;  %122 = vadd.xlane.f32.xlu1 %v121_v36  ;;  %v245_v36 = vld [vmem:[%s1848_s4 + $0x30] sm:$0xff] }
  0x17   :  { %1252 = vmatpush3.bf16.msra.mxu1 %v1249_v30 }
  0x1a   :  { %125 = vadd.xlane.f32.xlu0 %v124_v39  ;;  %128 = vadd.xlane.f32.xlu1 %v127_v40 }
  0x9b   :  { %v108_v41 = vpop.xlane.xlu0 %107  ;;  %v114_v42 = vpop.xlane.xlu1 %113 }
  0x9c   :  { %v131_v43 = vmul.f32 0.015625, %v108_v41  ;;  %v133_v44 = vmul.f32 0.015625, %v114_v42 }
  0x9e   :  { %v1483_v45 = vsub.f32 %v95_v19, %v131_v43  ;;  %v1485_v46 = vsub.f32 %v97_v20, %v133_v44 }
  0x9f   :  { %v111_v47 = vpop.xlane.xlu0 %110  ;;  %v117_v48 = vpop.xlane.xlu1 %116 }
  0xa0   :  { %v132_v49 = vmul.f32 0.015625, %v111_v47  ;;  %v134_v50 = vmul.f32 0.015625, %v117_v48  ;;  %v147_v51 = vmul.f32 %v1483_v45, %v1483_v45  ;;  %v149_v52 = vmul.f32 %v1485_v46, %v1485_v46 }
  0xa2   :  { %v1491_v53 = vsub.f32 %v96_v21, %v132_v49  ;;  %v1493_v54 = vsub.f32 %v98_v22, %v134_v50  ;;  %v155_v55 = vsel %vm105_vm0, %v147_v51, 0.0  ;;  %v161_v58 = vsel %vm105_vm0, %v149_v52, 0.0 }
  0xa3   :  { %156 = vadd.xlane.f32.xlu0 %v155_v55  ;;  %v120_v56 = vpop.xlane.xlu0 %119  ;;  %v123_v57 = vpop.xlane.xlu1 %122 }
  0xa4   :  { %v135_v59 = vmul.f32 0.015625, %v120_v56  ;;  %v136_v60 = vmul.f32 0.015625, %v123_v57  ;;  %v148_v61 = vmul.f32 %v1491_v53, %v1491_v53  ;;  %v150_v62 = vmul.f32 %v1493_v54, %v1493_v54 }
  0xa6   :  { %v1501_v63 = vsub.f32 %v99_v31, %v135_v59  ;;  %v1503_v0 = vsub.f32 %v100_v32, %v136_v60  ;;  %v158_v1 = vsel %vm105_vm0, %v148_v61, 0.0  ;;  %v164_v5 = vsel %vm105_vm0, %v150_v62, 0.0  ;;  %v243_v31 = vld [vmem:[%s1848_s4 + $0x20] sm:$0xff]  ;;  %v244_v32 = vld [vmem:[%s1848_s4 + $0x28] sm:$0xff] }
  0xa7   :  { %162 = vadd.xlane.f32.xlu0 %v161_v58  ;;  %159 = vadd.xlane.f32.xlu1 %v158_v1  ;;  %v126_v2 = vpop.xlane.xlu0 %125  ;;  %v129_v3 = vpop.xlane.xlu1 %128  ;;  %v1253_v35 = vpack.c.bf16 %v244_v32, %v243_v31 }
  0xa8   :  { %v137_v6 = vmul.f32 0.015625, %v126_v2  ;;  %v138_v7 = vmul.f32 0.015625, %v129_v3  ;;  %v151_v10 = vmul.f32 %v1501_v63, %v1501_v63  ;;  %v152_v11 = vmul.f32 %v1503_v0, %v1503_v0  ;;  %v1127_v3 = vld [vmem:[%s1849_s2] ss:$0 sm:$0xff] }
  0xa9   :  { %1254 = vmatprep.subr.bf16.mxu1 %v1253_v35 }
  0xaa   :  { %v1511_v15 = vsub.f32 %v101_v37, %v137_v6  ;;  %v1513_v16 = vsub.f32 %v102_v38, %v138_v7  ;;  %v167_v17 = vsel %vm105_vm0, %v151_v10, 0.0  ;;  %v170_v18 = vsel %vm105_vm0, %v152_v11, 0.0  ;;  %1256 = vmatpush3.bf16.msra.mxu1 %v1253_v35  ;;  %v246_v37 = vld [vmem:[%s1848_s4 + $0x38] sm:$0xff]  ;;  %v1128_v10 = vld [vmem:[%s1850_s3] ss:$0 sm:$0xff] }
  0xab   :  { %165 = vadd.xlane.f32.xlu1 %v164_v5  ;;  %168 = vadd.xlane.f32.xlu0 %v167_v17  ;;  %v1257_v38 = vpack.c.bf16 %v246_v37, %v245_v36 }
  0xac   :  { %v153_v19 = vmul.f32 %v1511_v15, %v1511_v15  ;;  %v154_v20 = vmul.f32 %v1513_v16, %v1513_v16 }
  0xad   :  { %1258 = vmatprep.subr.bf16.mxu1 %v1257_v38 }
  0xae   :  { %v173_v21 = vsel %vm105_vm0, %v153_v19, 0.0  ;;  %v176_v22 = vsel %vm105_vm0, %v154_v20, 0.0  ;;  %1260 = vmatpush3.bf16.msra.mxu1 %v1257_v38 }
  0xaf   :  { %171 = vadd.xlane.f32.xlu1 %v170_v18  ;;  %174 = vadd.xlane.f32.xlu0 %v173_v21 }
  0xb3   :  { %177 = vadd.xlane.f32.xlu1 %v176_v22 }
 0x130   :  { %v157_v39 = vpop.xlane.xlu0 %156 }
 0x131   :  { %v179_v40 = vmul.f32 0.015625, %v157_v39 }
 0x133   :  { %v187_v41 = vadd.f32 1e-05, %v179_v40 }
 0x134   :  { %v160_v42 = vpop.xlane.xlu1 %159  ;;  %v163_v43 = vpop.xlane.xlu0 %162 }
 0x135   :  { %1297 = vrsqrt.f32 %v187_v41  ;;  %v180_v44 = vmul.f32 0.015625, %v160_v42  ;;  %v181_v47 = vmul.f32 0.015625, %v163_v43 }
 0x137   :  { %v188_v48 = vadd.f32 1e-05, %v180_v44  ;;  %v189_v49 = vadd.f32 1e-05, %v181_v47  ;;  %v456_v47 = vld [vmem:[%s1851_s6 + $0x8] sm:$0xff] }
 0x138   :  { %v166_v50 = vpop.xlane.xlu1 %165  ;;  %v169_v51 = vpop.xlane.xlu0 %168 }
 0x139   :  { %1299 = vrsqrt.f32 %v188_v48  ;;  %v182_v52 = vmul.f32 0.015625, %v166_v50  ;;  %v183_v55 = vmul.f32 0.015625, %v169_v51  ;;  %v459_v51 = vld [vmem:[%s1851_s6 + $0x20] sm:$0xff] }
 0x13a   :  { %1301 = vrsqrt.f32 %v189_v49  ;;  %v458_v49 = vld [vmem:[%s1851_s6 + $0x18] sm:$0xff] }
 0x13b   :  { %v190_v56 = vadd.f32 1e-05, %v182_v52  ;;  %v191_v57 = vadd.f32 1e-05, %v183_v55  ;;  %v460_v52 = vld [vmem:[%s1851_s6 + $0x28] sm:$0xff] }
 0x13c   :  { %v172_v58 = vpop.xlane.xlu1 %171  ;;  %v175_v59 = vpop.xlane.xlu0 %174  ;;  %v1269_v55 = vpack.c.bf16 %v460_v52, %v459_v51 }
 0x13d   :  { %1303 = vrsqrt.f32 %v190_v56  ;;  %v184_v60 = vmul.f32 0.015625, %v172_v58  ;;  %v185_v61 = vmul.f32 0.015625, %v175_v59  ;;  %v461_v56 = vld [vmem:[%s1851_s6 + $0x30] sm:$0xff]  ;;  %v1129_v59 = vld [vmem:[%s1852_s5] ss:$0 sm:$0xff] }
 0x13e   :  { %1305 = vrsqrt.f32 %v191_v57  ;;  %v462_v57 = vld [vmem:[%s1851_s6 + $0x38] sm:$0xff] }
 0x13f   :  { %v1298_v62 = vpop.eup %1297  ;;  %v192_v1 = vadd.f32 1e-05, %v184_v60  ;;  %v193_v2 = vadd.f32 1e-05, %v185_v61  ;;  %v1273_v58 = vpack.c.bf16 %v462_v57, %v461_v56 }
 0x140   :  { %v178_v5 = vpop.xlane.xlu1 %177  ;;  %v203_v6 = vmul.f32 %v1298_v62, %v1483_v45 }
 0x141   :  { %1307 = vrsqrt.f32 %v192_v1  ;;  %v186_v7 = vmul.f32 0.015625, %v178_v5 }
 0x142   :  { %1309 = vrsqrt.f32 %v193_v2  ;;  %v217_v11 = vmul.f32 %v1127_v3, %v203_v6 }
 0x143   :  { %v1300_v17 = vpop.eup %1299  ;;  %v194_v18 = vadd.f32 1e-05, %v186_v7 }
 0x144   :  { %v1302_v19 = vpop.eup %1301  ;;  %v231_v20 = vadd.f32 %v1128_v10, %v217_v11  ;;  %v204_v21 = vmul.f32 %v1300_v17, %v1491_v53 }
 0x145   :  { %1311 = vrsqrt.f32 %v194_v18  ;;  %v205_v22 = vmul.f32 %v1302_v19, %v1485_v46 }
 0x146   :  { %1205 = vmatprep.mubr.msk.f32.mxu1 %vm105_vm0, %v231_v20  ;;  %v218_v45 = vmul.f32 %v1127_v3, %v204_v21 }
 0x147   :  { %v1304_v24 = vpop.eup %1303  ;;  %v219_v26 = vmul.f32 %v1127_v3, %v205_v22 }
 0x148   :  { %v1306_v27 = vpop.eup %1305  ;;  %v232_v28 = vadd.f32 %v1128_v10, %v218_v45  ;;  %v206_v29 = vmul.f32 %v1304_v24, %v1493_v54 }
 0x149   :  { %v233_v30 = vadd.f32 %v1128_v10, %v219_v26  ;;  %v207_v31 = vmul.f32 %v1306_v27, %v1501_v63 }
 0x14a   :  { %1206 = vmatmul.mubr.msk.f32.vlgmr.msra.gmra.mrb[0].mxu1 %vm105_vm0, %v232_v28  ;;  %v220_v32 = vmul.f32 %v1127_v3, %v206_v29 }
 0x14b   :  { %v1308_v35 = vpop.eup %1307  ;;  %1208 = vmatprep.mubr.msk.f32.mxu1 %vm105_vm0, %v233_v30  ;;  %v221_v53 = vmul.f32 %v1127_v3, %v207_v31 }
 0x14c   :  { %v1310_v46 = vpop.eup %1309  ;;  %v234_v36 = vadd.f32 %v1128_v10, %v220_v32  ;;  %v208_v37 = vmul.f32 %v1308_v35, %v1503_v0 }
 0x14d   :  { %v235_v38 = vadd.f32 %v1128_v10, %v221_v53  ;;  %v209_v39 = vmul.f32 %v1310_v46, %v1511_v15  ;;  %v455_v15 = vld [vmem:[%s1851_s6] sm:$0xff] }
 0x14e   :  { %1209 = vmatmul.mubr.msk.f32.gmra.mrb[2].mxu1 %vm105_vm0, %v234_v36  ;;  %v222_v54 = vmul.f32 %v1127_v3, %v208_v37  ;;  %v1261_v48 = vpack.c.bf16 %v456_v47, %v455_v15 }
 0x14f   :  { %v1312_v40 = vpop.eup %1311  ;;  %1211 = vmatprep.mubr.msk.f32.mxu1 %vm105_vm0, %v235_v38  ;;  %v223_v63 = vmul.f32 %v1127_v3, %v209_v39 }
 0x150   :  { %v236_v41 = vadd.f32 %v1128_v10, %v222_v54  ;;  %v210_v42 = vmul.f32 %v1312_v40, %v1513_v16  ;;  %1262 = vmatprep.subr.bf16.mxu1 %v1261_v48  ;;  %v457_v16 = vld [vmem:[%s1851_s6 + $0x10] sm:$0xff] }
 0x151   :  { %v237_v43 = vadd.f32 %v1128_v10, %v223_v63  ;;  %1264 = vmatpush3.bf16.msra.mxu1 %v1261_v48  ;;  %v1265_v50 = vpack.c.bf16 %v458_v49, %v457_v16 }
 0x152   :  { %1212 = vmatmul.mubr.msk.f32.gmra.mrb[4].mxu1 %vm105_vm0, %v236_v41  ;;  %v224_v44 = vmul.f32 %v1127_v3, %v210_v42 }
 0x153   :  { %1214 = vmatprep.mubr.msk.f32.mxu1 %vm105_vm0, %v237_v43  ;;  %1266 = vmatprep.subr.bf16.mxu1 %v1265_v50 }
 0x154   :  { %v238_v0 = vadd.f32 %v1128_v10, %v224_v44 }
 0x155   :  { %1268 = vmatpush3.bf16.msra.mxu1 %v1265_v50 }
 0x156   :  { %1215 = vmatmul.mubr.msk.f32.gmra.mrb[6].mxu1 %vm105_vm0, %v238_v0  ;;  %1270 = vmatprep.subr.bf16.mxu1 %v1269_v55 }
 0x159   :  { %1272 = vmatpush3.bf16.msra.mxu1 %v1269_v55 }
 0x15a   :  { %1274 = vmatprep.subr.bf16.mxu1 %v1273_v58 }
 0x15d   :  { %1276 = vmatpush3.bf16.msra.mxu1 %v1273_v58 }
 0x21d   :  { %v1207_v60 = vpop.f32.mrb[0].mxu1 }
 0x21e   :  { %v1596_v61 = vadd.f32 %v1207_v60, %v1129_v59  ;;  %v344_v62 = vpop.f32.mrb[1].mxu1 }
 0x21f   :  { %v345_v1 = vadd.f32 %v1129_v59, %v344_v62 }
 0x220   :  { %v392_v2 = vmul.f32 0.044715, %v1596_v61 }
 0x221   :  { %v391_v3 = vmul.f32 0.044715, %v345_v1  ;;  %v1210_v5 = vpop.f32.mrb[2].mxu1 }
 0x222   :  { %v400_v6 = vmul.f32 %v392_v2, %v1596_v61  ;;  %v1600_v7 = vadd.f32 %v1210_v5, %v1129_v59  ;;  %v354_v10 = vpop.f32.mrb[3].mxu1 }
 0x223   :  { %v399_v11 = vmul.f32 %v391_v3, %v345_v1  ;;  %v1602_v17 = vadd.f32 %v1129_v59, %v354_v10 }
 0x224   :  { %v408_v18 = vmul.f32 %v400_v6, %v1596_v61  ;;  %v394_v19 = vmul.f32 0.044715, %v1600_v7  ;;  %v383_v6 = vmul.f32 0.5, %v345_v1 }
 0x225   :  { %v407_v20 = vmul.f32 %v399_v11, %v345_v1  ;;  %v393_v21 = vmul.f32 0.044715, %v1602_v17  ;;  %v1213_v22 = vpop.f32.mrb[4].mxu1  ;;  %v384_v11 = vmul.f32 0.5, %v1596_v61 }
 0x226   :  { %v416_v45 = vadd.f32 %v408_v18, %v1596_v61  ;;  %v402_v24 = vmul.f32 %v394_v19, %v1600_v7  ;;  %v1609_v26 = vadd.f32 %v1213_v22, %v1129_v59  ;;  %v364_v27 = vpop.f32.mrb[5].mxu1 }
 0x227   :  { %v415_v28 = vadd.f32 %v407_v20, %v345_v1  ;;  %v401_v29 = vmul.f32 %v393_v21, %v1602_v17  ;;  %v1612_v30 = vadd.f32 %v1129_v59, %v364_v27  ;;  %v386_v27 = vmul.f32 0.5, %v1600_v7 }
 0x228   :  { %v424_v31 = vmul.f32 0.7978846, %v416_v45  ;;  %v410_v32 = vmul.f32 %v402_v24, %v1600_v7  ;;  %v396_v35 = vmul.f32 0.044715, %v1609_v26  ;;  %v385_v45 = vmul.f32 0.5, %v1602_v17 }
 0x229   :  { %v409_v53 = vmul.f32 %v401_v29, %v1602_v17  ;;  %v395_v46 = vmul.f32 0.044715, %v1612_v30  ;;  %v1216_v36 = vpop.f32.mrb[6].mxu1  ;;  %v423_v37 = vmul.f32 0.7978846, %v415_v28 }
 0x22a   :  { %1313 = vtanh.f32 %v424_v31  ;;  %v418_v38 = vadd.f32 %v410_v32, %v1600_v7  ;;  %v404_v39 = vmul.f32 %v396_v35, %v1609_v26  ;;  %v1620_v54 = vadd.f32 %v1216_v36, %v1129_v59  ;;  %v374_v40 = vpop.f32.mrb[7].mxu1 }
 0x22b   :  { %v417_v63 = vadd.f32 %v409_v53, %v1602_v17  ;;  %v403_v41 = vmul.f32 %v395_v46, %v1612_v30  ;;  %v375_v42 = vadd.f32 %v1129_v59, %v374_v40  ;;  %1315 = vtanh.f32 %v423_v37 }
 0x22c   :  { %v412_v43 = vmul.f32 %v404_v39, %v1609_v26  ;;  %v398_v44 = vmul.f32 0.044715, %v1620_v54  ;;  %v426_v0 = vmul.f32 0.7978846, %v418_v38  ;;  %v387_v32 = vmul.f32 0.5, %v1612_v30 }
 0x22d   :  { %v411_v15 = vmul.f32 %v403_v41, %v1612_v30  ;;  %v397_v47 = vmul.f32 0.044715, %v375_v42  ;;  %v425_v48 = vmul.f32 0.7978846, %v417_v63  ;;  %v388_v53 = vmul.f32 0.5, %v1609_v26 }
 0x22e   :  { %v420_v16 = vadd.f32 %v412_v43, %v1609_v26  ;;  %v406_v49 = vmul.f32 %v398_v44, %v1620_v54  ;;  %1317 = vtanh.f32 %v426_v0  ;;  %v389_v7 = vmul.f32 0.5, %v375_v42  ;;  %v1138_v26 = vld [vmem:[%s1853_s7] ss:$0 sm:$0xff] }
 0x22f   :  { %v419_v50 = vadd.f32 %v411_v15, %v1612_v30  ;;  %v405_v51 = vmul.f32 %v397_v47, %v375_v42  ;;  %1319 = vtanh.f32 %v425_v48  ;;  %v390_v40 = vmul.f32 0.5, %v1620_v54 }
 0x230   :  { %v414_v52 = vmul.f32 %v406_v49, %v1620_v54  ;;  %v428_v55 = vmul.f32 0.7978846, %v420_v16 }
 0x231   :  { %v413_v56 = vmul.f32 %v405_v51, %v375_v42  ;;  %v427_v57 = vmul.f32 0.7978846, %v419_v50 }
 0x232   :  { %v422_v58 = vadd.f32 %v414_v52, %v1620_v54  ;;  %1321 = vtanh.f32 %v428_v55 }
 0x233   :  { %v421_v59 = vadd.f32 %v413_v56, %v375_v42  ;;  %1323 = vtanh.f32 %v427_v57 }
 0x234   :  { %v1314_v60 = vpop.eup %1313  ;;  %v430_v62 = vmul.f32 0.7978846, %v422_v58 }
 0x235   :  { %v1316_v2 = vpop.eup %1315  ;;  %v440_v3 = vadd.f32 1.0, %v1314_v60  ;;  %v429_v5 = vmul.f32 0.7978846, %v421_v59 }
 0x236   :  { %v439_v10 = vadd.f32 1.0, %v1316_v2  ;;  %1325 = vtanh.f32 %v430_v62 }
 0x237   :  { %1327 = vtanh.f32 %v429_v5  ;;  %v448_v21 = vmul.f32 %v440_v3, %v384_v11 }
 0x238   :  { %v1318_v18 = vpop.eup %1317  ;;  %v447_v19 = vmul.f32 %v439_v10, %v383_v6 }
 0x239   :  { %v1320_v20 = vpop.eup %1319  ;;  %v442_v22 = vadd.f32 1.0, %v1318_v18 }
 0x23a   :  { %1233 = vmatprep.mubr.msk.f32.mxu1 %vm105_vm0, %v447_v19  ;;  %v441_v24 = vadd.f32 1.0, %v1320_v20 }
 0x23b   :  { %1234 = vmatmul.mubr.msk.f32.vlgmr.msra.gmra.mrb[8].mxu1 %vm105_vm0, %v448_v21  ;;  %v450_v31 = vmul.f32 %v442_v22, %v386_v27 }
 0x23c   :  { %v1322_v1 = vpop.eup %1321  ;;  %v449_v28 = vmul.f32 %v441_v24, %v385_v45 }
 0x23d   :  { %v1324_v29 = vpop.eup %1323  ;;  %v444_v61 = vadd.f32 1.0, %v1322_v1 }
 0x23e   :  { %1236 = vmatprep.mubr.msk.f32.mxu1 %vm105_vm0, %v449_v28  ;;  %v443_v35 = vadd.f32 1.0, %v1324_v29 }
 0x23f   :  { %1237 = vmatmul.mubr.msk.f32.gmra.mrb[10].mxu1 %vm105_vm0, %v450_v31  ;;  %v452_v37 = vmul.f32 %v444_v61, %v388_v53 }
 0x240   :  { %v1326_v17 = vpop.eup %1325  ;;  %v451_v46 = vmul.f32 %v443_v35, %v387_v32 }
 0x241   :  { %v1328_v36 = vpop.eup %1327  ;;  %v446_v38 = vadd.f32 1.0, %v1326_v17 }
 0x242   :  { %1239 = vmatprep.mubr.msk.f32.mxu1 %vm105_vm0, %v451_v46  ;;  %v445_v39 = vadd.f32 1.0, %v1328_v36 }
 0x243   :  { %1240 = vmatmul.mubr.msk.f32.gmra.mrb[12].mxu1 %vm105_vm0, %v452_v37  ;;  %v454_v30 = vmul.f32 %v446_v38, %v390_v40 }
 0x244   :  { %v453_v63 = vmul.f32 %v445_v39, %v389_v7 }
 0x246   :  { %1242 = vmatprep.mubr.msk.f32.mxu1 %vm105_vm0, %v453_v63 }
 0x247   :  { %1243 = vmatmul.mubr.msk.f32.gmra.mrb[14].mxu1 %vm105_vm0, %v454_v30 }
 0x30e   :  { %v1235_v41 = vpop.f32.mrb[8].mxu1 }
 0x30f   :  { %v560_v43 = vpop.f32.mrb[9].mxu1  ;;  %v566_v49 = vadd.f32 %v1235_v41, %v1138_v26 }
 0x310   :  { %v561_v44 = vadd.f32 %v1138_v26, %v560_v43 }
 0x312   :  { %v1238_v0 = vpop.f32.mrb[10].mxu1  ;;  %v599_v42 = vadd.f32 %v561_v44, %v1426_v9  ;;  %v600_v9 = vadd.f32 %v566_v49, %v1436_v13  ;;  %v878_v49 = vld [vmem:[%s1854_s10 + $0x8] sm:$0xff] }
 0x313   :  { %v570_v15 = vpop.f32.mrb[11].mxu1  ;;  %v576_v58 = vadd.f32 %v1238_v0, %v1138_v26 }
 0x314   :  { %v571_v47 = vadd.f32 %v1138_v26, %v570_v15  ;;  %v609_v54 = vsel %vm105_vm0, %v599_v42, 0.0  ;;  %v612_v2 = vsel %vm105_vm0, %v600_v9, 0.0 }
 0x315   :  { %610 = vadd.xlane.f32.xlu0 %v609_v54 }
 0x316   :  { %v1241_v48 = vpop.f32.mrb[12].mxu1  ;;  %v601_v16 = vadd.f32 %v571_v47, %v1431_v12 }
 0x317   :  { %v580_v50 = vpop.f32.mrb[13].mxu1  ;;  %v586_v59 = vadd.f32 %v1241_v48, %v1138_v26 }
 0x318   :  { %v581_v51 = vadd.f32 %v1138_v26, %v580_v50  ;;  %v615_v52 = vsel %vm105_vm0, %v601_v16, 0.0  ;;  %v880_v50 = vld [vmem:[%s1854_s10 + $0x18] sm:$0xff] }
 0x319   :  { %616 = vadd.xlane.f32.xlu1 %v615_v52  ;;  %v604_v6 = vadd.f32 %v586_v59, %v1458_v25  ;;  %v877_v52 = vld [vmem:[%s1854_s10] sm:$0xff] }
 0x31a   :  { %v1244_v55 = vpop.f32.mrb[14].mxu1  ;;  %v603_v56 = vadd.f32 %v581_v51, %v1452_v23  ;;  %v602_v23 = vadd.f32 %v576_v58, %v1441_v14  ;;  %v1277_v51 = vpack.c.bf16 %v880_v50, %v878_v49  ;;  %v881_v59 = vld [vmem:[%s1854_s10 + $0x20] sm:$0xff] }
 0x31b   :  { %v590_v57 = vpop.f32.mrb[15].mxu1  ;;  %v596_v3 = vadd.f32 %v1244_v55, %v1138_v26  ;;  %v624_v13 = vsel %vm105_vm0, %v604_v6, 0.0  ;;  %v879_v55 = vld [vmem:[%s1854_s10 + $0x10] sm:$0xff]  ;;  %v1147_v50 = vld [vmem:[%s1855_s8] ss:$0 sm:$0xff] }
 0x31c   :  { %v591_v60 = vadd.f32 %v1138_v26, %v590_v57  ;;  %v621_v62 = vsel %vm105_vm0, %v603_v56, 0.0  ;;  %v618_v10 = vsel %vm105_vm0, %v602_v23, 0.0  ;;  %1278 = vmatprep.subr.bf16.mxu0 %v1277_v51  ;;  %v882_v57 = vld [vmem:[%s1854_s10 + $0x28] sm:$0xff] }
 0x31d   :  { %622 = vadd.xlane.f32.xlu0 %v621_v62  ;;  %v606_v11 = vadd.f32 %v596_v3, %v1475_v34 }
 0x31e   :  { %v605_v12 = vadd.f32 %v591_v60, %v1470_v33  ;;  %v883_v60 = vld [vmem:[%s1854_s10 + $0x30] sm:$0xff] }
 0x31f   :  { %v630_v33 = vsel %vm105_vm0, %v606_v11, 0.0  ;;  %v1283_v62 = vpack.c.bf16 %v883_v60, %v881_v59 }
 0x320   :  { %v627_v5 = vsel %vm105_vm0, %v605_v12, 0.0 }
 0x321   :  { %613 = vadd.xlane.f32.xlu0 %v612_v2  ;;  %628 = vadd.xlane.f32.xlu1 %v627_v5  ;;  %v888_v2 = vld [vmem:[%s1854_s10 + $0x58] sm:$0xff]  ;;  %v885_v5 = vld [vmem:[%s1854_s10 + $0x40] sm:$0xff] }
 0x325   :  { %625 = vadd.xlane.f32.xlu0 %v624_v13  ;;  %619 = vadd.xlane.f32.xlu1 %v618_v10  ;;  %v890_v13 = vld [vmem:[%s1854_s10 + $0x68] sm:$0xff]  ;;  %v892_v10 = vld [vmem:[%s1854_s10 + $0x78] sm:$0xff] }
 0x329   :  { %631 = vadd.xlane.f32.xlu1 %v630_v33  ;;  %v1289_v33 = vpack.c.bf16 %v892_v10, %v890_v13 }
 0x3a2   :  { %v611_v18 = vpop.xlane.xlu0 %610 }
 0x3a3   :  { %v633_v19 = vmul.f32 0.015625, %v611_v18  ;;  %v891_v18 = vld [vmem:[%s1854_s10 + $0x70] sm:$0xff] }
 0x3a5   :  { %v1665_v20 = vsub.f32 %v599_v42, %v633_v19  ;;  %v1346_v19 = vmov 0.0  }
 0x3a6   :  { %v617_v25 = vpop.xlane.xlu1 %616  ;;  %1009 = vmatprep.mubr.f32.mxu0 %v1346_v19 }
 0x3a7   :  { %v635_v21 = vmul.f32 0.015625, %v617_v25  ;;  %v649_v14 = vmul.f32 %v1665_v20, %v1665_v20 }
 0x3a9   :  { %v1669_v22 = vsub.f32 %v601_v16, %v635_v21  ;;  %v657_v45 = vsel %vm105_vm0, %v649_v14, 0.0 }
 0x3aa   :  { %658 = vadd.xlane.f32.xlu0 %v657_v45  ;;  %v623_v34 = vpop.xlane.xlu0 %622 }
 0x3ab   :  { %v637_v24 = vmul.f32 0.015625, %v623_v34  ;;  %v651_v27 = vmul.f32 %v1669_v22, %v1669_v22 }
 0x3ad   :  { %v1674_v1 = vsub.f32 %v603_v56, %v637_v24  ;;  %v663_v28 = vsel %vm105_vm0, %v651_v27, 0.0  ;;  %v1279_v56 = vpack.c.bf16 %v879_v55, %v877_v52 }
 0x3ae   :  { %v614_v29 = vpop.xlane.xlu0 %613  ;;  %664 = vadd.xlane.f32.xlu1 %v663_v28  ;;  %v629_v31 = vpop.xlane.xlu1 %628 }
 0x3af   :  { %v634_v61 = vmul.f32 0.015625, %v614_v29  ;;  %v639_v32 = vmul.f32 0.015625, %v629_v31  ;;  %v653_v35 = vmul.f32 %v1674_v1, %v1674_v1  ;;  %1280 = vmatpush1.bf16.msra.mxu0 %v1279_v56 }
 0x3b1   :  { %v1679_v53 = vsub.f32 %v600_v9, %v634_v61  ;;  %v1681_v17 = vsub.f32 %v605_v12, %v639_v32  ;;  %v669_v46 = vsel %vm105_vm0, %v653_v35, 0.0  ;;  %v884_v9 = vld [vmem:[%s1854_s10 + $0x38] sm:$0xff]  ;;  %v886_v12 = vld [vmem:[%s1854_s10 + $0x48] sm:$0xff] }
 0x3b2   :  { %670 = vadd.xlane.f32.xlu0 %v669_v46  ;;  %v626_v36 = vpop.xlane.xlu0 %625  ;;  %v620_v37 = vpop.xlane.xlu1 %619  ;;  %v1281_v58 = vpack.c.bf16 %v884_v9, %v882_v57  ;;  %v1285_v3 = vpack.c.bf16 %v888_v2, %v886_v12 }
 0x3b3   :  { %v638_v38 = vmul.f32 0.015625, %v626_v36  ;;  %v636_v7 = vmul.f32 0.015625, %v620_v37  ;;  %v650_v39 = vmul.f32 %v1679_v53, %v1679_v53  ;;  %v655_v40 = vmul.f32 %v1681_v17, %v1681_v17 }
 0x3b4   :  { %1282 = vmatprep.subr.bf16.mxu0 %v1281_v58  ;;  %v1348_v58 = vmov 1934713408  }
 0x3b5   :  { %v1688_v63 = vsub.f32 %v604_v6, %v638_v38  ;;  %v1690_v30 = vsub.f32 %v602_v23, %v636_v7  ;;  %v660_v26 = vsel %vm105_vm0, %v650_v39, 0.0  ;;  %v675_v41 = vsel %vm105_vm0, %v655_v40, 0.0  ;;  %1284 = vmatpush1.bf16.msra.mxu0 %v1283_v62  ;;  %v887_v6 = vld [vmem:[%s1854_s10 + $0x50] sm:$0xff] }
 0x3b6   :  { %661 = vadd.xlane.f32.xlu0 %v660_v26  ;;  %676 = vadd.xlane.f32.xlu1 %v675_v41  ;;  %v632_v43 = vpop.xlane.xlu1 %631  ;;  %v1287_v23 = vpack.c.bf16 %v887_v6, %v885_v5  ;;  %v776_v59 = vunpack.c.l.s4 %v1348_v58 }
 0x3b7   :  { %v640_v44 = vmul.f32 0.015625, %v632_v43  ;;  %v654_v0 = vmul.f32 %v1688_v63, %v1688_v63  ;;  %v652_v42 = vmul.f32 %v1690_v30, %v1690_v30  ;;  %1286 = vmatprep.subr.bf16.mxu0 %v1285_v3 }
 0x3b9   :  { %v1698_v15 = vsub.f32 %v606_v11, %v640_v44  ;;  %v672_v47 = vsel %vm105_vm0, %v654_v0, 0.0  ;;  %v666_v54 = vsel %vm105_vm0, %v652_v42, 0.0  ;;  %1288 = vmatpush1.bf16.msra.mxu0 %v1287_v23  ;;  %v889_v11 = vld [vmem:[%s1854_s10 + $0x60] sm:$0xff]  ;;  %v777_v23 = vunpack.c.0.s8 %v776_v59 }
 0x3ba   :  { %673 = vadd.xlane.f32.xlu0 %v672_v47  ;;  %667 = vadd.xlane.f32.xlu1 %v666_v54  ;;  %v1291_v25 = vpack.c.bf16 %v891_v18, %v889_v11 }
 0x3bb   :  { %v656_v48 = vmul.f32 %v1698_v15, %v1698_v15  ;;  %1290 = vmatprep.subr.bf16.mxu0 %v1289_v33 }
 0x3bd   :  { %v678_v16 = vsel %vm105_vm0, %v656_v48, 0.0  ;;  %1292 = vmatpush1.bf16.msra.mxu0 %v1291_v25 }
 0x3be   :  { %679 = vadd.xlane.f32.xlu1 %v678_v16  ;;  %v1347_v16 = vmov 1983009808  }
 0x3bf   :  { %v744_v49 = vunpack.c.l.s4 %v1347_v16 }
 0x3c1   :  { %v745_v9 = vunpack.c.0.s8 %v744_v49 }
 0x3c3   :  { %v748_v6 = vsub.s32 %v745_v9, %v1417_v4 }
 0x437   :  { %v659_v21 = vpop.xlane.xlu0 %658 }
 0x438   :  { %v681_v14 = vmul.f32 0.015625, %v659_v21 }
 0x43a   :  { %v689_v24 = vadd.f32 1e-05, %v681_v14 }
 0x43b   :  { %v665_v45 = vpop.xlane.xlu1 %664 }
 0x43c   :  { %v683_v34 = vmul.f32 0.015625, %v665_v45  ;;  %1329 = vrsqrt.f32 %v689_v24  ;;  %v780_v24 = vsub.s32 %v777_v23, %v1417_v4 }
 0x43e   :  { %v691_v27 = vadd.f32 1e-05, %v683_v34 }
 0x43f   :  { %v671_v28 = vpop.xlane.xlu0 %670 }
 0x440   :  { %v685_v29 = vmul.f32 0.015625, %v671_v28  ;;  %1331 = vrsqrt.f32 %v691_v27 }
 0x442   :  { %v693_v31 = vadd.f32 1e-05, %v685_v29 }
 0x443   :  { %v662_v61 = vpop.xlane.xlu0 %661  ;;  %v677_v32 = vpop.xlane.xlu1 %676 }
 0x444   :  { %1333 = vrsqrt.f32 %v693_v31  ;;  %v682_v35 = vmul.f32 0.015625, %v662_v61  ;;  %v687_v46 = vmul.f32 0.015625, %v677_v32 }
 0x446   :  { %v695_v36 = vadd.f32 1e-05, %v687_v46  ;;  %v690_v37 = vadd.f32 1e-05, %v682_v35  ;;  %v1330_v43 = vpop.eup %1329 }
 0x447   :  { %v674_v38 = vpop.xlane.xlu0 %673  ;;  %v668_v7 = vpop.xlane.xlu1 %667  ;;  %v705_v54 = vmul.f32 %v1330_v43, %v1665_v20  ;;  %v1148_v20 = vld [vmem:[%s1856_s9] ss:$0 sm:$0xff] }
 0x448   :  { %v686_v39 = vmul.f32 0.015625, %v674_v38  ;;  %v684_v40 = vmul.f32 0.015625, %v668_v7  ;;  %1335 = vrsqrt.f32 %v695_v36 }
 0x449   :  { %1337 = vrsqrt.f32 %v690_v37  ;;  %v719_v56 = vmul.f32 %v1147_v50, %v705_v54 }
 0x44a   :  { %v694_v26 = vadd.f32 1e-05, %v686_v39  ;;  %v692_v41 = vadd.f32 1e-05, %v684_v40  ;;  %v1332_v0 = vpop.eup %1331 }
 0x44b   :  { %v680_v44 = vpop.xlane.xlu1 %679  ;;  %v707_v51 = vmul.f32 %v1332_v0, %v1669_v22  ;;  %v733_v22 = vadd.f32 %v1148_v20, %v719_v56 }
 0x44c   :  { %1339 = vrsqrt.f32 %v694_v26  ;;  %v688_v42 = vmul.f32 0.015625, %v680_v44 }
 0x44d   :  { %1341 = vrsqrt.f32 %v692_v41  ;;  %v721_v60 = vmul.f32 %v1147_v50, %v707_v51 }
 0x44e   :  { %v1334_v47 = vpop.eup %1333  ;;  %v696_v48 = vadd.f32 1e-05, %v688_v42 }
 0x44f   :  { %v709_v52 = vmul.f32 %v1334_v47, %v1674_v1  ;;  %v735_v13 = vadd.f32 %v1148_v20, %v721_v60 }
 0x450   :  { %1343 = vrsqrt.f32 %v696_v48 }
 0x451   :  { %v723_v55 = vmul.f32 %v1147_v50, %v709_v52 }
 0x452   :  { %v1336_v57 = vpop.eup %1335 }
 0x453   :  { %v737_v62 = vadd.f32 %v1148_v20, %v723_v55  ;;  %v711_v12 = vmul.f32 %v1336_v57, %v1681_v17  ;;  %v1338_v2 = vpop.eup %1337 }
 0x454   :  { %v706_v11 = vmul.f32 %v1338_v2, %v1679_v53 }
 0x455   :  { %v725_v5 = vmul.f32 %v1147_v50, %v711_v12  ;;  %v741_v25 = vcombine.low %v733_v22, %v737_v62  ;;  %v742_v45 = vcombine.high %v733_v22, %v737_v62 }
 0x456   :  { %v1340_v3 = vpop.eup %1339  ;;  %v720_v29 = vmul.f32 %v1147_v50, %v706_v11 }
 0x457   :  { %v1342_v1 = vpop.eup %1341  ;;  %v710_v10 = vmul.f32 %v1340_v3, %v1688_v63  ;;  %v739_v33 = vadd.f32 %v1148_v20, %v725_v5  ;;  %v749_v31 = vrot.slane %v741_v25, %v748_v6 }
 0x458   :  { %v708_v18 = vmul.f32 %v1342_v1, %v1690_v30  ;;  %v756_v30 = vrot.slane %v742_v45, %v748_v6  ;;  %v734_v38 = vadd.f32 %v1148_v20, %v720_v29 }
 0x459   :  { %v724_v14 = vmul.f32 %v1147_v50, %v710_v10  ;;  %v757_v17 = vcombine.low %v735_v13, %v739_v33  ;;  %v758_v34 = vcombine.high %v735_v13, %v739_v33  ;;  %v893_v33 = vld [vmem:[%s1857_s11] sm:$0x3] }
 0x45a   :  { %v1344_v21 = vpop.eup %1343  ;;  %v722_v27 = vmul.f32 %v1147_v50, %v708_v18  ;;  %v901_v18 = vsub.s32 1, %v1417_v4  ;;  %v898_v25 = vrot.slane %v893_v33, %v1421_v8 }
 0x45b   :  { %v712_v28 = vmul.f32 %v1344_v21, %v1698_v15  ;;  %v765_v61 = vrot.slane %v757_v17, %v748_v6  ;;  %v772_v63 = vrot.slane %v758_v34, %v748_v6  ;;  %v738_v53 = vadd.f32 %v1148_v20, %v724_v14 }
 0x45c   :  { %v736_v36 = vadd.f32 %v1148_v20, %v722_v27  ;;  %v902_v21 = vrot.slane %v893_v33, %v901_v18 }
 0x45d   :  { %v726_v32 = vmul.f32 %v1147_v50, %v712_v28  ;;  %v773_v35 = vcombine.low %v749_v31, %v765_v61  ;;  %v774_v46 = vcombine.high %v749_v31, %v765_v61  ;;  %v789_v40 = vcombine.low %v756_v30, %v772_v63 }
 0x45e   :  { %v809_v43 = vcombine.low %v734_v38, %v738_v53  ;;  %v790_v15 = vcombine.high %v756_v30, %v772_v63  ;;  %v810_v52 = vcombine.high %v734_v38, %v738_v53 }
 0x45f   :  { %v740_v37 = vadd.f32 %v1148_v20, %v726_v32  ;;  %v781_v7 = vrot.slane %v773_v35, %v780_v24  ;;  %v788_v39 = vrot.slane %v774_v46, %v780_v24  ;;  %v797_v42 = vrot.slane %v789_v40, %v780_v24 }
 0x460   :  { %v817_v54 = vrot.slane %v809_v43, %v748_v6  ;;  %v804_v48 = vrot.slane %v790_v15, %v780_v24  ;;  %v824_v59 = vrot.slane %v810_v52, %v748_v6 }
 0x461   :  { %v825_v26 = vcombine.low %v736_v36, %v740_v37  ;;  %v805_v41 = vcombine.high %v781_v7, %v1346_v19  ;;  %v806_v0 = vcombine.high %v788_v39, %v1346_v19  ;;  %v807_v49 = vcombine.high %v797_v42, %v1346_v19 }
 0x462   :  { %v826_v51 = vcombine.high %v736_v36, %v740_v37  ;;  %v808_v55 = vcombine.high %v804_v48, %v1346_v19 }
 0x463   :  { %v921_v44 = vcombine.low %v781_v7, %v805_v41  ;;  %v833_v47 = vrot.slane %v825_v26, %v748_v6  ;;  %v922_v16 = vcombine.low %v788_v39, %v806_v0  ;;  %v923_v56 = vcombine.low %v797_v42, %v807_v49 }
 0x464   :  { %v840_v58 = vrot.slane %v826_v51, %v748_v6  ;;  %v924_v20 = vcombine.low %v804_v48, %v808_v55 }
 0x465   :  { %1149 = vmatmul.mubr.msk.f32.vlgmr.msra.gmra.mrb[0].mxu0 %vm105_vm0, %v921_v44  ;;  %v841_v50 = vcombine.low %v817_v54, %v833_v47  ;;  %v842_v9 = vcombine.high %v817_v54, %v833_v47 }
 0x466   :  { %1015 = vmatprep.mubr.f32.mxu0 %v1346_v19  ;;  %v857_v12 = vcombine.low %v824_v59, %v840_v58  ;;  %v858_v5 = vcombine.high %v824_v59, %v840_v58 }
 0x467   :  { %v849_v57 = vrot.slane %v841_v50, %v780_v24  ;;  %v856_v62 = vrot.slane %v842_v9, %v780_v24 }
 0x468   :  { %v865_v22 = vrot.slane %v857_v12, %v780_v24  ;;  %v872_v23 = vrot.slane %v858_v5, %v780_v24 }
 0x469   :  { %1150 = vmatmul.mubr.msk.f32.gmra.mrb[2].mxu0 %vm105_vm0, %v922_v16  ;;  %v873_v60 = vcombine.high %v849_v57, %v1346_v19  ;;  %v874_v3 = vcombine.high %v856_v62, %v1346_v19 }
 0x46a   :  { %1021 = vmatprep.mubr.f32.mxu0 %v1346_v19  ;;  %v875_v6 = vcombine.high %v865_v22, %v1346_v19  ;;  %v876_v10 = vcombine.high %v872_v23, %v1346_v19 }
 0x46b   :  { %v925_v2 = vcombine.low %v849_v57, %v873_v60  ;;  %v926_v1 = vcombine.low %v856_v62, %v874_v3 }
 0x46c   :  { %v927_v13 = vcombine.low %v865_v22, %v875_v6  ;;  %v928_v11 = vcombine.low %v872_v23, %v876_v10 }
 0x46d   :  { %1151 = vmatmul.mubr.msk.f32.gmra.mrb[4].mxu0 %vm105_vm0, %v923_v56 }
 0x46e   :  { %1027 = vmatprep.mubr.f32.mxu0 %v1346_v19 }
 0x471   :  { %1152 = vmatmul.mubr.msk.f32.gmra.mrb[6].mxu0 %vm105_vm0, %v924_v20 }
 0x472   :  { %1033 = vmatprep.mubr.f32.mxu0 %v1346_v19 }
 0x475   :  { %1153 = vmatmul.mubr.msk.f32.gmra.mrb[8].mxu0 %vm105_vm0, %v925_v2 }
 0x476   :  { %1039 = vmatprep.mubr.f32.mxu0 %v1346_v19 }
 0x479   :  { %1154 = vmatmul.mubr.msk.f32.gmra.mrb[10].mxu0 %vm105_vm0, %v926_v1 }
 0x47a   :  { %1045 = vmatprep.mubr.f32.mxu0 %v1346_v19 }
 0x47d   :  { %1155 = vmatmul.mubr.msk.f32.gmra.mrb[12].mxu0 %vm105_vm0, %v927_v13 }
 0x47e   :  { %1051 = vmatprep.mubr.f32.mxu0 %v1346_v19 }
 0x481   :  { %1156 = vmatmul.mubr.msk.f32.gmra.mrb[14].mxu0 %vm105_vm0, %v928_v11 }
 0x538   :  { %v1011_v14 = vpop.f32.mrb[0].mxu0 }
 0x539   :  { %v1012_v17 = vadd.f32 %v1011_v14, %v898_v25  ;;  %v1013_v45 = vpop.f32.mrb[1].mxu0 }
 0x53a   :  { %v1014_v34 = vadd.f32 %v1013_v45, %v902_v21 }
 0x53c   :  { %v1074_v24 = vcombine.low %v1012_v17, %v1014_v34  ;;  %v1075_v27 = vcombine.high %v1012_v17, %v1014_v34  ;;  %v1017_v28 = vpop.f32.mrb[2].mxu0 }
 0x53d   :  { %v1018_v19 = vadd.f32 %v1017_v28, %v898_v25  ;;  %v1019_v29 = vpop.f32.mrb[3].mxu0 }
 0x53e   :  { %1106 = vst [vmem:[%s1858_s12] sm:$0xff] %v1074_v24  ;;  %1107 = vst [vmem:[%s1858_s12 + $0x8] sm:$0xff] %v1075_v27  ;;  %v1020_v4 = vadd.f32 %v1019_v29, %v902_v21 }
 0x540   :  { %v1076_v8 = vcombine.low %v1018_v19, %v1020_v4  ;;  %v1077_v31 = vcombine.high %v1018_v19, %v1020_v4  ;;  %v1023_v61 = vpop.f32.mrb[4].mxu0 }
 0x541   :  { %v1024_v63 = vadd.f32 %v1023_v61, %v898_v25  ;;  %v1025_v32 = vpop.f32.mrb[5].mxu0 }
 0x542   :  { %1108 = vst [vmem:[%s1858_s12 + $0x10] sm:$0xff] %v1076_v8  ;;  %1109 = vst [vmem:[%s1858_s12 + $0x18] sm:$0xff] %v1077_v31  ;;  %v1026_v53 = vadd.f32 %v1025_v32, %v902_v21 }
 0x544   :  { %v1078_v35 = vcombine.low %v1024_v63, %v1026_v53  ;;  %v1079_v46 = vcombine.high %v1024_v63, %v1026_v53  ;;  %v1029_v30 = vpop.f32.mrb[6].mxu0 }
 0x545   :  { %v1030_v36 = vadd.f32 %v1029_v30, %v898_v25  ;;  %v1031_v37 = vpop.f32.mrb[7].mxu0 }
 0x546   :  { %1110 = vst [vmem:[%s1858_s12 + $0x20] sm:$0xff] %v1078_v35  ;;  %1111 = vst [vmem:[%s1858_s12 + $0x28] sm:$0xff] %v1079_v46  ;;  %v1032_v38 = vadd.f32 %v1031_v37, %v902_v21 }
 0x548   :  { %v1080_v7 = vcombine.low %v1030_v36, %v1032_v38  ;;  %v1081_v39 = vcombine.high %v1030_v36, %v1032_v38  ;;  %v1035_v40 = vpop.f32.mrb[8].mxu0 }
 0x549   :  { %v1036_v26 = vadd.f32 %v1035_v40, %v898_v25  ;;  %v1037_v41 = vpop.f32.mrb[9].mxu0 }
 0x54a   :  { %1112 = vst [vmem:[%s1858_s12 + $0x30] sm:$0xff] %v1080_v7  ;;  %1113 = vst [vmem:[%s1858_s12 + $0x38] sm:$0xff] %v1081_v39  ;;  %v1038_v43 = vadd.f32 %v1037_v41, %v902_v21 }
 0x54c   :  { %v1082_v15 = vcombine.low %v1036_v26, %v1038_v43  ;;  %v1083_v44 = vcombine.high %v1036_v26, %v1038_v43  ;;  %v1041_v0 = vpop.f32.mrb[10].mxu0 }
 0x54d   :  { %v1042_v42 = vadd.f32 %v1041_v0, %v898_v25  ;;  %v1043_v47 = vpop.f32.mrb[11].mxu0 }
 0x54e   :  { %1114 = vst [vmem:[%s1858_s12 + $0x40] sm:$0xff] %v1082_v15  ;;  %1115 = vst [vmem:[%s1858_s12 + $0x48] sm:$0xff] %v1083_v44  ;;  %v1044_v54 = vadd.f32 %v1043_v47, %v902_v21 }
 0x550   :  { %v1084_v48 = vcombine.low %v1042_v42, %v1044_v54  ;;  %v1085_v16 = vcombine.high %v1042_v42, %v1044_v54  ;;  %v1047_v49 = vpop.f32.mrb[12].mxu0 }
 0x551   :  { %v1048_v50 = vadd.f32 %v1047_v49, %v898_v25  ;;  %v1049_v51 = vpop.f32.mrb[13].mxu0 }
 0x552   :  { %1116 = vst [vmem:[%s1858_s12 + $0x50] sm:$0xff] %v1084_v48  ;;  %1117 = vst [vmem:[%s1858_s12 + $0x58] sm:$0xff] %v1085_v16  ;;  %v1050_v52 = vadd.f32 %v1049_v51, %v902_v21 }
 0x554   :  { %v1086_v55 = vcombine.low %v1048_v50, %v1050_v52  ;;  %v1087_v56 = vcombine.high %v1048_v50, %v1050_v52  ;;  %v1053_v57 = vpop.f32.mrb[14].mxu0 }
 0x555   :  { %v1054_v9 = vadd.f32 %v1053_v57, %v898_v25  ;;  %v1055_v58 = vpop.f32.mrb[15].mxu0 }
 0x556   :  { %1118 = vst [vmem:[%s1858_s12 + $0x60] sm:$0xff] %v1086_v55  ;;  %1119 = vst [vmem:[%s1858_s12 + $0x68] sm:$0xff] %v1087_v56  ;;  %v1056_v59 = vadd.f32 %v1055_v58, %v902_v21 }
 0x558   :  { %v1088_v20 = vcombine.low %v1054_v9, %v1056_v59  ;;  %v1089_v60 = vcombine.high %v1054_v9, %v1056_v59 }
 0x55a   :  { %1120 = vst [vmem:[%s1858_s12 + $0x70] sm:$0xff] %v1088_v20  ;;  %1121 = vst [vmem:[%s1858_s12 + $0x78] sm:$0xff] %v1089_v60 }

// kernel: last_query_forward.5
= control target key start
LH: loop header
LB: loop body
LE: loop exit
PB: predicated region body
PF: predicated region fallthrough
CT: control target
= control target key end

     0   :  { %vm22_vm0 = vcmask 519168   ;;  %v2561_v3 = vmov 0.0   ;;  %s2562_s17 = smov 64   ;;  %vm44_vm1 = vcmask 523264   ;;  %vm2049_vm2 = vcmask 1041409   ;;  %s3070_s1 = inlined_call_operand.vmem [shape: f32[64,256], index: 1, kind: input, shape index: {}]   ;;  %s3071_s0 = inlined_call_operand.vmem [shape: f32[16,4,256], index: 0, kind: input, shape index: {}]   ;;  %s3072_s2 = inlined_call_operand.vmem [shape: f32[1,64], index: 2, kind: input, shape index: {}]   ;;  %s3073_s3 = inlined_call_operand.<no memory space> [shape: f32[1,1], index: 3, kind: input, shape index: {}]   ;;  %s3074_s4 = inlined_call_operand.vmem [shape: f32[16,4], index: 4, kind: output, shape index: {}]  }
   0x1   :  { %v28_v0 = vld [vmem:[%s3070_s1 + $0x8] sm:$0xff]  ;;  %v30_v1 = vld [vmem:[%s3070_s1 + $0x18] sm:$0xff]  ;;  %v27_v2 = vld [vmem:[%s3070_s1] sm:$0xff]  ;;  %112 = vmatprep.mubr.f32.mxu0 %v2561_v3  ;;  %23 = vst.msk [vmem:[#allocation2] sm:$0xf] %vm22_vm0, %v2561_v3  ;;  %230 = vmatprep.mubr.f32.mxu1 %v2561_v3  ;;  %vm2051_vm3 = vcmask 1042434  }
   0x2   :  { %24 = vst.msk [vmem:[#allocation3] sm:$0xf] %vm22_vm0, %v2561_v3  ;;  %v2603_v4 = vpack.c.bf16 %v30_v1, %v28_v0  ;;  %v29_v5 = vld [vmem:[%s3070_s1 + $0x10] sm:$0xff]  ;;  %v32_v6 = vld [vmem:[%s3070_s1 + $0x28] sm:$0xff]  ;;  %v34_v7 = vld [vmem:[%s3070_s1 + $0x38] sm:$0xff]  ;;  %vm2053_vm4 = vcmask 1043459  }
   0x3   :  { %v2614_v8 = vpack.c.bf16 %v29_v5, %v27_v2  ;;  %v2616_v9 = vpack.c.bf16 %v34_v7, %v32_v6  ;;  %v31_v10 = vld [vmem:[%s3070_s1 + $0x20] sm:$0xff]  ;;  %v33_v11 = vld [vmem:[%s3070_s1 + $0x30] sm:$0xff]  ;;  %v36_v12 = vld [vmem:[%s3070_s1 + $0x48] sm:$0xff]  ;;  %vm2055_vm5 = vcmask 1044484   ;;  %vm2057_vm6 = vcmask 1045509  }
   0x4   :  { %2112 = vmatprep.subr.bf16.mxu0 %v2603_v4  ;;  %v38_v13 = vld [vmem:[%s3070_s1 + $0x58] sm:$0xff]  ;;  %2128 = vmatprep.subr.bf16.mxu1 %v2603_v4  ;;  %v2633_v14 = vpack.c.bf16 %v33_v11, %v31_v10  ;;  %v35_v16 = vld [vmem:[%s3070_s1 + $0x40] sm:$0xff]  ;;  %v37_v17 = vld [vmem:[%s3070_s1 + $0x50] sm:$0xff]  ;;  %vm2061_vm7 = vcmask 1047559   ;;  %vm2059_vm8 = vcmask 1046534   ;;  %vm2072_vm9 = vcmask 31744  }
   0x5   :  { %2114 = vmatpush1.bf16.msra.mxu0 %v2614_v8  ;;  %2130 = vmatpush1.bf16.msra.mxu1 %v2614_v8  ;;  %v2637_v15 = vpack.c.bf16 %v38_v13, %v36_v12  ;;  %v40_v18 = vld [vmem:[%s3070_s1 + $0x68] sm:$0xff]  ;;  %v42_v19 = vld [vmem:[%s3070_s1 + $0x78] sm:$0xff]  ;;  %v2653_v21 = vpack.c.bf16 %v37_v17, %v35_v16  ;;  %v39_v23 = vld [vmem:[%s3070_s1 + $0x60] sm:$0xff] }
   0x6   :  { %2116 = vmatprep.subr.bf16.mxu0 %v2616_v9  ;;  %2132 = vmatprep.subr.bf16.mxu1 %v2616_v9  ;;  %v2657_v22 = vpack.c.bf16 %v42_v19, %v40_v18  ;;  %v41_v24 = vld [vmem:[%s3070_s1 + $0x70] sm:$0xff]  ;;  %v43_v28 = vld [vmem:[%s3071_s0] sm:$0xff]  ;;  %v2080_v55 = vld [vmem:[%s3071_s0 + $0x8] sm:$0xff] }
   0x7   :  { %v2668_v25 = vpack.c.bf16 %v41_v24, %v39_v23 }
   0x8   :  { %v25_v26 = vld [vmem:[#allocation2] sm:$0xf] }
   0x9   :  { %v26_v20 = vld [vmem:[#allocation3] sm:$0xf]  ;;  %2118 = vmatpush1.bf16.msra.mxu0 %v2633_v14  ;;  %2134 = vmatpush1.bf16.msra.mxu1 %v2633_v14 }
   0xa   :  { %145 = vrot.lane.b32.xlu0 %v26_v20, %s2562_s17  ;;  %2120 = vmatprep.subr.bf16.mxu0 %v2637_v15 }
   0xb   :  { %2136 = vmatprep.subr.bf16.mxu1 %v2637_v15 }
   0xd   :  { %2122 = vmatpush1.bf16.msra.mxu0 %v2653_v21  ;;  %2138 = vmatpush1.bf16.msra.mxu1 %v2653_v21 }
   0xe   :  { %2124 = vmatprep.subr.bf16.mxu0 %v2657_v22  ;;  %2140 = vmatprep.subr.bf16.mxu1 %v2657_v22 }
  0x11   :  { %2126 = vmatpush1.bf16.msra.mxu0 %v2668_v25  ;;  %2142 = vmatpush1.bf16.msra.mxu1 %v2668_v25 }
  0x12   :  { %2144 = vmatprep.subr.bf16.mxu0 %v2603_v4  ;;  %2160 = vmatprep.subr.bf16.mxu1 %v2603_v4 }
  0x14   :  { %2079 = vmatmul.mubr.msk.f32.vlgmr.msra.gmra.mrb[0].mxu0 %vm44_vm1, %v25_v26  ;;  %v2082_v26 = vld [vmem:[%s3071_s0 + $0x10] sm:$0xff] }
  0x15   :  { %2146 = vmatpush1.bf16.msra.mxu0 %v2614_v8  ;;  %344 = vmatprep.mubr.f32.mxu0 %v2561_v3 }
  0x16   :  { %2148 = vmatprep.subr.bf16.mxu0 %v2616_v9 }
  0x19   :  { %2150 = vmatpush1.bf16.msra.mxu0 %v2633_v14 }
  0x1a   :  { %2152 = vmatprep.subr.bf16.mxu0 %v2637_v15 }
  0x1d   :  { %2154 = vmatpush1.bf16.msra.mxu0 %v2653_v21 }
  0x1e   :  { %2156 = vmatprep.subr.bf16.mxu0 %v2657_v22 }
  0x21   :  { %2158 = vmatpush1.bf16.msra.mxu0 %v2668_v25 }
  0x22   :  { %2176 = vmatprep.subr.bf16.mxu0 %v2603_v4 }
  0x7c   :  { %v146_v40 = vpop.permute.xlu0 %145 }
  0xe7   :  { %v114_v27 = vpop.f32.mrb[0].mxu0 }
  0xe8   :  { %v116_v29 = vpop.f32.mrb[1].mxu0 }
  0xe9   :  { %v121_v30 = vcombine.low %v114_v27, %v116_v29 }
  0xeb   :  { %v123_v31 = vadd.f32 %v121_v30, %v43_v28 }
  0xed   :  { %v124_v32 = vsub.f32 0.0, %v123_v31  ;;  %134 = vrot.lane.b32.xlu1 %v123_v31, %s2562_s17  ;;  %v131_v34 = vrot.slane %v123_v31, 4 }
  0xef   :  { %v125_v33 = vmul.f32 1.442695, %v124_v32 }
  0xf1   :  { %2369 = vpow2.f32 %v125_v33 }
  0xf2   :  { %2371 = vtanh.f32 %v131_v34 }
  0xfb   :  { %v2370_v35 = vpop.eup %2369 }
  0xfc   :  { %v127_v36 = vadd.f32 1.0, %v2370_v35  ;;  %v2372_v37 = vpop.eup %2371 }
  0xfe   :  { %2373 = vrcp.f32 %v127_v36 }
 0x108   :  { %v2374_v38 = vpop.eup %2373 }
 0x109   :  { %v149_v39 = vmul.f32 %v2374_v38, %v2372_v37  ;;  %v148_v41 = vmul.f32 %v2374_v38, %v146_v40 }
 0x10b   :  { %151 = vrot.lane.b32.xlu0 %v149_v39, %s2562_s17 }
 0x15f   :  { %v135_v45 = vpop.permute.xlu1 %134 }
 0x160   :  { %v136_v46 = vrot.slane %v135_v45, 4 }
 0x162   :  { %v138_v47 = vsub.f32 0.0, %v136_v46 }
 0x164   :  { %v139_v48 = vmul.f32 1.442695, %v138_v47 }
 0x17d   :  { %v152_v42 = vpop.permute.xlu0 %151 }
 0x17e   :  { %v154_v43 = vadd.f32 %v152_v42, %v148_v41 }
 0x180   :  { %2375 = vtanh.f32 %v154_v43 }
 0x181   :  { %2377 = vpow2.f32 %v139_v48 }
 0x18a   :  { %v2376_v44 = vpop.eup %2375 }
 0x18b   :  { %157 = vrot.lane.b32.xlu1 %v2376_v44, %s2562_s17  ;;  %v2378_v49 = vpop.eup %2377 }
 0x18c   :  { %v141_v50 = vadd.f32 1.0, %v2378_v49 }
 0x18e   :  { %2379 = vrcp.f32 %v141_v50 }
 0x198   :  { %v2380_v51 = vpop.eup %2379 }
 0x1fd   :  { %v158_v52 = vpop.permute.xlu1 %157 }
 0x1fe   :  { %v2693_v53 = vmul.f32 %v2380_v51, %v158_v52  ;;  %v2084_v52 = vld [vmem:[%s3071_s0 + $0x18] sm:$0xff] }
 0x200   :  { %2081 = vmatmul.mubr.msk.f32.vlgmr.msra.gmra.mrb[0].mxu1 %vm44_vm1, %v2693_v53 }
 0x201   :  { %2162 = vmatpush1.bf16.msra.mxu1 %v2614_v8  ;;  %458 = vmatprep.mubr.f32.mxu1 %v2561_v3 }
 0x202   :  { %2164 = vmatprep.subr.bf16.mxu1 %v2616_v9 }
 0x205   :  { %2166 = vmatpush1.bf16.msra.mxu1 %v2633_v14 }
 0x206   :  { %2168 = vmatprep.subr.bf16.mxu1 %v2637_v15 }
 0x209   :  { %2170 = vmatpush1.bf16.msra.mxu1 %v2653_v21 }
 0x20a   :  { %2172 = vmatprep.subr.bf16.mxu1 %v2657_v22 }
 0x20d   :  { %2174 = vmatpush1.bf16.msra.mxu1 %v2668_v25 }
 0x20e   :  { %2192 = vmatprep.subr.bf16.mxu1 %v2603_v4 }
 0x2d3   :  { %v232_v54 = vpop.f32.mrb[0].mxu1 }
 0x2d4   :  { %v234_v56 = vpop.f32.mrb[1].mxu1 }
 0x2d5   :  { %v239_v57 = vcombine.low %v232_v54, %v234_v56 }
 0x2d7   :  { %v241_v58 = vadd.f32 %v2080_v55, %v239_v57 }
 0x2d9   :  { %v242_v59 = vsub.f32 0.0, %v241_v58  ;;  %252 = vrot.lane.b32.xlu1 %v241_v58, %s2562_s17  ;;  %v249_v61 = vrot.slane %v241_v58, 4 }
 0x2db   :  { %v243_v60 = vmul.f32 1.442695, %v242_v59 }
 0x2dd   :  { %2381 = vpow2.f32 %v243_v60 }
 0x2de   :  { %2383 = vtanh.f32 %v249_v61 }
 0x2e7   :  { %v2382_v62 = vpop.eup %2381 }
 0x2e8   :  { %v245_v63 = vadd.f32 1.0, %v2382_v62  ;;  %v2384_v0 = vpop.eup %2383 }
 0x2ea   :  { %2385 = vrcp.f32 %v245_v63 }
 0x2f4   :  { %v2386_v1 = vpop.eup %2385 }
 0x2f5   :  { %v263_v2 = vmul.f32 %v2386_v1, %v2384_v0  ;;  %v262_v5 = vmul.f32 %v2386_v1, %v154_v43 }
 0x2f7   :  { %265 = vrot.lane.b32.xlu0 %v263_v2, %s2562_s17 }
 0x34b   :  { %v253_v11 = vpop.permute.xlu1 %252 }
 0x34c   :  { %v254_v12 = vrot.slane %v253_v11, 4 }
 0x34e   :  { %v256_v13 = vsub.f32 0.0, %v254_v12 }
 0x350   :  { %v257_v16 = vmul.f32 1.442695, %v256_v13 }
 0x369   :  { %v266_v6 = vpop.permute.xlu0 %265 }
 0x36a   :  { %v268_v7 = vadd.f32 %v266_v6, %v262_v5 }
 0x36c   :  { %2387 = vtanh.f32 %v268_v7 }
 0x36d   :  { %2389 = vpow2.f32 %v257_v16 }
 0x376   :  { %v2388_v10 = vpop.eup %2387 }
 0x377   :  { %271 = vrot.lane.b32.xlu0 %v2388_v10, %s2562_s17  ;;  %v2390_v17 = vpop.eup %2389 }
 0x378   :  { %v259_v18 = vadd.f32 1.0, %v2390_v17 }
 0x37a   :  { %2391 = vrcp.f32 %v259_v18 }
 0x384   :  { %v2392_v19 = vpop.eup %2391 }
 0x3e9   :  { %v272_v20 = vpop.permute.xlu0 %271 }
 0x3ea   :  { %v2712_v23 = vmul.f32 %v2392_v19, %v272_v20 }
 0x3ec   :  { %2083 = vmatmul.mubr.msk.f32.vlgmr.msra.gmra.mrb[2].mxu0 %vm44_vm1, %v2712_v23 }
 0x3ed   :  { %2178 = vmatpush1.bf16.msra.mxu0 %v2614_v8  ;;  %572 = vmatprep.mubr.f32.mxu0 %v2561_v3 }
 0x3ee   :  { %2180 = vmatprep.subr.bf16.mxu0 %v2616_v9 }
 0x3f1   :  { %2182 = vmatpush1.bf16.msra.mxu0 %v2633_v14 }
 0x3f2   :  { %2184 = vmatprep.subr.bf16.mxu0 %v2637_v15 }
 0x3f5   :  { %2186 = vmatpush1.bf16.msra.mxu0 %v2653_v21 }
 0x3f6   :  { %2188 = vmatprep.subr.bf16.mxu0 %v2657_v22 }
 0x3f9   :  { %2190 = vmatpush1.bf16.msra.mxu0 %v2668_v25 }
 0x3fa   :  { %2208 = vmatprep.subr.bf16.mxu0 %v2603_v4 }
 0x4bf   :  { %v346_v24 = vpop.f32.mrb[2].mxu0 }
 0x4c0   :  { %v348_v27 = vpop.f32.mrb[3].mxu0 }
 0x4c1   :  { %v353_v28 = vcombine.low %v346_v24, %v348_v27  ;;  %v2086_v24 = vld [vmem:[%s3071_s0 + $0x20] sm:$0xff] }
 0x4c3   :  { %v355_v29 = vadd.f32 %v2082_v26, %v353_v28 }
 0x4c5   :  { %v356_v30 = vsub.f32 0.0, %v355_v29  ;;  %366 = vrot.lane.b32.xlu0 %v355_v29, %s2562_s17  ;;  %v363_v32 = vrot.slane %v355_v29, 4 }
 0x4c7   :  { %v357_v31 = vmul.f32 1.442695, %v356_v30 }
 0x4c9   :  { %2393 = vpow2.f32 %v357_v31 }
 0x4ca   :  { %2395 = vtanh.f32 %v363_v32 }
 0x4d3   :  { %v2394_v33 = vpop.eup %2393 }
 0x4d4   :  { %v359_v34 = vadd.f32 1.0, %v2394_v33  ;;  %v2396_v35 = vpop.eup %2395 }
 0x4d6   :  { %2397 = vrcp.f32 %v359_v34 }
 0x4e0   :  { %v2398_v36 = vpop.eup %2397 }
 0x4e1   :  { %v377_v37 = vmul.f32 %v2398_v36, %v2396_v35  ;;  %v376_v38 = vmul.f32 %v2398_v36, %v268_v7 }
 0x4e3   :  { %379 = vrot.lane.b32.xlu1 %v377_v37, %s2562_s17 }
 0x537   :  { %v367_v42 = vpop.permute.xlu0 %366 }
 0x538   :  { %v368_v43 = vrot.slane %v367_v42, 4 }
 0x53a   :  { %v370_v44 = vsub.f32 0.0, %v368_v43 }
 0x53c   :  { %v371_v45 = vmul.f32 1.442695, %v370_v44 }
 0x555   :  { %v380_v39 = vpop.permute.xlu1 %379 }
 0x556   :  { %v382_v40 = vadd.f32 %v380_v39, %v376_v38 }
 0x558   :  { %2399 = vtanh.f32 %v382_v40 }
 0x559   :  { %2401 = vpow2.f32 %v371_v45 }
 0x562   :  { %v2400_v41 = vpop.eup %2399 }
 0x563   :  { %385 = vrot.lane.b32.xlu1 %v2400_v41, %s2562_s17  ;;  %v2402_v46 = vpop.eup %2401 }
 0x564   :  { %v373_v47 = vadd.f32 1.0, %v2402_v46 }
 0x566   :  { %2403 = vrcp.f32 %v373_v47 }
 0x570   :  { %v2404_v48 = vpop.eup %2403 }
 0x5d5   :  { %v386_v49 = vpop.permute.xlu1 %385 }
 0x5d6   :  { %v2731_v50 = vmul.f32 %v2404_v48, %v386_v49 }
 0x5d8   :  { %2085 = vmatmul.mubr.msk.f32.vlgmr.msra.gmra.mrb[2].mxu1 %vm44_vm1, %v2731_v50 }
 0x5d9   :  { %2194 = vmatpush1.bf16.msra.mxu1 %v2614_v8  ;;  %686 = vmatprep.mubr.f32.mxu1 %v2561_v3 }
 0x5da   :  { %2196 = vmatprep.subr.bf16.mxu1 %v2616_v9 }
 0x5dd   :  { %2198 = vmatpush1.bf16.msra.mxu1 %v2633_v14 }
 0x5de   :  { %2200 = vmatprep.subr.bf16.mxu1 %v2637_v15 }
 0x5e1   :  { %2202 = vmatpush1.bf16.msra.mxu1 %v2653_v21 }
 0x5e2   :  { %2204 = vmatprep.subr.bf16.mxu1 %v2657_v22 }
 0x5e5   :  { %2206 = vmatpush1.bf16.msra.mxu1 %v2668_v25 }
 0x5e6   :  { %2224 = vmatprep.subr.bf16.mxu1 %v2603_v4 }
 0x6ab   :  { %v460_v51 = vpop.f32.mrb[2].mxu1 }
 0x6ac   :  { %v462_v54 = vpop.f32.mrb[3].mxu1 }
 0x6ad   :  { %v467_v55 = vcombine.low %v460_v51, %v462_v54 }
 0x6af   :  { %v469_v56 = vadd.f32 %v2084_v52, %v467_v55  ;;  %v2088_v52 = vld [vmem:[%s3071_s0 + $0x28] sm:$0xff] }
 0x6b1   :  { %v470_v57 = vsub.f32 0.0, %v469_v56  ;;  %480 = vrot.lane.b32.xlu1 %v469_v56, %s2562_s17  ;;  %v477_v59 = vrot.slane %v469_v56, 4 }
 0x6b3   :  { %v471_v58 = vmul.f32 1.442695, %v470_v57 }
 0x6b5   :  { %2405 = vpow2.f32 %v471_v58 }
 0x6b6   :  { %2407 = vtanh.f32 %v477_v59 }
 0x6bf   :  { %v2406_v60 = vpop.eup %2405 }
 0x6c0   :  { %v473_v61 = vadd.f32 1.0, %v2406_v60  ;;  %v2408_v62 = vpop.eup %2407 }
 0x6c2   :  { %2409 = vrcp.f32 %v473_v61 }
 0x6cc   :  { %v2410_v63 = vpop.eup %2409 }
 0x6cd   :  { %v491_v0 = vmul.f32 %v2410_v63, %v2408_v62  ;;  %v490_v1 = vmul.f32 %v2410_v63, %v382_v40 }
 0x6cf   :  { %493 = vrot.lane.b32.xlu0 %v491_v0, %s2562_s17 }
 0x723   :  { %v481_v7 = vpop.permute.xlu1 %480 }
 0x724   :  { %v482_v10 = vrot.slane %v481_v7, 4 }
 0x726   :  { %v484_v11 = vsub.f32 0.0, %v482_v10 }
 0x728   :  { %v485_v12 = vmul.f32 1.442695, %v484_v11 }
 0x741   :  { %v494_v2 = vpop.permute.xlu0 %493 }
 0x742   :  { %v496_v5 = vadd.f32 %v494_v2, %v490_v1 }
 0x744   :  { %2411 = vtanh.f32 %v496_v5 }
 0x745   :  { %2413 = vpow2.f32 %v485_v12 }
 0x74e   :  { %v2412_v6 = vpop.eup %2411 }
 0x74f   :  { %499 = vrot.lane.b32.xlu0 %v2412_v6, %s2562_s17  ;;  %v2414_v13 = vpop.eup %2413 }
 0x750   :  { %v487_v16 = vadd.f32 1.0, %v2414_v13 }
 0x752   :  { %2415 = vrcp.f32 %v487_v16 }
 0x75c   :  { %v2416_v17 = vpop.eup %2415 }
 0x7c1   :  { %v500_v18 = vpop.permute.xlu0 %499 }
 0x7c2   :  { %v2750_v19 = vmul.f32 %v2416_v17, %v500_v18 }
 0x7c4   :  { %2087 = vmatmul.mubr.msk.f32.vlgmr.msra.gmra.mrb[4].mxu0 %vm44_vm1, %v2750_v19 }
 0x7c5   :  { %2210 = vmatpush1.bf16.msra.mxu0 %v2614_v8  ;;  %800 = vmatprep.mubr.f32.mxu0 %v2561_v3 }
 0x7c6   :  { %2212 = vmatprep.subr.bf16.mxu0 %v2616_v9 }
 0x7c9   :  { %2214 = vmatpush1.bf16.msra.mxu0 %v2633_v14 }
 0x7ca   :  { %2216 = vmatprep.subr.bf16.mxu0 %v2637_v15 }
 0x7cd   :  { %2218 = vmatpush1.bf16.msra.mxu0 %v2653_v21 }
 0x7ce   :  { %2220 = vmatprep.subr.bf16.mxu0 %v2657_v22 }
 0x7d1   :  { %2222 = vmatpush1.bf16.msra.mxu0 %v2668_v25 }
 0x7d2   :  { %2240 = vmatprep.subr.bf16.mxu0 %v2603_v4 }
 0x897   :  { %v574_v20 = vpop.f32.mrb[4].mxu0 }
 0x898   :  { %v576_v26 = vpop.f32.mrb[5].mxu0 }
 0x899   :  { %v581_v27 = vcombine.low %v574_v20, %v576_v26  ;;  %v2090_v26 = vld [vmem:[%s3071_s0 + $0x30] sm:$0xff] }
 0x89b   :  { %v583_v28 = vadd.f32 %v2086_v24, %v581_v27 }
 0x89d   :  { %v584_v29 = vsub.f32 0.0, %v583_v28  ;;  %594 = vrot.lane.b32.xlu0 %v583_v28, %s2562_s17  ;;  %v591_v31 = vrot.slane %v583_v28, 4 }
 0x89f   :  { %v585_v30 = vmul.f32 1.442695, %v584_v29 }
 0x8a1   :  { %2417 = vpow2.f32 %v585_v30 }
 0x8a2   :  { %2419 = vtanh.f32 %v591_v31 }
 0x8ab   :  { %v2418_v32 = vpop.eup %2417 }
 0x8ac   :  { %v587_v33 = vadd.f32 1.0, %v2418_v32  ;;  %v2420_v34 = vpop.eup %2419 }
 0x8ae   :  { %2421 = vrcp.f32 %v587_v33 }
 0x8b8   :  { %v2422_v35 = vpop.eup %2421 }
 0x8b9   :  { %v605_v36 = vmul.f32 %v2422_v35, %v2420_v34  ;;  %v604_v37 = vmul.f32 %v2422_v35, %v496_v5 }
 0x8bb   :  { %607 = vrot.lane.b32.xlu1 %v605_v36, %s2562_s17 }
 0x90f   :  { %v595_v41 = vpop.permute.xlu0 %594 }
 0x910   :  { %v596_v42 = vrot.slane %v595_v41, 4 }
 0x912   :  { %v598_v43 = vsub.f32 0.0, %v596_v42 }
 0x914   :  { %v599_v44 = vmul.f32 1.442695, %v598_v43 }
 0x92d   :  { %v608_v38 = vpop.permute.xlu1 %607 }
 0x92e   :  { %v610_v39 = vadd.f32 %v608_v38, %v604_v37 }
 0x930   :  { %2423 = vtanh.f32 %v610_v39 }
 0x931   :  { %2425 = vpow2.f32 %v599_v44 }
 0x93a   :  { %v2424_v40 = vpop.eup %2423 }
 0x93b   :  { %613 = vrot.lane.b32.xlu1 %v2424_v40, %s2562_s17  ;;  %v2426_v45 = vpop.eup %2425 }
 0x93c   :  { %v601_v46 = vadd.f32 1.0, %v2426_v45 }
 0x93e   :  { %2427 = vrcp.f32 %v601_v46 }
 0x948   :  { %v2428_v47 = vpop.eup %2427 }
 0x9ad   :  { %v614_v48 = vpop.permute.xlu1 %613 }
 0x9ae   :  { %v2769_v49 = vmul.f32 %v2428_v47, %v614_v48 }
 0x9b0   :  { %2089 = vmatmul.mubr.msk.f32.vlgmr.msra.gmra.mrb[4].mxu1 %vm44_vm1, %v2769_v49 }
 0x9b1   :  { %2226 = vmatpush1.bf16.msra.mxu1 %v2614_v8  ;;  %914 = vmatprep.mubr.f32.mxu1 %v2561_v3 }
 0x9b2   :  { %2228 = vmatprep.subr.bf16.mxu1 %v2616_v9 }
 0x9b5   :  { %2230 = vmatpush1.bf16.msra.mxu1 %v2633_v14 }
 0x9b6   :  { %2232 = vmatprep.subr.bf16.mxu1 %v2637_v15 }
 0x9b9   :  { %2234 = vmatpush1.bf16.msra.mxu1 %v2653_v21 }
 0x9ba   :  { %2236 = vmatprep.subr.bf16.mxu1 %v2657_v22 }
 0x9bd   :  { %2238 = vmatpush1.bf16.msra.mxu1 %v2668_v25 }
 0x9be   :  { %2256 = vmatprep.subr.bf16.mxu1 %v2603_v4 }
 0xa83   :  { %v688_v51 = vpop.f32.mrb[4].mxu1 }
 0xa84   :  { %v690_v54 = vpop.f32.mrb[5].mxu1 }
 0xa85   :  { %v695_v55 = vcombine.low %v688_v51, %v690_v54 }
 0xa87   :  { %v697_v56 = vadd.f32 %v2088_v52, %v695_v55  ;;  %v2092_v55 = vld [vmem:[%s3071_s0 + $0x38] sm:$0xff] }
 0xa89   :  { %v698_v57 = vsub.f32 0.0, %v697_v56  ;;  %708 = vrot.lane.b32.xlu1 %v697_v56, %s2562_s17  ;;  %v705_v59 = vrot.slane %v697_v56, 4 }
 0xa8b   :  { %v699_v58 = vmul.f32 1.442695, %v698_v57 }
 0xa8d   :  { %2429 = vpow2.f32 %v699_v58 }
 0xa8e   :  { %2431 = vtanh.f32 %v705_v59 }
 0xa97   :  { %v2430_v60 = vpop.eup %2429 }
 0xa98   :  { %v701_v61 = vadd.f32 1.0, %v2430_v60  ;;  %v2432_v62 = vpop.eup %2431 }
 0xa9a   :  { %2433 = vrcp.f32 %v701_v61 }
 0xaa4   :  { %v2434_v63 = vpop.eup %2433 }
 0xaa5   :  { %v719_v0 = vmul.f32 %v2434_v63, %v2432_v62  ;;  %v718_v1 = vmul.f32 %v2434_v63, %v610_v39 }
 0xaa7   :  { %721 = vrot.lane.b32.xlu0 %v719_v0, %s2562_s17 }
 0xafb   :  { %v709_v7 = vpop.permute.xlu1 %708 }
 0xafc   :  { %v710_v10 = vrot.slane %v709_v7, 4 }
 0xafe   :  { %v712_v11 = vsub.f32 0.0, %v710_v10 }
 0xb00   :  { %v713_v12 = vmul.f32 1.442695, %v712_v11 }
 0xb19   :  { %v722_v2 = vpop.permute.xlu0 %721 }
 0xb1a   :  { %v724_v5 = vadd.f32 %v722_v2, %v718_v1 }
 0xb1c   :  { %2435 = vtanh.f32 %v724_v5 }
 0xb1d   :  { %2437 = vpow2.f32 %v713_v12 }
 0xb26   :  { %v2436_v6 = vpop.eup %2435 }
 0xb27   :  { %727 = vrot.lane.b32.xlu0 %v2436_v6, %s2562_s17  ;;  %v2438_v13 = vpop.eup %2437 }
 0xb28   :  { %v715_v16 = vadd.f32 1.0, %v2438_v13 }
 0xb2a   :  { %2439 = vrcp.f32 %v715_v16 }
 0xb34   :  { %v2440_v17 = vpop.eup %2439 }
 0xb99   :  { %v728_v18 = vpop.permute.xlu0 %727 }
 0xb9a   :  { %v2788_v20 = vmul.f32 %v2440_v17, %v728_v18 }
 0xb9c   :  { %2091 = vmatmul.mubr.msk.f32.vlgmr.msra.gmra.mrb[6].mxu0 %vm44_vm1, %v2788_v20 }
 0xb9d   :  { %2242 = vmatpush1.bf16.msra.mxu0 %v2614_v8  ;;  %1028 = vmatprep.mubr.f32.mxu0 %v2561_v3 }
 0xb9e   :  { %2244 = vmatprep.subr.bf16.mxu0 %v2616_v9 }
 0xba1   :  { %2246 = vmatpush1.bf16.msra.mxu0 %v2633_v14 }
 0xba2   :  { %2248 = vmatprep.subr.bf16.mxu0 %v2637_v15 }
 0xba5   :  { %2250 = vmatpush1.bf16.msra.mxu0 %v2653_v21 }
 0xba6   :  { %2252 = vmatprep.subr.bf16.mxu0 %v2657_v22 }
 0xba9   :  { %2254 = vmatpush1.bf16.msra.mxu0 %v2668_v25 }
 0xbaa   :  { %2272 = vmatprep.subr.bf16.mxu0 %v2603_v4 }
 0xc6f   :  { %v802_v24 = vpop.f32.mrb[6].mxu0 }
 0xc70   :  { %v804_v27 = vpop.f32.mrb[7].mxu0 }
 0xc71   :  { %v809_v28 = vcombine.low %v802_v24, %v804_v27 }
 0xc73   :  { %v811_v29 = vadd.f32 %v2090_v26, %v809_v28 }
 0xc75   :  { %v812_v30 = vsub.f32 0.0, %v811_v29  ;;  %822 = vrot.lane.b32.xlu0 %v811_v29, %s2562_s17  ;;  %v819_v32 = vrot.slane %v811_v29, 4  ;;  %v2094_v29 = vld [vmem:[%s3071_s0 + $0x40] sm:$0xff] }
 0xc77   :  { %v813_v31 = vmul.f32 1.442695, %v812_v30 }
 0xc79   :  { %2441 = vpow2.f32 %v813_v31 }
 0xc7a   :  { %2443 = vtanh.f32 %v819_v32 }
 0xc83   :  { %v2442_v33 = vpop.eup %2441 }
 0xc84   :  { %v815_v34 = vadd.f32 1.0, %v2442_v33  ;;  %v2444_v35 = vpop.eup %2443 }
 0xc86   :  { %2445 = vrcp.f32 %v815_v34 }
 0xc90   :  { %v2446_v36 = vpop.eup %2445 }
 0xc91   :  { %v833_v37 = vmul.f32 %v2446_v36, %v2444_v35  ;;  %v832_v38 = vmul.f32 %v2446_v36, %v724_v5 }
 0xc93   :  { %835 = vrot.lane.b32.xlu1 %v833_v37, %s2562_s17 }
 0xce7   :  { %v823_v42 = vpop.permute.xlu0 %822 }
 0xce8   :  { %v824_v43 = vrot.slane %v823_v42, 4 }
 0xcea   :  { %v826_v44 = vsub.f32 0.0, %v824_v43 }
 0xcec   :  { %v827_v45 = vmul.f32 1.442695, %v826_v44 }
 0xd05   :  { %v836_v39 = vpop.permute.xlu1 %835 }
 0xd06   :  { %v838_v40 = vadd.f32 %v836_v39, %v832_v38 }
 0xd08   :  { %2447 = vtanh.f32 %v838_v40 }
 0xd09   :  { %2449 = vpow2.f32 %v827_v45 }
 0xd12   :  { %v2448_v41 = vpop.eup %2447 }
 0xd13   :  { %841 = vrot.lane.b32.xlu1 %v2448_v41, %s2562_s17  ;;  %v2450_v46 = vpop.eup %2449 }
 0xd14   :  { %v829_v47 = vadd.f32 1.0, %v2450_v46 }
 0xd16   :  { %2451 = vrcp.f32 %v829_v47 }
 0xd20   :  { %v2452_v48 = vpop.eup %2451 }
 0xd85   :  { %v842_v51 = vpop.permute.xlu1 %841 }
 0xd86   :  { %v2807_v52 = vmul.f32 %v2452_v48, %v842_v51 }
 0xd88   :  { %2093 = vmatmul.mubr.msk.f32.vlgmr.msra.gmra.mrb[6].mxu1 %vm44_vm1, %v2807_v52 }
 0xd89   :  { %2258 = vmatpush1.bf16.msra.mxu1 %v2614_v8  ;;  %1142 = vmatprep.mubr.f32.mxu1 %v2561_v3 }
 0xd8a   :  { %2260 = vmatprep.subr.bf16.mxu1 %v2616_v9 }
 0xd8d   :  { %2262 = vmatpush1.bf16.msra.mxu1 %v2633_v14 }
 0xd8e   :  { %2264 = vmatprep.subr.bf16.mxu1 %v2637_v15 }
 0xd91   :  { %2266 = vmatpush1.bf16.msra.mxu1 %v2653_v21 }
 0xd92   :  { %2268 = vmatprep.subr.bf16.mxu1 %v2657_v22 }
 0xd95   :  { %2270 = vmatpush1.bf16.msra.mxu1 %v2668_v25 }
 0xd96   :  { %2288 = vmatprep.subr.bf16.mxu1 %v2603_v4 }
 0xe5b   :  { %v916_v54 = vpop.f32.mrb[6].mxu1 }
 0xe5c   :  { %v918_v56 = vpop.f32.mrb[7].mxu1 }
 0xe5d   :  { %v923_v57 = vcombine.low %v916_v54, %v918_v56 }
 0xe5f   :  { %v925_v58 = vadd.f32 %v2092_v55, %v923_v57 }
 0xe61   :  { %v926_v59 = vsub.f32 0.0, %v925_v58  ;;  %936 = vrot.lane.b32.xlu1 %v925_v58, %s2562_s17  ;;  %v933_v61 = vrot.slane %v925_v58, 4 }
 0xe63   :  { %v927_v60 = vmul.f32 1.442695, %v926_v59  ;;  %v2096_v59 = vld [vmem:[%s3071_s0 + $0x48] sm:$0xff] }
 0xe65   :  { %2453 = vpow2.f32 %v927_v60 }
 0xe66   :  { %2455 = vtanh.f32 %v933_v61 }
 0xe6f   :  { %v2454_v62 = vpop.eup %2453 }
 0xe70   :  { %v929_v63 = vadd.f32 1.0, %v2454_v62  ;;  %v2456_v0 = vpop.eup %2455 }
 0xe72   :  { %2457 = vrcp.f32 %v929_v63 }
 0xe7c   :  { %v2458_v1 = vpop.eup %2457 }
 0xe7d   :  { %v947_v2 = vmul.f32 %v2458_v1, %v2456_v0  ;;  %v946_v5 = vmul.f32 %v2458_v1, %v838_v40 }
 0xe7f   :  { %949 = vrot.lane.b32.xlu0 %v947_v2, %s2562_s17 }
 0xed3   :  { %v937_v11 = vpop.permute.xlu1 %936 }
 0xed4   :  { %v938_v12 = vrot.slane %v937_v11, 4 }
 0xed6   :  { %v940_v13 = vsub.f32 0.0, %v938_v12 }
 0xed8   :  { %v941_v16 = vmul.f32 1.442695, %v940_v13 }
 0xef1   :  { %v950_v6 = vpop.permute.xlu0 %949 }
 0xef2   :  { %v952_v7 = vadd.f32 %v950_v6, %v946_v5 }
 0xef4   :  { %2459 = vtanh.f32 %v952_v7 }
 0xef5   :  { %2461 = vpow2.f32 %v941_v16 }
 0xefe   :  { %v2460_v10 = vpop.eup %2459 }
 0xeff   :  { %955 = vrot.lane.b32.xlu0 %v2460_v10, %s2562_s17  ;;  %v2462_v17 = vpop.eup %2461 }
 0xf00   :  { %v943_v18 = vadd.f32 1.0, %v2462_v17 }
 0xf02   :  { %2463 = vrcp.f32 %v943_v18 }
 0xf0c   :  { %v2464_v24 = vpop.eup %2463 }
 0xf71   :  { %v956_v26 = vpop.permute.xlu0 %955 }
 0xf72   :  { %v2826_v27 = vmul.f32 %v2464_v24, %v956_v26 }
 0xf74   :  { %2095 = vmatmul.mubr.msk.f32.vlgmr.msra.gmra.mrb[8].mxu0 %vm44_vm1, %v2826_v27 }
 0xf75   :  { %2274 = vmatpush1.bf16.msra.mxu0 %v2614_v8  ;;  %1256 = vmatprep.mubr.f32.mxu0 %v2561_v3 }
 0xf76   :  { %2276 = vmatprep.subr.bf16.mxu0 %v2616_v9 }
 0xf79   :  { %2278 = vmatpush1.bf16.msra.mxu0 %v2633_v14 }
 0xf7a   :  { %2280 = vmatprep.subr.bf16.mxu0 %v2637_v15 }
 0xf7d   :  { %2282 = vmatpush1.bf16.msra.mxu0 %v2653_v21 }
 0xf7e   :  { %2284 = vmatprep.subr.bf16.mxu0 %v2657_v22 }
 0xf81   :  { %2286 = vmatpush1.bf16.msra.mxu0 %v2668_v25 }
 0xf82   :  { %2304 = vmatprep.subr.bf16.mxu0 %v2603_v4 }
0x1047   :  { %v1030_v28 = vpop.f32.mrb[8].mxu0 }
0x1048   :  { %v1032_v30 = vpop.f32.mrb[9].mxu0 }
0x1049   :  { %v1037_v31 = vcombine.low %v1030_v28, %v1032_v30 }
0x104b   :  { %v1039_v32 = vadd.f32 %v2094_v29, %v1037_v31 }
0x104d   :  { %v1040_v33 = vsub.f32 0.0, %v1039_v32  ;;  %1050 = vrot.lane.b32.xlu0 %v1039_v32, %s2562_s17  ;;  %v1047_v35 = vrot.slane %v1039_v32, 4 }
0x104f   :  { %v1041_v34 = vmul.f32 1.442695, %v1040_v33 }
0x1051   :  { %2465 = vpow2.f32 %v1041_v34  ;;  %v2098_v34 = vld [vmem:[%s3071_s0 + $0x50] sm:$0xff] }
0x1052   :  { %2467 = vtanh.f32 %v1047_v35 }
0x105b   :  { %v2466_v36 = vpop.eup %2465 }
0x105c   :  { %v1043_v37 = vadd.f32 1.0, %v2466_v36  ;;  %v2468_v38 = vpop.eup %2467 }
0x105e   :  { %2469 = vrcp.f32 %v1043_v37 }
0x1068   :  { %v2470_v39 = vpop.eup %2469 }
0x1069   :  { %v1061_v40 = vmul.f32 %v2470_v39, %v2468_v38  ;;  %v1060_v41 = vmul.f32 %v2470_v39, %v952_v7 }
0x106b   :  { %1063 = vrot.lane.b32.xlu1 %v1061_v40, %s2562_s17 }
0x10bf   :  { %v1051_v45 = vpop.permute.xlu0 %1050 }
0x10c0   :  { %v1052_v46 = vrot.slane %v1051_v45, 4 }
0x10c2   :  { %v1054_v47 = vsub.f32 0.0, %v1052_v46 }
0x10c4   :  { %v1055_v48 = vmul.f32 1.442695, %v1054_v47 }
0x10dd   :  { %v1064_v42 = vpop.permute.xlu1 %1063 }
0x10de   :  { %v1066_v43 = vadd.f32 %v1064_v42, %v1060_v41 }
0x10e0   :  { %2471 = vtanh.f32 %v1066_v43 }
0x10e1   :  { %2473 = vpow2.f32 %v1055_v48 }
0x10ea   :  { %v2472_v44 = vpop.eup %2471 }
0x10eb   :  { %1069 = vrot.lane.b32.xlu1 %v2472_v44, %s2562_s17  ;;  %v2474_v51 = vpop.eup %2473 }
0x10ec   :  { %v1057_v54 = vadd.f32 1.0, %v2474_v51 }
0x10ee   :  { %2475 = vrcp.f32 %v1057_v54 }
0x10f8   :  { %v2476_v55 = vpop.eup %2475 }
0x115d   :  { %v1070_v56 = vpop.permute.xlu1 %1069 }
0x115e   :  { %v2845_v57 = vmul.f32 %v2476_v55, %v1070_v56 }
0x1160   :  { %2097 = vmatmul.mubr.msk.f32.vlgmr.msra.gmra.mrb[8].mxu1 %vm44_vm1, %v2845_v57 }
0x1161   :  { %2290 = vmatpush1.bf16.msra.mxu1 %v2614_v8  ;;  %1370 = vmatprep.mubr.f32.mxu1 %v2561_v3 }
0x1162   :  { %2292 = vmatprep.subr.bf16.mxu1 %v2616_v9 }
0x1165   :  { %2294 = vmatpush1.bf16.msra.mxu1 %v2633_v14 }
0x1166   :  { %2296 = vmatprep.subr.bf16.mxu1 %v2637_v15 }
0x1169   :  { %2298 = vmatpush1.bf16.msra.mxu1 %v2653_v21 }
0x116a   :  { %2300 = vmatprep.subr.bf16.mxu1 %v2657_v22 }
0x116d   :  { %2302 = vmatpush1.bf16.msra.mxu1 %v2668_v25 }
0x116e   :  { %2320 = vmatprep.subr.bf16.mxu1 %v2603_v4 }
0x1233   :  { %v1144_v58 = vpop.f32.mrb[8].mxu1 }
0x1234   :  { %v1146_v60 = vpop.f32.mrb[9].mxu1 }
0x1235   :  { %v1151_v61 = vcombine.low %v1144_v58, %v1146_v60 }
0x1237   :  { %v1153_v62 = vadd.f32 %v2096_v59, %v1151_v61 }
0x1239   :  { %v1154_v63 = vsub.f32 0.0, %v1153_v62  ;;  %1164 = vrot.lane.b32.xlu1 %v1153_v62, %s2562_s17  ;;  %v1161_v1 = vrot.slane %v1153_v62, 4 }
0x123b   :  { %v1155_v0 = vmul.f32 1.442695, %v1154_v63 }
0x123d   :  { %2477 = vpow2.f32 %v1155_v0 }
0x123e   :  { %2479 = vtanh.f32 %v1161_v1  ;;  %v2100_v1 = vld [vmem:[%s3071_s0 + $0x58] sm:$0xff] }
0x1247   :  { %v2478_v2 = vpop.eup %2477 }
0x1248   :  { %v1157_v5 = vadd.f32 1.0, %v2478_v2  ;;  %v2480_v6 = vpop.eup %2479 }
0x124a   :  { %2481 = vrcp.f32 %v1157_v5 }
0x1254   :  { %v2482_v7 = vpop.eup %2481 }
0x1255   :  { %v1175_v10 = vmul.f32 %v2482_v7, %v2480_v6  ;;  %v1174_v11 = vmul.f32 %v2482_v7, %v1066_v43 }
0x1257   :  { %1177 = vrot.lane.b32.xlu0 %v1175_v10, %s2562_s17 }
0x12ab   :  { %v1165_v17 = vpop.permute.xlu1 %1164 }
0x12ac   :  { %v1166_v18 = vrot.slane %v1165_v17, 4 }
0x12ae   :  { %v1168_v24 = vsub.f32 0.0, %v1166_v18 }
0x12b0   :  { %v1169_v26 = vmul.f32 1.442695, %v1168_v24 }
0x12c9   :  { %v1178_v12 = vpop.permute.xlu0 %1177 }
0x12ca   :  { %v1180_v13 = vadd.f32 %v1178_v12, %v1174_v11 }
0x12cc   :  { %2483 = vtanh.f32 %v1180_v13 }
0x12cd   :  { %2485 = vpow2.f32 %v1169_v26 }
0x12d6   :  { %v2484_v16 = vpop.eup %2483 }
0x12d7   :  { %1183 = vrot.lane.b32.xlu0 %v2484_v16, %s2562_s17  ;;  %v2486_v28 = vpop.eup %2485 }
0x12d8   :  { %v1171_v29 = vadd.f32 1.0, %v2486_v28 }
0x12da   :  { %2487 = vrcp.f32 %v1171_v29 }
0x12e4   :  { %v2488_v30 = vpop.eup %2487 }
0x1349   :  { %v1184_v31 = vpop.permute.xlu0 %1183 }
0x134a   :  { %v2864_v32 = vmul.f32 %v2488_v30, %v1184_v31 }
0x134c   :  { %2099 = vmatmul.mubr.msk.f32.vlgmr.msra.gmra.mrb[10].mxu0 %vm44_vm1, %v2864_v32 }
0x134d   :  { %2306 = vmatpush1.bf16.msra.mxu0 %v2614_v8  ;;  %1484 = vmatprep.mubr.f32.mxu0 %v2561_v3 }
0x134e   :  { %2308 = vmatprep.subr.bf16.mxu0 %v2616_v9 }
0x1351   :  { %2310 = vmatpush1.bf16.msra.mxu0 %v2633_v14 }
0x1352   :  { %2312 = vmatprep.subr.bf16.mxu0 %v2637_v15 }
0x1355   :  { %2314 = vmatpush1.bf16.msra.mxu0 %v2653_v21 }
0x1356   :  { %2316 = vmatprep.subr.bf16.mxu0 %v2657_v22 }
0x1359   :  { %2318 = vmatpush1.bf16.msra.mxu0 %v2668_v25 }
0x135a   :  { %2336 = vmatprep.subr.bf16.mxu0 %v2603_v4 }
0x141f   :  { %v1258_v33 = vpop.f32.mrb[10].mxu0 }
0x1420   :  { %v1260_v35 = vpop.f32.mrb[11].mxu0 }
0x1421   :  { %v1265_v36 = vcombine.low %v1258_v33, %v1260_v35 }
0x1423   :  { %v1267_v37 = vadd.f32 %v2098_v34, %v1265_v36 }
0x1425   :  { %v1268_v38 = vsub.f32 0.0, %v1267_v37  ;;  %1278 = vrot.lane.b32.xlu0 %v1267_v37, %s2562_s17  ;;  %v1275_v40 = vrot.slane %v1267_v37, 4 }
0x1427   :  { %v1269_v39 = vmul.f32 1.442695, %v1268_v38 }
0x1429   :  { %2489 = vpow2.f32 %v1269_v39 }
0x142a   :  { %2491 = vtanh.f32 %v1275_v40  ;;  %v2102_v40 = vld [vmem:[%s3071_s0 + $0x60] sm:$0xff] }
0x1433   :  { %v2490_v41 = vpop.eup %2489 }
0x1434   :  { %v1271_v42 = vadd.f32 1.0, %v2490_v41  ;;  %v2492_v43 = vpop.eup %2491 }
0x1436   :  { %2493 = vrcp.f32 %v1271_v42 }
0x1440   :  { %v2494_v44 = vpop.eup %2493 }
0x1441   :  { %v1289_v45 = vmul.f32 %v2494_v44, %v2492_v43  ;;  %v1288_v46 = vmul.f32 %v2494_v44, %v1180_v13 }
0x1443   :  { %1291 = vrot.lane.b32.xlu1 %v1289_v45, %s2562_s17 }
0x1497   :  { %v1279_v54 = vpop.permute.xlu0 %1278 }
0x1498   :  { %v1280_v55 = vrot.slane %v1279_v54, 4 }
0x149a   :  { %v1282_v56 = vsub.f32 0.0, %v1280_v55 }
0x149c   :  { %v1283_v58 = vmul.f32 1.442695, %v1282_v56 }
0x14b5   :  { %v1292_v47 = vpop.permute.xlu1 %1291 }
0x14b6   :  { %v1294_v48 = vadd.f32 %v1292_v47, %v1288_v46 }
0x14b8   :  { %2495 = vtanh.f32 %v1294_v48 }
0x14b9   :  { %2497 = vpow2.f32 %v1283_v58 }
0x14c2   :  { %v2496_v51 = vpop.eup %2495 }
0x14c3   :  { %1297 = vrot.lane.b32.xlu1 %v2496_v51, %s2562_s17  ;;  %v2498_v59 = vpop.eup %2497 }
0x14c4   :  { %v1285_v60 = vadd.f32 1.0, %v2498_v59 }
0x14c6   :  { %2499 = vrcp.f32 %v1285_v60 }
0x14d0   :  { %v2500_v61 = vpop.eup %2499 }
0x1535   :  { %v1298_v62 = vpop.permute.xlu1 %1297 }
0x1536   :  { %v2883_v63 = vmul.f32 %v2500_v61, %v1298_v62 }
0x1538   :  { %2101 = vmatmul.mubr.msk.f32.vlgmr.msra.gmra.mrb[10].mxu1 %vm44_vm1, %v2883_v63 }
0x1539   :  { %2322 = vmatpush1.bf16.msra.mxu1 %v2614_v8  ;;  %1598 = vmatprep.mubr.f32.mxu1 %v2561_v3 }
0x153a   :  { %2324 = vmatprep.subr.bf16.mxu1 %v2616_v9 }
0x153d   :  { %2326 = vmatpush1.bf16.msra.mxu1 %v2633_v14 }
0x153e   :  { %2328 = vmatprep.subr.bf16.mxu1 %v2637_v15 }
0x1541   :  { %2330 = vmatpush1.bf16.msra.mxu1 %v2653_v21 }
0x1542   :  { %2332 = vmatprep.subr.bf16.mxu1 %v2657_v22 }
0x1545   :  { %2334 = vmatpush1.bf16.msra.mxu1 %v2668_v25 }
0x1546   :  { %2352 = vmatprep.subr.bf16.mxu1 %v2603_v4 }
0x160b   :  { %v1372_v0 = vpop.f32.mrb[10].mxu1 }
0x160c   :  { %v1374_v2 = vpop.f32.mrb[11].mxu1 }
0x160d   :  { %v1379_v5 = vcombine.low %v1372_v0, %v1374_v2 }
0x160f   :  { %v1381_v6 = vadd.f32 %v2100_v1, %v1379_v5 }
0x1611   :  { %v1382_v7 = vsub.f32 0.0, %v1381_v6  ;;  %1392 = vrot.lane.b32.xlu1 %v1381_v6, %s2562_s17  ;;  %v1389_v11 = vrot.slane %v1381_v6, 4 }
0x1613   :  { %v1383_v10 = vmul.f32 1.442695, %v1382_v7 }
0x1615   :  { %2501 = vpow2.f32 %v1383_v10 }
0x1616   :  { %2503 = vtanh.f32 %v1389_v11 }
0x161f   :  { %v2502_v12 = vpop.eup %2501 }
0x1620   :  { %v1385_v13 = vadd.f32 1.0, %v2502_v12  ;;  %v2504_v16 = vpop.eup %2503  ;;  %v2104_v12 = vld [vmem:[%s3071_s0 + $0x68] sm:$0xff] }
0x1622   :  { %2505 = vrcp.f32 %v1385_v13 }
0x162c   :  { %v2506_v4 = vpop.eup %2505 }
0x162d   :  { %v1403_v17 = vmul.f32 %v2506_v4, %v2504_v16  ;;  %v1402_v18 = vmul.f32 %v2506_v4, %v1294_v48 }
0x162f   :  { %1405 = vrot.lane.b32.xlu0 %v1403_v17, %s2562_s17 }
0x1683   :  { %v1393_v29 = vpop.permute.xlu1 %1392 }
0x1684   :  { %v1394_v30 = vrot.slane %v1393_v29, 4 }
0x1686   :  { %v1396_v31 = vsub.f32 0.0, %v1394_v30 }
0x1688   :  { %v1397_v33 = vmul.f32 1.442695, %v1396_v31 }
0x16a1   :  { %v1406_v24 = vpop.permute.xlu0 %1405 }
0x16a2   :  { %v1408_v26 = vadd.f32 %v1406_v24, %v1402_v18 }
0x16a4   :  { %2507 = vtanh.f32 %v1408_v26 }
0x16a5   :  { %2509 = vpow2.f32 %v1397_v33 }
0x16ae   :  { %v2508_v28 = vpop.eup %2507 }
0x16af   :  { %1411 = vrot.lane.b32.xlu0 %v2508_v28, %s2562_s17  ;;  %v2510_v34 = vpop.eup %2509 }
0x16b0   :  { %v1399_v35 = vadd.f32 1.0, %v2510_v34 }
0x16b2   :  { %2511 = vrcp.f32 %v1399_v35 }
0x16bc   :  { %v2512_v36 = vpop.eup %2511 }
0x1721   :  { %v1412_v37 = vpop.permute.xlu0 %1411 }
0x1722   :  { %v2902_v38 = vmul.f32 %v2512_v36, %v1412_v37 }
0x1724   :  { %2103 = vmatmul.mubr.msk.f32.vlgmr.msra.gmra.mrb[12].mxu0 %vm44_vm1, %v2902_v38 }
0x1725   :  { %2338 = vmatpush1.bf16.msra.mxu0 %v2614_v8  ;;  %1712 = vmatprep.mubr.f32.mxu0 %v2561_v3 }
0x1726   :  { %2340 = vmatprep.subr.bf16.mxu0 %v2616_v9 }
0x1729   :  { %2342 = vmatpush1.bf16.msra.mxu0 %v2633_v14 }
0x172a   :  { %2344 = vmatprep.subr.bf16.mxu0 %v2637_v15 }
0x172d   :  { %2346 = vmatpush1.bf16.msra.mxu0 %v2653_v21 }
0x172e   :  { %2348 = vmatprep.subr.bf16.mxu0 %v2657_v22 }
0x1731   :  { %2350 = vmatpush1.bf16.msra.mxu0 %v2668_v25 }
0x17f7   :  { %v1486_v39 = vpop.f32.mrb[12].mxu0 }
0x17f8   :  { %v1488_v41 = vpop.f32.mrb[13].mxu0 }
0x17f9   :  { %v1493_v42 = vcombine.low %v1486_v39, %v1488_v41 }
0x17fb   :  { %v1495_v43 = vadd.f32 %v2102_v40, %v1493_v42  ;;  %v2106_v40 = vld [vmem:[%s3071_s0 + $0x70] sm:$0xff] }
0x17fd   :  { %v1496_v44 = vsub.f32 0.0, %v1495_v43  ;;  %1506 = vrot.lane.b32.xlu0 %v1495_v43, %s2562_s17  ;;  %v1503_v46 = vrot.slane %v1495_v43, 4 }
0x17ff   :  { %v1497_v45 = vmul.f32 1.442695, %v1496_v44 }
0x1801   :  { %2513 = vpow2.f32 %v1497_v45 }
0x1802   :  { %2515 = vtanh.f32 %v1503_v46 }
0x180b   :  { %v2514_v47 = vpop.eup %2513 }
0x180c   :  { %v1499_v48 = vadd.f32 1.0, %v2514_v47  ;;  %v2516_v51 = vpop.eup %2515 }
0x180e   :  { %2517 = vrcp.f32 %v1499_v48 }
0x1818   :  { %v2518_v54 = vpop.eup %2517 }
0x1819   :  { %v1517_v55 = vmul.f32 %v2518_v54, %v2516_v51  ;;  %v1516_v56 = vmul.f32 %v2518_v54, %v1408_v26 }
0x181b   :  { %1519 = vrot.lane.b32.xlu1 %v1517_v55, %s2562_s17 }
0x186f   :  { %v1507_v61 = vpop.permute.xlu0 %1506 }
0x1870   :  { %v1508_v62 = vrot.slane %v1507_v61, 4 }
0x1872   :  { %v1510_v0 = vsub.f32 0.0, %v1508_v62 }
0x1874   :  { %v1511_v1 = vmul.f32 1.442695, %v1510_v0 }
0x188d   :  { %v1520_v58 = vpop.permute.xlu1 %1519 }
0x188e   :  { %v1522_v59 = vadd.f32 %v1520_v58, %v1516_v56 }
0x1890   :  { %2519 = vtanh.f32 %v1522_v59 }
0x1891   :  { %2521 = vpow2.f32 %v1511_v1 }
0x189a   :  { %v2520_v60 = vpop.eup %2519 }
0x189b   :  { %1525 = vrot.lane.b32.xlu1 %v2520_v60, %s2562_s17  ;;  %v2522_v2 = vpop.eup %2521 }
0x189c   :  { %v1513_v5 = vadd.f32 1.0, %v2522_v2 }
0x189e   :  { %2523 = vrcp.f32 %v1513_v5 }
0x18a8   :  { %v2524_v6 = vpop.eup %2523 }
0x190d   :  { %v1526_v7 = vpop.permute.xlu1 %1525 }
0x190e   :  { %v2920_v10 = vmul.f32 %v2524_v6, %v1526_v7 }
0x1910   :  { %2105 = vmatmul.mubr.msk.f32.vlgmr.msra.gmra.mrb[12].mxu1 %vm44_vm1, %v2920_v10 }
0x1911   :  { %2354 = vmatpush1.bf16.msra.mxu1 %v2614_v8  ;;  %1826 = vmatprep.mubr.f32.mxu1 %v2561_v3 }
0x1912   :  { %2356 = vmatprep.subr.bf16.mxu1 %v2616_v9 }
0x1915   :  { %2358 = vmatpush1.bf16.msra.mxu1 %v2633_v14 }
0x1916   :  { %2360 = vmatprep.subr.bf16.mxu1 %v2637_v15 }
0x1919   :  { %2362 = vmatpush1.bf16.msra.mxu1 %v2653_v21 }
0x191a   :  { %2364 = vmatprep.subr.bf16.mxu1 %v2657_v22 }
0x191d   :  { %2366 = vmatpush1.bf16.msra.mxu1 %v2668_v25 }
0x19e3   :  { %v1600_v11 = vpop.f32.mrb[12].mxu1 }
0x19e4   :  { %v1602_v8 = vpop.f32.mrb[13].mxu1 }
0x19e5   :  { %v1607_v13 = vcombine.low %v1600_v11, %v1602_v8  ;;  %v2108_v8 = vld [vmem:[%s3071_s0 + $0x78] sm:$0xff] }
0x19e7   :  { %v1609_v3 = vadd.f32 %v2104_v12, %v1607_v13 }
0x19e9   :  { %v1610_v16 = vsub.f32 0.0, %v1609_v3  ;;  %1620 = vrot.lane.b32.xlu1 %v1609_v3, %s2562_s17  ;;  %v1617_v14 = vrot.slane %v1609_v3, 4 }
0x19eb   :  { %v1611_v9 = vmul.f32 1.442695, %v1610_v16 }
0x19ed   :  { %2525 = vpow2.f32 %v1611_v9 }
0x19ee   :  { %2527 = vtanh.f32 %v1617_v14 }
0x19f7   :  { %v2526_v15 = vpop.eup %2525 }
0x19f8   :  { %v1613_v21 = vadd.f32 1.0, %v2526_v15  ;;  %v2528_v22 = vpop.eup %2527 }
0x19fa   :  { %2529 = vrcp.f32 %v1613_v21 }
0x1a04   :  { %v2530_v25 = vpop.eup %2529 }
0x1a05   :  { %v1631_v4 = vmul.f32 %v2530_v25, %v2528_v22  ;;  %v1630_v17 = vmul.f32 %v2530_v25, %v1522_v59 }
0x1a07   :  { %1633 = vrot.lane.b32.xlu0 %v1631_v4, %s2562_s17 }
0x1a5b   :  { %v1621_v28 = vpop.permute.xlu1 %1620 }
0x1a5c   :  { %v1622_v29 = vrot.slane %v1621_v28, 4 }
0x1a5e   :  { %v1624_v30 = vsub.f32 0.0, %v1622_v29 }
0x1a60   :  { %v1625_v31 = vmul.f32 1.442695, %v1624_v30 }
0x1a79   :  { %v1634_v18 = vpop.permute.xlu0 %1633 }
0x1a7a   :  { %v1636_v24 = vadd.f32 %v1634_v18, %v1630_v17  ;;  %v2956_v18 = vld [vmem:[%s3072_s2] ss:$0 sm:$0xff] }
0x1a7b   :  { %v1894_v28 = vmul.f32 %v2956_v18, %v2864_v32  ;;  %v1895_v30 = vmul.f32 %v2956_v18, %v2883_v63 }
0x1a7c   :  { %2531 = vtanh.f32 %v1636_v24 }
0x1a7d   :  { %2533 = vpow2.f32 %v1625_v31  ;;  %v1928_v29 = vsel %vm22_vm0, %v1894_v28, 0.0  ;;  %v1931_v31 = vsel %vm22_vm0, %v1895_v30, 0.0 }
0x1a86   :  { %v2532_v26 = vpop.eup %2531 }
0x1a87   :  { %1639 = vrot.lane.b32.xlu0 %v2532_v26, %s2562_s17  ;;  %v2534_v33 = vpop.eup %2533 }
0x1a88   :  { %v1627_v34 = vadd.f32 1.0, %v2534_v33  ;;  %v1896_v33 = vmul.f32 %v2956_v18, %v2902_v38 }
0x1a8a   :  { %2535 = vrcp.f32 %v1627_v34  ;;  %v1897_v34 = vmul.f32 %v2956_v18, %v2920_v10 }
0x1a8c   :  { %v1937_v32 = vsel %vm22_vm0, %v1897_v34, 0.0 }
0x1a94   :  { %v2536_v35 = vpop.eup %2535 }
0x1af9   :  { %v1640_v36 = vpop.permute.xlu0 %1639 }
0x1afa   :  { %v2938_v37 = vmul.f32 %v2536_v35, %v1640_v36 }
0x1afc   :  { %2107 = vmatmul.mubr.msk.f32.vlgmr.msra.gmra.mrb[14].mxu0 %vm44_vm1, %v2938_v37  ;;  %v1898_v35 = vmul.f32 %v2956_v18, %v2938_v37 }
0x1afe   :  { %v1940_v63 = vsel %vm22_vm0, %v1898_v35, 0.0 }
0x1bcf   :  { %v1714_v39 = vpop.f32.mrb[14].mxu0 }
0x1bd0   :  { %v1716_v41 = vpop.f32.mrb[15].mxu0 }
0x1bd1   :  { %v1721_v42 = vcombine.low %v1714_v39, %v1716_v41 }
0x1bd3   :  { %v1723_v43 = vadd.f32 %v2106_v40, %v1721_v42  ;;  %v1886_v42 = vmul.f32 %v2956_v18, %v2712_v23 }
0x1bd5   :  { %v1724_v44 = vsub.f32 0.0, %v1723_v43  ;;  %1734 = vrot.lane.b32.xlu0 %v1723_v43, %s2562_s17  ;;  %v1731_v46 = vrot.slane %v1723_v43, 4  ;;  %v1904_v37 = vsel %vm22_vm0, %v1886_v42, 0.0  ;;  %v1893_v43 = vmul.f32 %v2956_v18, %v2845_v57 }
0x1bd7   :  { %v1725_v45 = vmul.f32 1.442695, %v1724_v44  ;;  %v1925_v44 = vsel %vm22_vm0, %v1893_v43, 0.0 }
0x1bd9   :  { %2537 = vpow2.f32 %v1725_v45  ;;  %v1887_v45 = vmul.f32 %v2956_v18, %v2731_v50 }
0x1bda   :  { %2539 = vtanh.f32 %v1731_v46 }
0x1bdb   :  { %v1907_v46 = vsel %vm22_vm0, %v1887_v45, 0.0 }
0x1be3   :  { %v2538_v47 = vpop.eup %2537 }
0x1be4   :  { %v1727_v48 = vadd.f32 1.0, %v2538_v47  ;;  %v2540_v51 = vpop.eup %2539  ;;  %v1888_v47 = vmul.f32 %v2956_v18, %v2750_v19 }
0x1be6   :  { %2541 = vrcp.f32 %v1727_v48  ;;  %v1910_v23 = vsel %vm22_vm0, %v1888_v47, 0.0  ;;  %v1889_v48 = vmul.f32 %v2956_v18, %v2769_v49 }
0x1be8   :  { %v1913_v57 = vsel %vm22_vm0, %v1889_v48, 0.0 }
0x1bf0   :  { %v2542_v54 = vpop.eup %2541 }
0x1bf1   :  { %v1745_v55 = vmul.f32 %v2542_v54, %v2540_v51  ;;  %v1744_v56 = vmul.f32 %v2542_v54, %v1636_v24  ;;  %v1885_v24 = vmul.f32 %v2956_v18, %v2693_v53  ;;  %v1934_v53 = vsel %vm22_vm0, %v1896_v33, 0.0 }
0x1bf2   :  { %v1890_v51 = vmul.f32 %v2956_v18, %v2788_v20  ;;  %v1891_v54 = vmul.f32 %v2956_v18, %v2807_v52 }
0x1bf3   :  { %1747 = vrot.lane.b32.xlu1 %v1745_v55, %s2562_s17  ;;  %v1901_v26 = vsel %vm22_vm0, %v1885_v24, 0.0  ;;  %v1892_v55 = vmul.f32 %v2956_v18, %v2826_v27 }
0x1bf4   :  { %v1916_v50 = vsel %vm22_vm0, %v1890_v51, 0.0  ;;  %v1919_v19 = vsel %vm22_vm0, %v1891_v54, 0.0 }
0x1bf5   :  { %v1922_v49 = vsel %vm22_vm0, %v1892_v55, 0.0 }
0x1c47   :  { %v1735_v61 = vpop.permute.xlu0 %1734 }
0x1c48   :  { %v1736_v62 = vrot.slane %v1735_v61, 4 }
0x1c4a   :  { %v1738_v0 = vsub.f32 0.0, %v1736_v62 }
0x1c4c   :  { %v1739_v1 = vmul.f32 1.442695, %v1738_v0 }
0x1c65   :  { %v1748_v58 = vpop.permute.xlu1 %1747 }
0x1c66   :  { %v1750_v59 = vadd.f32 %v1748_v58, %v1744_v56 }
0x1c68   :  { %2543 = vtanh.f32 %v1750_v59 }
0x1c69   :  { %2545 = vpow2.f32 %v1739_v1 }
0x1c72   :  { %v2544_v60 = vpop.eup %2543 }
0x1c73   :  { %1753 = vrot.lane.b32.xlu1 %v2544_v60, %s2562_s17  ;;  %v2546_v2 = vpop.eup %2545 }
0x1c74   :  { %v1741_v5 = vadd.f32 1.0, %v2546_v2 }
0x1c76   :  { %2547 = vrcp.f32 %v1741_v5 }
0x1c80   :  { %v2548_v6 = vpop.eup %2547 }
0x1ce5   :  { %v1754_v7 = vpop.permute.xlu1 %1753 }
0x1ce6   :  { %v1756_v11 = vmul.f32 %v2548_v6, %v1754_v7 }
0x1ce8   :  { %2109 = vmatmul.mubr.msk.f32.vlgmr.msra.gmra.mrb[14].mxu1 %vm44_vm1, %v1756_v11  ;;  %v1899_v36 = vmul.f32 %v2956_v18, %v1756_v11  ;;  %v1983_v11 = vlaneseq }
0x1cea   :  { %v1943_v38 = vsel %vm22_vm0, %v1899_v36, 0.0 }
0x1dbb   :  { %v1828_v12 = vpop.f32.mrb[14].mxu1 }
0x1dbc   :  { %v1830_v13 = vpop.f32.mrb[15].mxu1 }
0x1dbd   :  { %v1835_v3 = vcombine.low %v1828_v12, %v1830_v13  ;;  %v1986_v13 = vshrl.u32 %v1983_v11, 7 }
0x1dbf   :  { %v1837_v16 = vadd.f32 %v2108_v8, %v1835_v3  ;;  %v1984_v8 = vand.u32 127, %v1983_v11  ;;  %v3011_v3 = vstv %s3073_s3 }
0x1dc1   :  { %v1838_v9 = vsub.f32 0.0, %v1837_v16  ;;  %1848 = vrot.lane.b32.xlu1 %v1837_v16, %s2562_s17  ;;  %v1845_v15 = vrot.slane %v1837_v16, 4 }
0x1dc3   :  { %v1839_v14 = vmul.f32 1.442695, %v1838_v9 }
0x1dc5   :  { %2549 = vpow2.f32 %v1839_v14 }
0x1dc6   :  { %2551 = vtanh.f32 %v1845_v15 }
0x1dcf   :  { %v2550_v21 = vpop.eup %2549 }
0x1dd0   :  { %v1841_v22 = vadd.f32 1.0, %v2550_v21  ;;  %v2552_v25 = vpop.eup %2551  ;;  %v3015_v21 = vsub.s32 %v1984_v8, %v1986_v13 }
0x1dd2   :  { %2553 = vrcp.f32 %v1841_v22 }
0x1ddc   :  { %v2554_v4 = vpop.eup %2553 }
0x1ddd   :  { %v1859_v17 = vmul.f32 %v2554_v4, %v2552_v25  ;;  %v1858_v39 = vmul.f32 %v2554_v4, %v1750_v59 }
0x1ddf   :  { %1861 = vrot.lane.b32.xlu0 %v1859_v17, %s2562_s17 }
0x1de5   :  { %1902 = vadd.xlane.f32.xlu1 %v1901_v26 }
0x1de9   :  { %1929 = vadd.xlane.f32.xlu1 %v1928_v29 }
0x1ded   :  { %1932 = vadd.xlane.f32.xlu1 %v1931_v31 }
0x1df1   :  { %1935 = vadd.xlane.f32.xlu1 %v1934_v53 }
0x1df5   :  { %1938 = vadd.xlane.f32.xlu1 %v1937_v32 }
0x1df9   :  { %1941 = vadd.xlane.f32.xlu1 %v1940_v63 }
0x1dfd   :  { %1944 = vadd.xlane.f32.xlu1 %v1943_v38 }
0x1e33   :  { %v1849_v56 = vpop.permute.xlu1 %1848 }
0x1e34   :  { %v1850_v58 = vrot.slane %v1849_v56, 4 }
0x1e36   :  { %v1852_v59 = vsub.f32 0.0, %v1850_v58 }
0x1e38   :  { %v1853_v20 = vmul.f32 1.442695, %v1852_v59 }
0x1e51   :  { %v1862_v40 = vpop.permute.xlu0 %1861 }
0x1e52   :  { %v1864_v41 = vadd.f32 %v1862_v40, %v1858_v39 }
0x1e54   :  { %2555 = vtanh.f32 %v1864_v41 }
0x1e55   :  { %2557 = vpow2.f32 %v1853_v20 }
0x1e5e   :  { %v2556_v10 = vpop.eup %2555 }
0x1e5f   :  { %1867 = vrot.lane.b32.xlu0 %v2556_v10, %s2562_s17  ;;  %v2558_v60 = vpop.eup %2557 }
0x1e60   :  { %v1855_v61 = vadd.f32 1.0, %v2558_v60 }
0x1e62   :  { %2559 = vrcp.f32 %v1855_v61 }
0x1e6c   :  { %v2560_v52 = vpop.eup %2559 }
0x1e72   :  { %v1903_v16 = vpop.xlane.xlu1 %1902 }
0x1e73   :  { %v1951_v22 = vadd.f32 %v3011_v3, %v1903_v16 }
0x1e75   :  { %v1988_v28 = vrot.slane %v1951_v22, %v3015_v21 }
0x1e7e   :  { %1905 = vadd.xlane.f32.xlu0 %v1904_v37  ;;  %v1930_v37 = vpop.xlane.xlu1 %1929 }
0x1e82   :  { %1926 = vadd.xlane.f32.xlu0 %v1925_v44  ;;  %v1933_v43 = vpop.xlane.xlu1 %1932 }
0x1e83   :  { %v1961_v48 = vadd.f32 %v3011_v3, %v1933_v43 }
0x1e86   :  { %1908 = vadd.xlane.f32.xlu0 %v1907_v46  ;;  %v1936_v44 = vpop.xlane.xlu1 %1935  ;;  %v1960_v46 = vadd.f32 %v3011_v3, %v1930_v37 }
0x1e87   :  { %v1962_v51 = vadd.f32 %v3011_v3, %v1936_v44 }
0x1e89   :  { %v2032_v56 = vrot.slane %v1962_v51, %v3015_v21 }
0x1e8a   :  { %1911 = vadd.xlane.f32.xlu0 %v1910_v23  ;;  %v1939_v47 = vpop.xlane.xlu1 %1938 }
0x1e8b   :  { %v1963_v55 = vadd.f32 %v3011_v3, %v1939_v47 }
0x1e8d   :  { %v2036_v60 = vrot.slane %v1963_v55, %v3015_v21 }
0x1e8e   :  { %1914 = vadd.xlane.f32.xlu0 %v1913_v57  ;;  %v2024_v57 = vrot.slane %v1960_v46, %v3015_v21 }
0x1e92   :  { %1917 = vadd.xlane.f32.xlu0 %v1916_v50  ;;  %v1942_v50 = vpop.xlane.xlu1 %1941 }
0x1e93   :  { %v1964_v58 = vadd.f32 %v3011_v3, %v1942_v50 }
0x1e96   :  { %1920 = vadd.xlane.f32.xlu0 %v1919_v19  ;;  %v2028_v19 = vrot.slane %v1961_v48, %v3015_v21  ;;  %v1945_v59 = vpop.xlane.xlu1 %1944 }
0x1e97   :  { %v1965_v61 = vadd.f32 %v3011_v3, %v1945_v59 }
0x1e9a   :  { %1923 = vadd.xlane.f32.xlu0 %v1922_v49 }
0x1eb0   :  { %1874 = vrot.lane.b32.xlu0 %v1864_v41, %s2562_s17 }
0x1ed1   :  { %v1868_v62 = vpop.permute.xlu0 %1867 }
0x1ed2   :  { %v1870_v0 = vmul.f32 %v2560_v52, %v1868_v62  ;;  %v2040_v62 = vrot.slane %v1964_v58, %v3015_v21 }
0x1ed4   :  { %1872 = vst.msk [vmem:[#allocation2] sm:$0xf] %vm22_vm0, %v1870_v0  ;;  %v1900_v27 = vmul.f32 %v2956_v18, %v1870_v0 }
0x1ed6   :  { %v1946_v1 = vsel %vm22_vm0, %v1900_v27, 0.0 }
0x1ed7   :  { %1947 = vadd.xlane.f32.xlu1 %v1946_v1 }
0x1f0b   :  { %v1906_v2 = vpop.xlane.xlu0 %1905 }
0x1f0c   :  { %v1952_v9 = vadd.f32 %v3011_v3, %v1906_v2  ;;  %v2044_v2 = vrot.slane %v1965_v61, %v3015_v21 }
0x1f0e   :  { %v1992_v17 = vrot.slane %v1952_v9, %v3015_v21 }
0x1f0f   :  { %v1927_v5 = vpop.xlane.xlu0 %1926 }
0x1f10   :  { %v2050_v33 = vsel %vm2049_vm2, %v1992_v17, %v1988_v28  ;;  %v1959_v45 = vadd.f32 %v3011_v3, %v1927_v5 }
0x1f12   :  { %v2020_v23 = vrot.slane %v1959_v45, %v3015_v21 }
0x1f13   :  { %v1909_v6 = vpop.xlane.xlu0 %1908 }
0x1f14   :  { %v1953_v14 = vadd.f32 %v3011_v3, %v1909_v6  ;;  %v2063_v54 = vsel %vm2049_vm2, %v2024_v57, %v2020_v23 }
0x1f15   :  { %v2064_v49 = vsel %vm2051_vm3, %v2028_v19, %v2063_v54 }
0x1f16   :  { %v1996_v24 = vrot.slane %v1953_v14, %v3015_v21  ;;  %v2065_v20 = vsel %vm2053_vm4, %v2032_v56, %v2064_v49 }
0x1f17   :  { %v1912_v7 = vpop.xlane.xlu0 %1911  ;;  %v2066_v52 = vsel %vm2055_vm5, %v2036_v60, %v2065_v20 }
0x1f18   :  { %v1954_v25 = vadd.f32 %v3011_v3, %v1912_v7  ;;  %v2052_v34 = vsel %vm2051_vm3, %v1996_v24, %v2050_v33  ;;  %v2067_v1 = vsel %vm2057_vm6, %v2040_v62, %v2066_v52 }
0x1f19   :  { %v2068_v6 = vsel %vm2059_vm8, %v2044_v2, %v2067_v1 }
0x1f1a   :  { %v2000_v29 = vrot.slane %v1954_v25, %v3015_v21 }
0x1f1b   :  { %v1915_v12 = vpop.xlane.xlu0 %1914 }
0x1f1c   :  { %v1955_v4 = vadd.f32 %v3011_v3, %v1915_v12  ;;  %v2054_v63 = vsel %vm2053_vm4, %v2000_v29, %v2052_v34 }
0x1f1e   :  { %v2004_v31 = vrot.slane %v1955_v4, %v3015_v21 }
0x1f1f   :  { %v1918_v15 = vpop.xlane.xlu0 %1917 }
0x1f20   :  { %v1956_v18 = vadd.f32 %v3011_v3, %v1918_v15  ;;  %v2056_v38 = vsel %vm2055_vm5, %v2004_v31, %v2054_v63 }
0x1f22   :  { %v2008_v53 = vrot.slane %v1956_v18, %v3015_v21 }
0x1f23   :  { %v1921_v26 = vpop.xlane.xlu0 %1920 }
0x1f24   :  { %v1957_v30 = vadd.f32 %v3011_v3, %v1921_v26  ;;  %v2058_v39 = vsel %vm2057_vm6, %v2008_v53, %v2056_v38 }
0x1f26   :  { %v2012_v32 = vrot.slane %v1957_v30, %v3015_v21 }
0x1f27   :  { %v1924_v35 = vpop.xlane.xlu0 %1923 }
0x1f28   :  { %v1958_v36 = vadd.f32 %v3011_v3, %v1924_v35  ;;  %v2060_v41 = vsel %vm2059_vm8, %v2012_v32, %v2058_v39 }
0x1f2a   :  { %v2016_v40 = vrot.slane %v1958_v36, %v3015_v21 }
0x1f2b   :  { %v1875_v10 = vpop.permute.xlu0 %1874 }
0x1f2c   :  { %v2062_v42 = vsel %vm2061_vm7, %v2016_v40, %v2060_v41  ;;  %1877 = vst.msk [vmem:[#allocation3] sm:$0xf] %vm22_vm0, %v1875_v10 }
0x1f2d   :  { %2073 = vst.msk [vmem:[%s3074_s4] sm:$0xff] %vm2072_vm9, %v2062_v42 }
0x1f64   :  { %v1948_v0 = vpop.xlane.xlu1 %1947 }
0x1f65   :  { %v1966_v27 = vadd.f32 %v3011_v3, %v1948_v0 }
0x1f67   :  { %v2048_v5 = vrot.slane %v1966_v27, %v3015_v21 }
0x1f69   :  { %v2069_v7 = vsel %vm2061_vm7, %v2048_v5, %v2068_v6 }
0x1f6a   :  { %2074 = vst.msk [vmem:[%s3074_s4 + $0x8] sm:$0xff] %vm2072_vm9, %v2069_v7 }

</bundles_post_ra>
